<compile_context>
chip_gen: v7x
topology: tpu7x:2x2x1
jax: 0.10.0
libtpu: 0.0.40
codegen_flags: <defaults>
</compile_context>

<pallas_src>
import jax
import jax.numpy as jnp
import numpy as np
from jax.experimental import pallas as pl
from jax.experimental.pallas import tpu as pltpu


_BN_EPS = 1e-5
_CFG = [(3, 64), (64, 64), (64, 128), (128, 128)]
_VMEM_LIMIT = 32 * 1024 * 1024  # >= scoped default on v5e, == default v6e/v7x


def _divisor_tile(n, cap):
    t = min(n, cap)
    while t > 1 and n % t != 0:
        t -= 1
    return max(t, 1)


# ----------------------------------------------------------------------------
# Conv3x3 (pad=1) + folded BatchNorm + ReLU, row-tiled with a 2-row halo.
# ----------------------------------------------------------------------------
def _conv_bn_relu_kernel(x_ref, w_ref, shift_ref, o_ref):
    # x_ref:     (1, TH+2, W+2, Cin)  f32  zero-padded rows (2-row halo)
    # w_ref:     (9*Cin, Cout)        f32  BN-scale-folded weights, tap-major
    # shift_ref: (1, Cout)            f32  folded BN shift (incl. conv bias)
    # o_ref:     (1, TH, W, Cout)     f32
    th = o_ref.shape[1]
    tw = o_ref.shape[2]
    cin = x_ref.shape[3]
    tile = x_ref[0]                                   # (TH+2, W+2, Cin)

    # In-VMEM im2col: 9 shifted windows, concatenated on the lane axis.
    taps = []
    for dy in range(3):
        for dx in range(3):
            taps.append(tile[dy:dy + th, dx:dx + tw, :].reshape(th * tw, cin))
    patches = jnp.concatenate(taps, axis=-1)          # (TH*W, 9*Cin)

    # Single deep matmul on the MXU, f32 accumulation.
    acc = jnp.dot(patches, w_ref[...], preferred_element_type=jnp.float32)
    y = jnp.maximum(acc + shift_ref[...], 0.0)        # BN shift + ReLU in f32
    o_ref[0] = y.reshape(th, tw, -1).astype(o_ref.dtype)


def conv3x3_bn_relu(x, w, scale, shift, tile_h=None):
    # x: (N, H, W, Cin), w: (3, 3, Cin, Cout) HWIO, scale/shift: (Cout,)
    N, H, W, Cin = x.shape
    Cout = w.shape[-1]
    if tile_h is None:
        # 8 rows keeps VMEM small even at 224x224/Cin=128 while still giving
        # >=1792 matmul rows per grid step on ImageNet-sized inputs.
        tile_h = _divisor_tile(H, 8)
    nt = H // tile_h

    # Fold the BN scale into the conv weights (trace-time, tiny tensor).
    wf = (w * scale).reshape(9 * Cin, Cout).astype(jnp.float32)
    shift2 = shift.reshape(1, Cout).astype(jnp.float32)

    # Zero-pad and cut into row tiles with a 2-row halo (+2/tile_h rows of
    # duplication; avoids any 9x HBM im2col materialization).
    xp = jnp.pad(x.astype(jnp.float32), ((0, 0), (1, 1), (1, 1), (0, 0)))
    xt = jnp.stack([xp[:, i * tile_h:i * tile_h + tile_h + 2]
                    for i in range(nt)], axis=1)
    xt = xt.reshape(N * nt, tile_h + 2, W + 2, Cin)

    return pl.pallas_call(
        _conv_bn_relu_kernel,
        out_shape=jax.ShapeDtypeStruct((N, H, W, Cout), jnp.float32),
        grid=(N, nt),
        in_specs=[
            pl.BlockSpec((1, tile_h + 2, W + 2, Cin),
                         lambda n, t: (n * nt + t, 0, 0, 0)),
            pl.BlockSpec((9 * Cin, Cout), lambda n, t: (0, 0)),
            pl.BlockSpec((1, Cout), lambda n, t: (0, 0)),
        ],
        out_specs=pl.BlockSpec((1, tile_h, W, Cout),
                               lambda n, t: (n, t, 0, 0)),
        compiler_params=pltpu.CompilerParams(
            dimension_semantics=("parallel", "parallel"),
            vmem_limit_bytes=_VMEM_LIMIT),
    )(xt, wf, shift2)


# ----------------------------------------------------------------------------
# MaxPool2d(kernel_size=2, stride=2).
# The wrapper does a FREE row-major reshape (N,H,W,C)->(N,H,W/2,2C) so the
# W-pair sits on the lane axis; the kernel never needs strided gathers.
# ----------------------------------------------------------------------------
def _maxpool2x2_kernel(x_ref, o_ref):
    # x_ref: (1, 2*TP, Wo, 2*C)    o_ref: (1, TP, Wo, C)
    tp, wo, c = o_ref.shape[1], o_ref.shape[2], o_ref.shape[3]
    v = x_ref[0].reshape(tp, 2, wo, 2 * c)            # leading-dim split: free
    vh = jnp.max(v, axis=1)                           # max over the H pair
    o_ref[0] = jnp.maximum(vh[:, :, :c], vh[:, :, c:])  # max over the W pair


def maxpool2x2(x, tile_rows=None):
    # x: (N, H, W, C) -> (N, H//2, W//2, C)
    N, H, W, C = x.shape
    Ho, Wo = H // 2, W // 2
    if tile_rows is None:
        tile_rows = _divisor_tile(Ho, 64)
    nt = Ho // tile_rows
    xr = x.reshape(N, H, Wo, 2 * C)                   # free (contiguous)

    return pl.pallas_call(
        _maxpool2x2_kernel,
        out_shape=jax.ShapeDtypeStruct((N, Ho, Wo, C), x.dtype),
        grid=(N, nt),
        in_specs=[pl.BlockSpec((1, 2 * tile_rows, Wo, 2 * C),
                               lambda n, t: (n, t, 0, 0))],
        out_specs=pl.BlockSpec((1, tile_rows, Wo, C),
                               lambda n, t: (n, t, 0, 0)),
        compiler_params=pltpu.CompilerParams(
            dimension_semantics=("parallel", "parallel"),
            vmem_limit_bytes=_VMEM_LIMIT),
    )(xr)


# ----------------------------------------------------------------------------
# Parameters (deterministic synthetic init matching VGG13_bn features[0:14])
# ----------------------------------------------------------------------------
def init_params(key):
    params = []
    for i, (cin, cout) in enumerate(_CFG):
        ks = jax.random.split(jax.random.fold_in(key, i), 6)
        params.append(dict(
            w=0.1 * jax.random.normal(ks[0], (3, 3, cin, cout), jnp.float32),
            b=0.1 * jax.random.normal(ks[1], (cout,), jnp.float32),
            gamma=1.0 + 0.1 * jax.random.normal(ks[2], (cout,), jnp.float32),
            beta=0.1 * jax.random.normal(ks[3], (cout,), jnp.float32),
            mean=0.1 * jax.random.normal(ks[4], (cout,), jnp.float32),
            var=jax.random.uniform(ks[5], (cout,), jnp.float32, 0.5, 1.5),
        ))
    return params


def _fold_bn(p):
    inv = p["gamma"] / jnp.sqrt(p["var"] + _BN_EPS)
    scale = inv
    shift = p["beta"] + (p["b"] - p["mean"]) * inv
    return scale, shift


def convnet_forward(x_nchw, params):
    """CONVNet.forward: (N, 3, H, W) -> (N, 128, H//4, W//4)."""
    x = jnp.transpose(x_nchw, (0, 2, 3, 1)).astype(jnp.float32)   # NCHW->NHWC
    for i, p in enumerate(params):
        s, t = _fold_bn(p)
        x = conv3x3_bn_relu(x, p["w"], s, t)
        if i % 2 == 1:                                 # after conv2 / conv4
            x = maxpool2x2(x)
    return jnp.transpose(x, (0, 3, 1, 2))                         # NHWC->NCHW


# ----------------------------------------------------------------------------
# Pure-JAX (f32) reference for correctness check
# ----------------------------------------------------------------------------
def reference_forward(x_nchw, params):
    x = jnp.transpose(x_nchw, (0, 2, 3, 1))

    def conv(x, p):
        y = jax.lax.conv_general_dilated(
            x, p["w"], window_strides=(1, 1), padding="SAME",
            dimension_numbers=("NHWC", "HWIO", "NHWC"),
            precision=jax.lax.Precision.HIGHEST)
        s, t = _fold_bn(p)
        return jnp.maximum(y * s + t, 0.0)

    def pool(x):
        N, H, W, C = x.shape
        return jnp.max(x.reshape(N, H // 2, 2, W // 2, 2, C), axis=(2, 4))

    x = conv(x, params[0]); x = conv(x, params[1]); x = pool(x)
    x = conv(x, params[2]); x = conv(x, params[3]); x = pool(x)
    return jnp.transpose(x, (0, 3, 1, 2))


if __name__ == "__main__":
    key = jax.random.PRNGKey(0)
    params = init_params(jax.random.fold_in(key, 1))
    # small shapes: batch=2, 3 input channels (RGB), 16x16 spatial
    x = jax.random.normal(jax.random.fold_in(key, 2), (2, 3, 16, 16),
                          jnp.float32)

    out = jax.jit(lambda inp: convnet_forward(inp, params))(x)
    out = jax.block_until_ready(out)

    assert out.shape == (2, 128, 4, 4), out.shape
    ref = reference_forward(x, params)
    # f32 activations/weights with f32 MXU accumulation: only tiny
    # accumulation-order differences vs. the XLA conv reference remain.
    np.testing.assert_allclose(np.asarray(out), np.asarray(ref),
                               rtol=1e-2, atol=1e-2)
    print("KERNEL_OK")
</pallas_src>

<mosaic_0001>
module attributes {stable_mosaic.version = 11 : i64} {
  func.func @_conv_bn_relu_kernel(%arg0: i32, %arg1: i32, %arg2: memref<1x10x18x3xf32, #tpu.memory_space<vmem>>, %arg3: memref<27x64xf32, #tpu.memory_space<vmem>>, %arg4: memref<1x64xf32, #tpu.memory_space<vmem>>, %arg5: memref<1x8x16x64xf32, #tpu.memory_space<vmem>>) attributes {dimension_semantics = [#tpu.dimension_semantics<parallel>, #tpu.dimension_semantics<parallel>], iteration_bounds = array<i64: 2, 2>, scalar_prefetch = 0 : i64, scratch_operands = 0 : i64, tpu.core_type = #tpu.core_type<tc>, window_params = [{transform_indices = @transform_0, window_bounds = array<i64: 1, 10, 18, 3>}, {pipeline_mode = #tpu.pipeline_mode<synchronous>, transform_indices = @transform_1, window_bounds = array<i64: 27, 64>}, {pipeline_mode = #tpu.pipeline_mode<synchronous>, transform_indices = @transform_2, window_bounds = array<i64: 1, 64>}, {transform_indices = @transform_3, window_bounds = array<i64: 1, 8, 16, 64>}]} {
    %c0 = arith.constant 0 : index
    %c0_0 = arith.constant 0 : index
    %c0_1 = arith.constant 0 : index
    %c0_2 = arith.constant 0 : index
    %0 = vector.load %arg2[%c0, %c0_0, %c0_1, %c0_2] : memref<1x10x18x3xf32, #tpu.memory_space<vmem>>, vector<1x10x18x3xf32>
    %1 = vector.shape_cast %0 : vector<1x10x18x3xf32> to vector<10x18x3xf32>
    %2 = vector.extract_strided_slice %1 {offsets = [0, 0, 0], sizes = [8, 16, 3], strides = [1, 1, 1]} : vector<10x18x3xf32> to vector<8x16x3xf32>
    %3 = vector.shape_cast %2 : vector<8x16x3xf32> to vector<128x3xf32>
    %4 = vector.extract_strided_slice %1 {offsets = [0, 1, 0], sizes = [8, 16, 3], strides = [1, 1, 1]} : vector<10x18x3xf32> to vector<8x16x3xf32>
    %5 = vector.shape_cast %4 : vector<8x16x3xf32> to vector<128x3xf32>
    %6 = vector.extract_strided_slice %1 {offsets = [0, 2, 0], sizes = [8, 16, 3], strides = [1, 1, 1]} : vector<10x18x3xf32> to vector<8x16x3xf32>
    %7 = vector.shape_cast %6 : vector<8x16x3xf32> to vector<128x3xf32>
    %8 = vector.extract_strided_slice %1 {offsets = [1, 0, 0], sizes = [8, 16, 3], strides = [1, 1, 1]} : vector<10x18x3xf32> to vector<8x16x3xf32>
    %9 = vector.shape_cast %8 : vector<8x16x3xf32> to vector<128x3xf32>
    %10 = vector.extract_strided_slice %1 {offsets = [1, 1, 0], sizes = [8, 16, 3], strides = [1, 1, 1]} : vector<10x18x3xf32> to vector<8x16x3xf32>
    %11 = vector.shape_cast %10 : vector<8x16x3xf32> to vector<128x3xf32>
    %12 = vector.extract_strided_slice %1 {offsets = [1, 2, 0], sizes = [8, 16, 3], strides = [1, 1, 1]} : vector<10x18x3xf32> to vector<8x16x3xf32>
    %13 = vector.shape_cast %12 : vector<8x16x3xf32> to vector<128x3xf32>
    %14 = vector.extract_strided_slice %1 {offsets = [2, 0, 0], sizes = [8, 16, 3], strides = [1, 1, 1]} : vector<10x18x3xf32> to vector<8x16x3xf32>
    %15 = vector.shape_cast %14 : vector<8x16x3xf32> to vector<128x3xf32>
    %16 = vector.extract_strided_slice %1 {offsets = [2, 1, 0], sizes = [8, 16, 3], strides = [1, 1, 1]} : vector<10x18x3xf32> to vector<8x16x3xf32>
    %17 = vector.shape_cast %16 : vector<8x16x3xf32> to vector<128x3xf32>
    %18 = vector.extract_strided_slice %1 {offsets = [2, 2, 0], sizes = [8, 16, 3], strides = [1, 1, 1]} : vector<10x18x3xf32> to vector<8x16x3xf32>
    %19 = vector.shape_cast %18 : vector<8x16x3xf32> to vector<128x3xf32>
    %20 = tpu.concatenate %3, %5, %7, %9, %11, %13, %15, %17, %19 in 1 : vector<128x3xf32>, vector<128x3xf32>, vector<128x3xf32>, vector<128x3xf32>, vector<128x3xf32>, vector<128x3xf32>, vector<128x3xf32>, vector<128x3xf32>, vector<128x3xf32> -> vector<128x27xf32>
    %c0_3 = arith.constant 0 : index
    %c0_4 = arith.constant 0 : index
    %21 = vector.load %arg3[%c0_3, %c0_4] : memref<27x64xf32, #tpu.memory_space<vmem>>, vector<27x64xf32>
    %cst = arith.constant dense<0.000000e+00> : vector<128x64xf32>
    %22 = tpu.matmul %20, %21, %cst {dimension_numbers = #tpu.dot_dimension_numbers<[1], [0], [0], [1], [0, 0, 1, 1], [], []>} : vector<128x27xf32>, vector<27x64xf32>, vector<128x64xf32> -> vector<128x64xf32>
    %c0_5 = arith.constant 0 : index
    %c0_6 = arith.constant 0 : index
    %23 = vector.load %arg4[%c0_5, %c0_6] : memref<1x64xf32, #tpu.memory_space<vmem>>, vector<1x64xf32>
    %24 = vector.broadcast %23 : vector<1x64xf32> to vector<128x64xf32>
    %25 = arith.addf %22, %24 : vector<128x64xf32>
    %cst_7 = arith.constant 0.000000e+00 : f32
    %26 = vector.broadcast %cst_7 : f32 to vector<128x64xf32>
    %27 = arith.maximumf %25, %26 : vector<128x64xf32>
    %28 = vector.shape_cast %27 : vector<128x64xf32> to vector<8x16x64xf32>
    %c0_8 = arith.constant 0 : index
    %c0_9 = arith.constant 0 : index
    %c0_10 = arith.constant 0 : index
    %c0_11 = arith.constant 0 : index
    %29 = vector.load %arg5[%c0_8, %c0_9, %c0_10, %c0_11] : memref<1x8x16x64xf32, #tpu.memory_space<vmem>>, vector<1x8x16x64xf32>
    %30 = vector.shape_cast %29 : vector<1x8x16x64xf32> to vector<8x16x64xf32>
    %31 = vector.shape_cast %28 : vector<8x16x64xf32> to vector<1x8x16x64xf32>
    tpu.vector_store %arg5[%c0_8, %c0_9, %c0_10, %c0_11], %31 {strides = array<i32>} : memref<1x8x16x64xf32, #tpu.memory_space<vmem>>, vector<1x8x16x64xf32>,
    return
  }
  func.func @transform_0(%arg0: i32, %arg1: i32) -> (i32, i32, i32, i32) {
    %c2_i32 = arith.constant 2 : i32
    %0 = arith.muli %arg0, %c2_i32 : i32
    %1 = arith.addi %0, %arg1 : i32
    %c0_i32 = arith.constant 0 : i32
    %c0_i32_0 = arith.constant 0 : i32
    %c0_i32_1 = arith.constant 0 : i32
    %c0_i32_2 = arith.constant 0 : i32
    return %1, %c0_i32, %c0_i32_0, %c0_i32_1 : i32, i32, i32, i32
  }
  func.func @transform_1(%arg0: i32, %arg1: i32) -> (i32, i32) {
    %c0_i32 = arith.constant 0 : i32
    %c0_i32_0 = arith.constant 0 : i32
    %c0_i32_1 = arith.constant 0 : i32
    return %c0_i32, %c0_i32_0 : i32, i32
  }
  func.func @transform_2(%arg0: i32, %arg1: i32) -> (i32, i32) {
    %c0_i32 = arith.constant 0 : i32
    %c0_i32_0 = arith.constant 0 : i32
    %c0_i32_1 = arith.constant 0 : i32
    return %c0_i32, %c0_i32_0 : i32, i32
  }
  func.func @transform_3(%arg0: i32, %arg1: i32) -> (i32, i32, i32, i32) {
    %c0_i32 = arith.constant 0 : i32
    %c0_i32_0 = arith.constant 0 : i32
    %c0_i32_1 = arith.constant 0 : i32
    return %arg0, %arg1, %c0_i32, %c0_i32_0 : i32, i32, i32, i32
  }
}

module attributes {stable_mosaic.version = 11 : i64} {
  func.func @_conv_bn_relu_kernel(%arg0: i32, %arg1: i32, %arg2: memref<1x10x18x64xf32, #tpu.memory_space<vmem>>, %arg3: memref<576x64xf32, #tpu.memory_space<vmem>>, %arg4: memref<1x64xf32, #tpu.memory_space<vmem>>, %arg5: memref<1x8x16x64xf32, #tpu.memory_space<vmem>>) attributes {dimension_semantics = [#tpu.dimension_semantics<parallel>, #tpu.dimension_semantics<parallel>], iteration_bounds = array<i64: 2, 2>, scalar_prefetch = 0 : i64, scratch_operands = 0 : i64, tpu.core_type = #tpu.core_type<tc>, window_params = [{transform_indices = @transform_0, window_bounds = array<i64: 1, 10, 18, 64>}, {pipeline_mode = #tpu.pipeline_mode<synchronous>, transform_indices = @transform_1, window_bounds = array<i64: 576, 64>}, {pipeline_mode = #tpu.pipeline_mode<synchronous>, transform_indices = @transform_2, window_bounds = array<i64: 1, 64>}, {transform_indices = @transform_3, window_bounds = array<i64: 1, 8, 16, 64>}]} {
    %c0 = arith.constant 0 : index
    %c0_0 = arith.constant 0 : index
    %c0_1 = arith.constant 0 : index
    %c0_2 = arith.constant 0 : index
    %0 = vector.load %arg2[%c0, %c0_0, %c0_1, %c0_2] : memref<1x10x18x64xf32, #tpu.memory_space<vmem>>, vector<1x10x18x64xf32>
    %1 = vector.shape_cast %0 : vector<1x10x18x64xf32> to vector<10x18x64xf32>
    %2 = vector.extract_strided_slice %1 {offsets = [0, 0, 0], sizes = [8, 16, 64], strides = [1, 1, 1]} : vector<10x18x64xf32> to vector<8x16x64xf32>
    %3 = vector.shape_cast %2 : vector<8x16x64xf32> to vector<128x64xf32>
    %4 = vector.extract_strided_slice %1 {offsets = [0, 1, 0], sizes = [8, 16, 64], strides = [1, 1, 1]} : vector<10x18x64xf32> to vector<8x16x64xf32>
    %5 = vector.shape_cast %4 : vector<8x16x64xf32> to vector<128x64xf32>
    %6 = vector.extract_strided_slice %1 {offsets = [0, 2, 0], sizes = [8, 16, 64], strides = [1, 1, 1]} : vector<10x18x64xf32> to vector<8x16x64xf32>
    %7 = vector.shape_cast %6 : vector<8x16x64xf32> to vector<128x64xf32>
    %8 = vector.extract_strided_slice %1 {offsets = [1, 0, 0], sizes = [8, 16, 64], strides = [1, 1, 1]} : vector<10x18x64xf32> to vector<8x16x64xf32>
    %9 = vector.shape_cast %8 : vector<8x16x64xf32> to vector<128x64xf32>
    %10 = vector.extract_strided_slice %1 {offsets = [1, 1, 0], sizes = [8, 16, 64], strides = [1, 1, 1]} : vector<10x18x64xf32> to vector<8x16x64xf32>
    %11 = vector.shape_cast %10 : vector<8x16x64xf32> to vector<128x64xf32>
    %12 = vector.extract_strided_slice %1 {offsets = [1, 2, 0], sizes = [8, 16, 64], strides = [1, 1, 1]} : vector<10x18x64xf32> to vector<8x16x64xf32>
    %13 = vector.shape_cast %12 : vector<8x16x64xf32> to vector<128x64xf32>
    %14 = vector.extract_strided_slice %1 {offsets = [2, 0, 0], sizes = [8, 16, 64], strides = [1, 1, 1]} : vector<10x18x64xf32> to vector<8x16x64xf32>
    %15 = vector.shape_cast %14 : vector<8x16x64xf32> to vector<128x64xf32>
    %16 = vector.extract_strided_slice %1 {offsets = [2, 1, 0], sizes = [8, 16, 64], strides = [1, 1, 1]} : vector<10x18x64xf32> to vector<8x16x64xf32>
    %17 = vector.shape_cast %16 : vector<8x16x64xf32> to vector<128x64xf32>
    %18 = vector.extract_strided_slice %1 {offsets = [2, 2, 0], sizes = [8, 16, 64], strides = [1, 1, 1]} : vector<10x18x64xf32> to vector<8x16x64xf32>
    %19 = vector.shape_cast %18 : vector<8x16x64xf32> to vector<128x64xf32>
    %20 = tpu.concatenate %3, %5, %7, %9, %11, %13, %15, %17, %19 in 1 : vector<128x64xf32>, vector<128x64xf32>, vector<128x64xf32>, vector<128x64xf32>, vector<128x64xf32>, vector<128x64xf32>, vector<128x64xf32>, vector<128x64xf32>, vector<128x64xf32> -> vector<128x576xf32>
    %c0_3 = arith.constant 0 : index
    %c0_4 = arith.constant 0 : index
    %21 = vector.load %arg3[%c0_3, %c0_4] : memref<576x64xf32, #tpu.memory_space<vmem>>, vector<576x64xf32>
    %cst = arith.constant dense<0.000000e+00> : vector<128x64xf32>
    %22 = tpu.matmul %20, %21, %cst {dimension_numbers = #tpu.dot_dimension_numbers<[1], [0], [0], [1], [0, 0, 1, 1], [], []>} : vector<128x576xf32>, vector<576x64xf32>, vector<128x64xf32> -> vector<128x64xf32>
    %c0_5 = arith.constant 0 : index
    %c0_6 = arith.constant 0 : index
    %23 = vector.load %arg4[%c0_5, %c0_6] : memref<1x64xf32, #tpu.memory_space<vmem>>, vector<1x64xf32>
    %24 = vector.broadcast %23 : vector<1x64xf32> to vector<128x64xf32>
    %25 = arith.addf %22, %24 : vector<128x64xf32>
    %cst_7 = arith.constant 0.000000e+00 : f32
    %26 = vector.broadcast %cst_7 : f32 to vector<128x64xf32>
    %27 = arith.maximumf %25, %26 : vector<128x64xf32>
    %28 = vector.shape_cast %27 : vector<128x64xf32> to vector<8x16x64xf32>
    %c0_8 = arith.constant 0 : index
    %c0_9 = arith.constant 0 : index
    %c0_10 = arith.constant 0 : index
    %c0_11 = arith.constant 0 : index
    %29 = vector.load %arg5[%c0_8, %c0_9, %c0_10, %c0_11] : memref<1x8x16x64xf32, #tpu.memory_space<vmem>>, vector<1x8x16x64xf32>
    %30 = vector.shape_cast %29 : vector<1x8x16x64xf32> to vector<8x16x64xf32>
    %31 = vector.shape_cast %28 : vector<8x16x64xf32> to vector<1x8x16x64xf32>
    tpu.vector_store %arg5[%c0_8, %c0_9, %c0_10, %c0_11], %31 {strides = array<i32>} : memref<1x8x16x64xf32, #tpu.memory_space<vmem>>, vector<1x8x16x64xf32>,
    return
  }
  func.func @transform_0(%arg0: i32, %arg1: i32) -> (i32, i32, i32, i32) {
    %c2_i32 = arith.constant 2 : i32
    %0 = arith.muli %arg0, %c2_i32 : i32
    %1 = arith.addi %0, %arg1 : i32
    %c0_i32 = arith.constant 0 : i32
    %c0_i32_0 = arith.constant 0 : i32
    %c0_i32_1 = arith.constant 0 : i32
    %c0_i32_2 = arith.constant 0 : i32
    return %1, %c0_i32, %c0_i32_0, %c0_i32_1 : i32, i32, i32, i32
  }
  func.func @transform_1(%arg0: i32, %arg1: i32) -> (i32, i32) {
    %c0_i32 = arith.constant 0 : i32
    %c0_i32_0 = arith.constant 0 : i32
    %c0_i32_1 = arith.constant 0 : i32
    return %c0_i32, %c0_i32_0 : i32, i32
  }
  func.func @transform_2(%arg0: i32, %arg1: i32) -> (i32, i32) {
    %c0_i32 = arith.constant 0 : i32
    %c0_i32_0 = arith.constant 0 : i32
    %c0_i32_1 = arith.constant 0 : i32
    return %c0_i32, %c0_i32_0 : i32, i32
  }
  func.func @transform_3(%arg0: i32, %arg1: i32) -> (i32, i32, i32, i32) {
    %c0_i32 = arith.constant 0 : i32
    %c0_i32_0 = arith.constant 0 : i32
    %c0_i32_1 = arith.constant 0 : i32
    return %arg0, %arg1, %c0_i32, %c0_i32_0 : i32, i32, i32, i32
  }
}

module attributes {stable_mosaic.version = 11 : i64} {
  func.func @_maxpool2x2_kernel(%arg0: i32, %arg1: i32, %arg2: memref<1x16x8x128xf32, #tpu.memory_space<vmem>>, %arg3: memref<1x8x8x64xf32, #tpu.memory_space<vmem>>) attributes {dimension_semantics = [#tpu.dimension_semantics<parallel>, #tpu.dimension_semantics<parallel>], iteration_bounds = array<i64: 2, 1>, scalar_prefetch = 0 : i64, scratch_operands = 0 : i64, tpu.core_type = #tpu.core_type<tc>, window_params = [{transform_indices = @transform_0, window_bounds = array<i64: 1, 16, 8, 128>}, {transform_indices = @transform_1, window_bounds = array<i64: 1, 8, 8, 64>}]} {
    %c0 = arith.constant 0 : index
    %c0_0 = arith.constant 0 : index
    %c0_1 = arith.constant 0 : index
    %c0_2 = arith.constant 0 : index
    %0 = vector.load %arg2[%c0, %c0_0, %c0_1, %c0_2] : memref<1x16x8x128xf32, #tpu.memory_space<vmem>>, vector<1x16x8x128xf32>
    %1 = vector.shape_cast %0 : vector<1x16x8x128xf32> to vector<16x8x128xf32>
    %2 = vector.shape_cast %1 : vector<16x8x128xf32> to vector<8x2x8x128xf32>
    %cst = arith.constant dense<0xFF800000> : vector<8x8x128xf32>
    %3 = vector.multi_reduction <maximumf>, %2, %cst [1] : vector<8x2x8x128xf32> to vector<8x8x128xf32>
    %4 = vector.extract_strided_slice %3 {offsets = [0, 0, 0], sizes = [8, 8, 64], strides = [1, 1, 1]} : vector<8x8x128xf32> to vector<8x8x64xf32>
    %5 = vector.extract_strided_slice %3 {offsets = [0, 0, 64], sizes = [8, 8, 64], strides = [1, 1, 1]} : vector<8x8x128xf32> to vector<8x8x64xf32>
    %6 = arith.maximumf %4, %5 : vector<8x8x64xf32>
    %c0_3 = arith.constant 0 : index
    %c0_4 = arith.constant 0 : index
    %c0_5 = arith.constant 0 : index
    %c0_6 = arith.constant 0 : index
    %7 = vector.load %arg3[%c0_3, %c0_4, %c0_5, %c0_6] : memref<1x8x8x64xf32, #tpu.memory_space<vmem>>, vector<1x8x8x64xf32>
    %8 = vector.shape_cast %7 : vector<1x8x8x64xf32> to vector<8x8x64xf32>
    %9 = vector.shape_cast %6 : vector<8x8x64xf32> to vector<1x8x8x64xf32>
    tpu.vector_store %arg3[%c0_3, %c0_4, %c0_5, %c0_6], %9 {strides = array<i32>} : memref<1x8x8x64xf32, #tpu.memory_space<vmem>>, vector<1x8x8x64xf32>,
    return
  }
  func.func @transform_0(%arg0: i32, %arg1: i32) -> (i32, i32, i32, i32) {
    %c0_i32 = arith.constant 0 : i32
    %c0_i32_0 = arith.constant 0 : i32
    %c0_i32_1 = arith.constant 0 : i32
    return %arg0, %arg1, %c0_i32, %c0_i32_0 : i32, i32, i32, i32
  }
  func.func @transform_1(%arg0: i32, %arg1: i32) -> (i32, i32, i32, i32) {
    %c0_i32 = arith.constant 0 : i32
    %c0_i32_0 = arith.constant 0 : i32
    %c0_i32_1 = arith.constant 0 : i32
    return %arg0, %arg1, %c0_i32, %c0_i32_0 : i32, i32, i32, i32
  }
}

module attributes {stable_mosaic.version = 11 : i64} {
  func.func @_conv_bn_relu_kernel(%arg0: i32, %arg1: i32, %arg2: memref<1x10x10x64xf32, #tpu.memory_space<vmem>>, %arg3: memref<576x128xf32, #tpu.memory_space<vmem>>, %arg4: memref<1x128xf32, #tpu.memory_space<vmem>>, %arg5: memref<1x8x8x128xf32, #tpu.memory_space<vmem>>) attributes {dimension_semantics = [#tpu.dimension_semantics<parallel>, #tpu.dimension_semantics<parallel>], iteration_bounds = array<i64: 2, 1>, scalar_prefetch = 0 : i64, scratch_operands = 0 : i64, tpu.core_type = #tpu.core_type<tc>, window_params = [{transform_indices = @transform_0, window_bounds = array<i64: 1, 10, 10, 64>}, {pipeline_mode = #tpu.pipeline_mode<synchronous>, transform_indices = @transform_1, window_bounds = array<i64: 576, 128>}, {pipeline_mode = #tpu.pipeline_mode<synchronous>, transform_indices = @transform_2, window_bounds = array<i64: 1, 128>}, {transform_indices = @transform_3, window_bounds = array<i64: 1, 8, 8, 128>}]} {
    %c0 = arith.constant 0 : index
    %c0_0 = arith.constant 0 : index
    %c0_1 = arith.constant 0 : index
    %c0_2 = arith.constant 0 : index
    %0 = vector.load %arg2[%c0, %c0_0, %c0_1, %c0_2] : memref<1x10x10x64xf32, #tpu.memory_space<vmem>>, vector<1x10x10x64xf32>
    %1 = vector.shape_cast %0 : vector<1x10x10x64xf32> to vector<10x10x64xf32>
    %2 = vector.extract_strided_slice %1 {offsets = [0, 0, 0], sizes = [8, 8, 64], strides = [1, 1, 1]} : vector<10x10x64xf32> to vector<8x8x64xf32>
    %3 = vector.shape_cast %2 : vector<8x8x64xf32> to vector<64x64xf32>
    %4 = vector.extract_strided_slice %1 {offsets = [0, 1, 0], sizes = [8, 8, 64], strides = [1, 1, 1]} : vector<10x10x64xf32> to vector<8x8x64xf32>
    %5 = vector.shape_cast %4 : vector<8x8x64xf32> to vector<64x64xf32>
    %6 = vector.extract_strided_slice %1 {offsets = [0, 2, 0], sizes = [8, 8, 64], strides = [1, 1, 1]} : vector<10x10x64xf32> to vector<8x8x64xf32>
    %7 = vector.shape_cast %6 : vector<8x8x64xf32> to vector<64x64xf32>
    %8 = vector.extract_strided_slice %1 {offsets = [1, 0, 0], sizes = [8, 8, 64], strides = [1, 1, 1]} : vector<10x10x64xf32> to vector<8x8x64xf32>
    %9 = vector.shape_cast %8 : vector<8x8x64xf32> to vector<64x64xf32>
    %10 = vector.extract_strided_slice %1 {offsets = [1, 1, 0], sizes = [8, 8, 64], strides = [1, 1, 1]} : vector<10x10x64xf32> to vector<8x8x64xf32>
    %11 = vector.shape_cast %10 : vector<8x8x64xf32> to vector<64x64xf32>
    %12 = vector.extract_strided_slice %1 {offsets = [1, 2, 0], sizes = [8, 8, 64], strides = [1, 1, 1]} : vector<10x10x64xf32> to vector<8x8x64xf32>
    %13 = vector.shape_cast %12 : vector<8x8x64xf32> to vector<64x64xf32>
    %14 = vector.extract_strided_slice %1 {offsets = [2, 0, 0], sizes = [8, 8, 64], strides = [1, 1, 1]} : vector<10x10x64xf32> to vector<8x8x64xf32>
    %15 = vector.shape_cast %14 : vector<8x8x64xf32> to vector<64x64xf32>
    %16 = vector.extract_strided_slice %1 {offsets = [2, 1, 0], sizes = [8, 8, 64], strides = [1, 1, 1]} : vector<10x10x64xf32> to vector<8x8x64xf32>
    %17 = vector.shape_cast %16 : vector<8x8x64xf32> to vector<64x64xf32>
    %18 = vector.extract_strided_slice %1 {offsets = [2, 2, 0], sizes = [8, 8, 64], strides = [1, 1, 1]} : vector<10x10x64xf32> to vector<8x8x64xf32>
    %19 = vector.shape_cast %18 : vector<8x8x64xf32> to vector<64x64xf32>
    %20 = tpu.concatenate %3, %5, %7, %9, %11, %13, %15, %17, %19 in 1 : vector<64x64xf32>, vector<64x64xf32>, vector<64x64xf32>, vector<64x64xf32>, vector<64x64xf32>, vector<64x64xf32>, vector<64x64xf32>, vector<64x64xf32>, vector<64x64xf32> -> vector<64x576xf32>
    %c0_3 = arith.constant 0 : index
    %c0_4 = arith.constant 0 : index
    %21 = vector.load %arg3[%c0_3, %c0_4] : memref<576x128xf32, #tpu.memory_space<vmem>>, vector<576x128xf32>
    %cst = arith.constant dense<0.000000e+00> : vector<64x128xf32>
    %22 = tpu.matmul %20, %21, %cst {dimension_numbers = #tpu.dot_dimension_numbers<[1], [0], [0], [1], [0, 0, 1, 1], [], []>} : vector<64x576xf32>, vector<576x128xf32>, vector<64x128xf32> -> vector<64x128xf32>
    %c0_5 = arith.constant 0 : index
    %c0_6 = arith.constant 0 : index
    %23 = vector.load %arg4[%c0_5, %c0_6] : memref<1x128xf32, #tpu.memory_space<vmem>>, vector<1x128xf32>
    %24 = vector.broadcast %23 : vector<1x128xf32> to vector<64x128xf32>
    %25 = arith.addf %22, %24 : vector<64x128xf32>
    %cst_7 = arith.constant 0.000000e+00 : f32
    %26 = vector.broadcast %cst_7 : f32 to vector<64x128xf32>
    %27 = arith.maximumf %25, %26 : vector<64x128xf32>
    %28 = vector.shape_cast %27 : vector<64x128xf32> to vector<8x8x128xf32>
    %c0_8 = arith.constant 0 : index
    %c0_9 = arith.constant 0 : index
    %c0_10 = arith.constant 0 : index
    %c0_11 = arith.constant 0 : index
    %29 = vector.load %arg5[%c0_8, %c0_9, %c0_10, %c0_11] : memref<1x8x8x128xf32, #tpu.memory_space<vmem>>, vector<1x8x8x128xf32>
    %30 = vector.shape_cast %29 : vector<1x8x8x128xf32> to vector<8x8x128xf32>
    %31 = vector.shape_cast %28 : vector<8x8x128xf32> to vector<1x8x8x128xf32>
    tpu.vector_store %arg5[%c0_8, %c0_9, %c0_10, %c0_11], %31 {strides = array<i32>} : memref<1x8x8x128xf32, #tpu.memory_space<vmem>>, vector<1x8x8x128xf32>,
    return
  }
  func.func @transform_0(%arg0: i32, %arg1: i32) -> (i32, i32, i32, i32) {
    %c1_i32 = arith.constant 1 : i32
    %0 = arith.muli %arg0, %c1_i32 : i32
    %1 = arith.addi %0, %arg1 : i32
    %c0_i32 = arith.constant 0 : i32
    %c0_i32_0 = arith.constant 0 : i32
    %c0_i32_1 = arith.constant 0 : i32
    %c0_i32_2 = arith.constant 0 : i32
    return %1, %c0_i32, %c0_i32_0, %c0_i32_1 : i32, i32, i32, i32
  }
  func.func @transform_1(%arg0: i32, %arg1: i32) -> (i32, i32) {
    %c0_i32 = arith.constant 0 : i32
    %c0_i32_0 = arith.constant 0 : i32
    %c0_i32_1 = arith.constant 0 : i32
    return %c0_i32, %c0_i32_0 : i32, i32
  }
  func.func @transform_2(%arg0: i32, %arg1: i32) -> (i32, i32) {
    %c0_i32 = arith.constant 0 : i32
    %c0_i32_0 = arith.constant 0 : i32
    %c0_i32_1 = arith.constant 0 : i32
    return %c0_i32, %c0_i32_0 : i32, i32
  }
  func.func @transform_3(%arg0: i32, %arg1: i32) -> (i32, i32, i32, i32) {
    %c0_i32 = arith.constant 0 : i32
    %c0_i32_0 = arith.constant 0 : i32
    %c0_i32_1 = arith.constant 0 : i32
    return %arg0, %arg1, %c0_i32, %c0_i32_0 : i32, i32, i32, i32
  }
}

module attributes {stable_mosaic.version = 11 : i64} {
  func.func @_conv_bn_relu_kernel(%arg0: i32, %arg1: i32, %arg2: memref<1x10x10x128xf32, #tpu.memory_space<vmem>>, %arg3: memref<1152x128xf32, #tpu.memory_space<vmem>>, %arg4: memref<1x128xf32, #tpu.memory_space<vmem>>, %arg5: memref<1x8x8x128xf32, #tpu.memory_space<vmem>>) attributes {dimension_semantics = [#tpu.dimension_semantics<parallel>, #tpu.dimension_semantics<parallel>], iteration_bounds = array<i64: 2, 1>, scalar_prefetch = 0 : i64, scratch_operands = 0 : i64, tpu.core_type = #tpu.core_type<tc>, window_params = [{transform_indices = @transform_0, window_bounds = array<i64: 1, 10, 10, 128>}, {pipeline_mode = #tpu.pipeline_mode<synchronous>, transform_indices = @transform_1, window_bounds = array<i64: 1152, 128>}, {pipeline_mode = #tpu.pipeline_mode<synchronous>, transform_indices = @transform_2, window_bounds = array<i64: 1, 128>}, {transform_indices = @transform_3, window_bounds = array<i64: 1, 8, 8, 128>}]} {
    %c0 = arith.constant 0 : index
    %c0_0 = arith.constant 0 : index
    %c0_1 = arith.constant 0 : index
    %c0_2 = arith.constant 0 : index
    %0 = vector.load %arg2[%c0, %c0_0, %c0_1, %c0_2] : memref<1x10x10x128xf32, #tpu.memory_space<vmem>>, vector<1x10x10x128xf32>
    %1 = vector.shape_cast %0 : vector<1x10x10x128xf32> to vector<10x10x128xf32>
    %2 = vector.extract_strided_slice %1 {offsets = [0, 0, 0], sizes = [8, 8, 128], strides = [1, 1, 1]} : vector<10x10x128xf32> to vector<8x8x128xf32>
    %3 = vector.shape_cast %2 : vector<8x8x128xf32> to vector<64x128xf32>
    %4 = vector.extract_strided_slice %1 {offsets = [0, 1, 0], sizes = [8, 8, 128], strides = [1, 1, 1]} : vector<10x10x128xf32> to vector<8x8x128xf32>
    %5 = vector.shape_cast %4 : vector<8x8x128xf32> to vector<64x128xf32>
    %6 = vector.extract_strided_slice %1 {offsets = [0, 2, 0], sizes = [8, 8, 128], strides = [1, 1, 1]} : vector<10x10x128xf32> to vector<8x8x128xf32>
    %7 = vector.shape_cast %6 : vector<8x8x128xf32> to vector<64x128xf32>
    %8 = vector.extract_strided_slice %1 {offsets = [1, 0, 0], sizes = [8, 8, 128], strides = [1, 1, 1]} : vector<10x10x128xf32> to vector<8x8x128xf32>
    %9 = vector.shape_cast %8 : vector<8x8x128xf32> to vector<64x128xf32>
    %10 = vector.extract_strided_slice %1 {offsets = [1, 1, 0], sizes = [8, 8, 128], strides = [1, 1, 1]} : vector<10x10x128xf32> to vector<8x8x128xf32>
    %11 = vector.shape_cast %10 : vector<8x8x128xf32> to vector<64x128xf32>
    %12 = vector.extract_strided_slice %1 {offsets = [1, 2, 0], sizes = [8, 8, 128], strides = [1, 1, 1]} : vector<10x10x128xf32> to vector<8x8x128xf32>
    %13 = vector.shape_cast %12 : vector<8x8x128xf32> to vector<64x128xf32>
    %14 = vector.extract_strided_slice %1 {offsets = [2, 0, 0], sizes = [8, 8, 128], strides = [1, 1, 1]} : vector<10x10x128xf32> to vector<8x8x128xf32>
    %15 = vector.shape_cast %14 : vector<8x8x128xf32> to vector<64x128xf32>
    %16 = vector.extract_strided_slice %1 {offsets = [2, 1, 0], sizes = [8, 8, 128], strides = [1, 1, 1]} : vector<10x10x128xf32> to vector<8x8x128xf32>
    %17 = vector.shape_cast %16 : vector<8x8x128xf32> to vector<64x128xf32>
    %18 = vector.extract_strided_slice %1 {offsets = [2, 2, 0], sizes = [8, 8, 128], strides = [1, 1, 1]} : vector<10x10x128xf32> to vector<8x8x128xf32>
    %19 = vector.shape_cast %18 : vector<8x8x128xf32> to vector<64x128xf32>
    %20 = tpu.concatenate %3, %5, %7, %9, %11, %13, %15, %17, %19 in 1 : vector<64x128xf32>, vector<64x128xf32>, vector<64x128xf32>, vector<64x128xf32>, vector<64x128xf32>, vector<64x128xf32>, vector<64x128xf32>, vector<64x128xf32>, vector<64x128xf32> -> vector<64x1152xf32>
    %c0_3 = arith.constant 0 : index
    %c0_4 = arith.constant 0 : index
    %21 = vector.load %arg3[%c0_3, %c0_4] : memref<1152x128xf32, #tpu.memory_space<vmem>>, vector<1152x128xf32>
    %cst = arith.constant dense<0.000000e+00> : vector<64x128xf32>
    %22 = tpu.matmul %20, %21, %cst {dimension_numbers = #tpu.dot_dimension_numbers<[1], [0], [0], [1], [0, 0, 1, 1], [], []>} : vector<64x1152xf32>, vector<1152x128xf32>, vector<64x128xf32> -> vector<64x128xf32>
    %c0_5 = arith.constant 0 : index
    %c0_6 = arith.constant 0 : index
    %23 = vector.load %arg4[%c0_5, %c0_6] : memref<1x128xf32, #tpu.memory_space<vmem>>, vector<1x128xf32>
    %24 = vector.broadcast %23 : vector<1x128xf32> to vector<64x128xf32>
    %25 = arith.addf %22, %24 : vector<64x128xf32>
    %cst_7 = arith.constant 0.000000e+00 : f32
    %26 = vector.broadcast %cst_7 : f32 to vector<64x128xf32>
    %27 = arith.maximumf %25, %26 : vector<64x128xf32>
    %28 = vector.shape_cast %27 : vector<64x128xf32> to vector<8x8x128xf32>
    %c0_8 = arith.constant 0 : index
    %c0_9 = arith.constant 0 : index
    %c0_10 = arith.constant 0 : index
    %c0_11 = arith.constant 0 : index
    %29 = vector.load %arg5[%c0_8, %c0_9, %c0_10, %c0_11] : memref<1x8x8x128xf32, #tpu.memory_space<vmem>>, vector<1x8x8x128xf32>
    %30 = vector.shape_cast %29 : vector<1x8x8x128xf32> to vector<8x8x128xf32>
    %31 = vector.shape_cast %28 : vector<8x8x128xf32> to vector<1x8x8x128xf32>
    tpu.vector_store %arg5[%c0_8, %c0_9, %c0_10, %c0_11], %31 {strides = array<i32>} : memref<1x8x8x128xf32, #tpu.memory_space<vmem>>, vector<1x8x8x128xf32>,
    return
  }
  func.func @transform_0(%arg0: i32, %arg1: i32) -> (i32, i32, i32, i32) {
    %c1_i32 = arith.constant 1 : i32
    %0 = arith.muli %arg0, %c1_i32 : i32
    %1 = arith.addi %0, %arg1 : i32
    %c0_i32 = arith.constant 0 : i32
    %c0_i32_0 = arith.constant 0 : i32
    %c0_i32_1 = arith.constant 0 : i32
    %c0_i32_2 = arith.constant 0 : i32
    return %1, %c0_i32, %c0_i32_0, %c0_i32_1 : i32, i32, i32, i32
  }
  func.func @transform_1(%arg0: i32, %arg1: i32) -> (i32, i32) {
    %c0_i32 = arith.constant 0 : i32
    %c0_i32_0 = arith.constant 0 : i32
    %c0_i32_1 = arith.constant 0 : i32
    return %c0_i32, %c0_i32_0 : i32, i32
  }
  func.func @transform_2(%arg0: i32, %arg1: i32) -> (i32, i32) {
    %c0_i32 = arith.constant 0 : i32
    %c0_i32_0 = arith.constant 0 : i32
    %c0_i32_1 = arith.constant 0 : i32
    return %c0_i32, %c0_i32_0 : i32, i32
  }
  func.func @transform_3(%arg0: i32, %arg1: i32) -> (i32, i32, i32, i32) {
    %c0_i32 = arith.constant 0 : i32
    %c0_i32_0 = arith.constant 0 : i32
    %c0_i32_1 = arith.constant 0 : i32
    return %arg0, %arg1, %c0_i32, %c0_i32_0 : i32, i32, i32, i32
  }
}

module attributes {stable_mosaic.version = 11 : i64} {
  func.func @_maxpool2x2_kernel(%arg0: i32, %arg1: i32, %arg2: memref<1x8x4x256xf32, #tpu.memory_space<vmem>>, %arg3: memref<1x4x4x128xf32, #tpu.memory_space<vmem>>) attributes {dimension_semantics = [#tpu.dimension_semantics<parallel>, #tpu.dimension_semantics<parallel>], iteration_bounds = array<i64: 2, 1>, scalar_prefetch = 0 : i64, scratch_operands = 0 : i64, tpu.core_type = #tpu.core_type<tc>, window_params = [{transform_indices = @transform_0, window_bounds = array<i64: 1, 8, 4, 256>}, {transform_indices = @transform_1, window_bounds = array<i64: 1, 4, 4, 128>}]} {
    %c0 = arith.constant 0 : index
    %c0_0 = arith.constant 0 : index
    %c0_1 = arith.constant 0 : index
    %c0_2 = arith.constant 0 : index
    %0 = vector.load %arg2[%c0, %c0_0, %c0_1, %c0_2] : memref<1x8x4x256xf32, #tpu.memory_space<vmem>>, vector<1x8x4x256xf32>
    %1 = vector.shape_cast %0 : vector<1x8x4x256xf32> to vector<8x4x256xf32>
    %2 = vector.shape_cast %1 : vector<8x4x256xf32> to vector<4x2x4x256xf32>
    %cst = arith.constant dense<0xFF800000> : vector<4x4x256xf32>
    %3 = vector.multi_reduction <maximumf>, %2, %cst [1] : vector<4x2x4x256xf32> to vector<4x4x256xf32>
    %4 = vector.extract_strided_slice %3 {offsets = [0, 0, 0], sizes = [4, 4, 128], strides = [1, 1, 1]} : vector<4x4x256xf32> to vector<4x4x128xf32>
    %5 = vector.extract_strided_slice %3 {offsets = [0, 0, 128], sizes = [4, 4, 128], strides = [1, 1, 1]} : vector<4x4x256xf32> to vector<4x4x128xf32>
    %6 = arith.maximumf %4, %5 : vector<4x4x128xf32>
    %c0_3 = arith.constant 0 : index
    %c0_4 = arith.constant 0 : index
    %c0_5 = arith.constant 0 : index
    %c0_6 = arith.constant 0 : index
    %7 = vector.load %arg3[%c0_3, %c0_4, %c0_5, %c0_6] : memref<1x4x4x128xf32, #tpu.memory_space<vmem>>, vector<1x4x4x128xf32>
    %8 = vector.shape_cast %7 : vector<1x4x4x128xf32> to vector<4x4x128xf32>
    %9 = vector.shape_cast %6 : vector<4x4x128xf32> to vector<1x4x4x128xf32>
    tpu.vector_store %arg3[%c0_3, %c0_4, %c0_5, %c0_6], %9 {strides = array<i32>} : memref<1x4x4x128xf32, #tpu.memory_space<vmem>>, vector<1x4x4x128xf32>,
    return
  }
  func.func @transform_0(%arg0: i32, %arg1: i32) -> (i32, i32, i32, i32) {
    %c0_i32 = arith.constant 0 : i32
    %c0_i32_0 = arith.constant 0 : i32
    %c0_i32_1 = arith.constant 0 : i32
    return %arg0, %arg1, %c0_i32, %c0_i32_0 : i32, i32, i32, i32
  }
  func.func @transform_1(%arg0: i32, %arg1: i32) -> (i32, i32, i32, i32) {
    %c0_i32 = arith.constant 0 : i32
    %c0_i32_0 = arith.constant 0 : i32
    %c0_i32_1 = arith.constant 0 : i32
    return %arg0, %arg1, %c0_i32, %c0_i32_0 : i32, i32, i32, i32
  }
}

</mosaic_0001>

<bundles_post_ra>
// kernel: _lambda_.6
= control target key start
LH: loop header
LB: loop body
LE: loop exit
PB: predicated region body
PF: predicated region fallthrough
CT: control target
= control target key end

     0   :  { %s1442_s12 = smov 0   ;;  %s1444_s13 = smov 0   ;;  %s2179_s0 = inlined_call_operand.vmem [shape: f32[4,10,18,3], index: 0, kind: input, shape index: {}]   ;;  %s2180_s1 = inlined_call_operand.vmem [shape: f32[27,64], index: 1, kind: input, shape index: {}]   ;;  %s2181_s2 = inlined_call_operand.vmem [shape: f32[1,64], index: 2, kind: input, shape index: {}]   ;;  %s2182_s3 = inlined_call_operand.vmem [shape: f32[2,16,16,64], index: 3, kind: output, shape index: {}]  }
   0x1   :  { %s1446_s14 = smov 0   ;;  %s1448_s15 = smov 0  }
   0x2   :  { %s1450_s16 = smov 0  }
   0x3 LB: > { %s22_s17 = sadd.s32 1, %s1403_s14  ;;  %s25_s18 = sadd.s32 1, %s1407_s15  ;;  %s1411_s16 = sphi %s1450_s16, %s13_s16   ;;  %s1407_s15 = sphi %s1448_s15, %s2213_s15   ;;  %s1403_s14 = sphi %s1446_s14, %s2212_s14   ;;  %s1399_s13 = sphi %s1444_s13, %s2211_s13   ;;  %s1395_s12 = sphi %s1442_s12, %s2210_s12  }
   0x4   : > { %p23_p0 = scmp.ge.s32.totalorder %s22_s17, 2  ;;  %p1230_p1 = scmp.ge.s32.totalorder %s1411_s16, 1 }
   0x5   : > { %p159_p2 = scmp.lt.s32.totalorder %s1411_s16, 5 }
   0x6   : > { %s2215_s17 = smov (%p23_p0, %s22_s17), 0  ;;  %s2217_s18 = smov (!%p23_p0, %s25_s18), %s1407_s15 }
   0x7   : > { %p160_p3 = pnand %p1230_p1, %p159_p2  ;;  %p27_p4 = scmp.ge.s32.totalorder %s2217_s18, 2 }
   0x9   : > { %s2219_s18 = smov (%p27_p4, %s2217_s18), 0  ;;  %163 = sbr.rel (%p160_p3) target bundleno = 615 (0x267), region = 32 }
  0x10   : > { %s1231_s19 = sshll.u32 %s1399_s13, 1  ;;  %vm264_vm0 = vcmask 1046528   ;;  %s1413_s25 = smov 3   ;;  %vm305_vm1 = vcmask 1045504   ;;  %vm952_vm2 = vcmask 1042432   ;;  %vm1421_vm3 = vmmov 1  }
  0x11   : > { %s191_s20 = sadd.s32 %s1395_s12, %s1231_s19  ;;  %s1414_s26 = smov 6   ;;  %vm1314_vm4 = vmpackc.low %vm952_vm2, %vm1421_vm3  ;;  %vm756_vm5 = vcmask 23552   ;;  %vm773_vm6 = vcmask 48128   ;;  %vm790_vm7 = vcmask 72704   ;;  %vm807_vm8 = vcmask 97280  }
  0x12   : > { %p192_p5 = scmp.lt.s32.totalorder %s191_s20, 3  ;;  %s1415_s27 = smov 9   ;;  %vm824_vm9 = vcmask 121856   ;;  %vm841_vm10 = vcmask 146432   ;;  %vm858_vm11 = vcmask 171008   ;;  %vm875_vm12 = vcmask 195584  }
  0x13   : > { %s1416_s28 = smov 12   ;;  %s1417_s29 = smov 15   ;;  %vm903_vm13 = vcmask 220160   ;;  %vm1117_vm14 = vcmask 523264  }
  0x14   : > { %s2221_s20 = smov (!%p192_p5, %s191_s20), 3  ;;  %s1418_s30 = smov 18  }
  0x15   : > { %s1323_s21 = smul.u32 240, %s2221_s20  ;;  %s1419_s4 = smov 21  }
  0x16   : > { %s1420_s20 = smov 24   ;;  %p200_p6 = scmp.lt.s32.totalorder %s1399_s13, 1 }
  0x17   : > { %s1481_s24 = scalar_lea.vmem %s2179_s0, %s1323_s21  ;;  %s1233_s21 = sshll.u32 %s1395_s12, 3 }
  0x18   : > { %v1484_v0 = vld [vmem:[%s1481_s24 + $0x8] sm:$0xff]  ;;  %v212_v1 = vld [vmem:[%s1481_s24 + $0x10] sm:$0x3]  ;;  %v1488_v2 = vld [vmem:[%s1481_s24] sm:$0xff]  ;;  %p202_p7 = scmp.lt.s32.totalorder %s1233_s21, 15  ;;  %s2223_s13 = smov (!%p200_p6, %s1399_s13), 1 }
  0x19   : > { %v266_v3 = vrot.slane %v1484_v0, 1  ;;  %v268_v4 = vrot.slane %v212_v1, 1  ;;  %v265_v5 = vrot.slane %v1488_v2, 1  ;;  %v1493_v6 = vld [vmem:[%s1481_s24 + $0x68] sm:$0xff]  ;;  %v224_v7 = vld [vmem:[%s1481_s24 + $0x70] sm:$0x3] }
  0x1a   : > { %v286_v8 = vrot.slane %v1493_v6, 1  ;;  %v288_v9 = vrot.slane %v224_v7, 1  ;;  %v1498_v10 = vld [vmem:[%s1481_s24 + $0x60] sm:$0xff]  ;;  %v327_v14 = vrot.slane %v1493_v6, 2  ;;  %v306_v15 = vrot.slane %v1488_v2, 2  ;;  %v1534_v26 = vld [vmem:[%s1481_s24 + $0x78] sm:$0xff] }
  0x1b   : > { %v269_v11 = vsel %vm264_vm0, %v266_v3, %v268_v4  ;;  %v267_v12 = vsel %vm264_vm0, %v265_v5, %v266_v3  ;;  %v285_v13 = vrot.slane %v1498_v10, 1  ;;  %v326_v18 = vrot.slane %v1498_v10, 2  ;;  %v1537_v27 = vld [vmem:[%s1481_s24 + $0x18] sm:$0xff]  ;;  %v1540_v28 = vld [vmem:[%s1481_s24 + $0x80] sm:$0xff]  ;;  %v227_v36 = vld [vmem:[%s1481_s24 + $0x88] sm:$0x3] }
  0x1c   : > { %374 = vrot.lane.b32.xlu1 %v269_v11, %s1413_s25  ;;  %372 = vrot.lane.b32.xlu0 %v267_v12, %s1413_s25  ;;  %v1508_v16 = vsel %vm264_vm0, %v286_v8, %v288_v9  ;;  %v307_v19 = vrot.slane %v1484_v0, 2  ;;  %v329_v22 = vrot.slane %v224_v7, 2  ;;  %v309_v23 = vrot.slane %v212_v1, 2  ;;  %v1543_v29 = vld [vmem:[%s1481_s24 + $0x20] sm:$0xff]  ;;  %v215_v37 = vld [vmem:[%s1481_s24 + $0x28] sm:$0x3] }
  0x1d   : > { %v1511_v17 = vsel %vm264_vm0, %v285_v13, %v286_v8  ;;  %v1520_v20 = vsel %vm305_vm1, %v326_v18, %v327_v14  ;;  %v290_v30 = vrot.slane %v1534_v26, 1  ;;  %v291_v31 = vrot.slane %v1540_v28, 1  ;;  %v1601_v52 = vld [vmem:[%s1481_s24 + $0x90] sm:$0xff]  ;;  %v1614_v54 = vld [vmem:[%s1481_s24 + $0x98] sm:$0xff]  ;;  %v230_v62 = vld [vmem:[%s1481_s24 + $0xa0] sm:$0x3] }
  0x1e   : > { %v308_v21 = vsel %vm305_vm1, %v306_v15, %v307_v19  ;;  %v1527_v24 = vsel %vm305_vm1, %v327_v14, %v329_v22  ;;  %v310_v25 = vsel %vm305_vm1, %v307_v19, %v309_v23  ;;  %v270_v32 = vrot.slane %v1537_v27, 1  ;;  %v1604_v53 = vld [vmem:[%s1481_s24 + $0x30] sm:$0xff]  ;;  %v1617_v55 = vld [vmem:[%s1481_s24 + $0x38] sm:$0xff]  ;;  %v218_v63 = vld [vmem:[%s1481_s24 + $0x40] sm:$0x3]  ;;  %s2225_s21 = smov (!%p202_p7, %s1233_s21), 15 }
  0x1f   : > { %v271_v33 = vrot.slane %v1543_v29, 1  ;;  %v1558_v34 = vsel %vm264_vm0, %v290_v30, %v291_v31  ;;  %v293_v38 = vrot.slane %v227_v36, 1  ;;  %v273_v39 = vrot.slane %v215_v37, 1  ;;  %2196 = vst [vmem:[#allocation6_spill] sm:$0xff] %v1617_v55  ;;  %v892_v12 = vld [vmem:[%s2180_s1] sm:$0xff]  ;;  %v893_v13 = vld [vmem:[%s2180_s1 + $0x8] sm:$0xff] }
  0x20   : > { %390 = vrot.lane.b32.xlu1 %v1508_v16, %s1413_s25  ;;  %388 = vrot.lane.b32.xlu0 %v1511_v17, %s1413_s25  ;;  %2192 = vst [vmem:[#allocation2_spill] sm:$0xff] %v1558_v34  ;;  %v331_v40 = vrot.slane %v1534_v26, 2  ;;  %v332_v41 = vrot.slane %v1540_v28, 2  ;;  %v311_v44 = vrot.slane %v1537_v27, 2  ;;  %v312_v45 = vrot.slane %v1543_v29, 2  ;;  %v894_v19 = vld [vmem:[%s2180_s1 + $0x10] sm:$0xff] }
  0x21   : > { %v272_v35 = vsel %vm264_vm0, %v270_v32, %v271_v33  ;;  %v1572_v42 = vsel %vm264_vm0, %v291_v31, %v293_v38  ;;  %v274_v43 = vsel %vm264_vm0, %v271_v33, %v273_v39  ;;  %v334_v48 = vrot.slane %v227_v36, 2  ;;  %v1684_v32 = vld [vmem:[%s1481_s24 + $0xa8] sm:$0xff]  ;;  %s1234_s22 = sshll.u32 %s2225_s21, 1  ;;  %s1235_s23 = sshll.u32 %s2223_s13, 5 }
  0x22   : > { %2193 = vst [vmem:[#allocation3_spill] sm:$0xff] %v1572_v42  ;;  %v1581_v46 = vsel %vm305_vm1, %v331_v40, %v332_v41  ;;  %v313_v47 = vsel %vm305_vm1, %v311_v44, %v312_v45  ;;  %v314_v49 = vrot.slane %v215_v37, 2  ;;  %v295_v56 = vrot.slane %v1601_v52, 1  ;;  %2197 = vst [vmem:[#allocation7_spill] sm:$0xff] %v1684_v32  ;;  %v1687_v33 = vld [vmem:[%s1481_s24 + $0x48] sm:$0xff] }
  0x23   : > { %2194 = vst [vmem:[#allocation4_spill] sm:$0xff] %v1581_v46  ;;  %v1594_v50 = vsel %vm305_vm1, %v332_v41, %v334_v48  ;;  %v296_v57 = vrot.slane %v1614_v54, 1  ;;  %v275_v58 = vrot.slane %v1604_v53, 1  ;;  %v276_v59 = vrot.slane %v1617_v55, 1  ;;  %2198 = vst [vmem:[#allocation8_spill] sm:$0xff] %v1687_v33  ;;  %v1708_v41 = vld [vmem:[%s1481_s24 + $0xb0] sm:$0xff] }
  0x24   : > { %436 = vrot.lane.b32.xlu1 %v1520_v20, %s1414_s26  ;;  %420 = vrot.lane.b32.xlu0 %v308_v21, %s1414_s26  ;;  %2195 = vst [vmem:[#allocation5_spill] sm:$0xff] %v1594_v50  ;;  %v315_v51 = vsel %vm305_vm1, %v312_v45, %v314_v49  ;;  %v298_v1 = vrot.slane %v230_v62, 1  ;;  %v278_v3 = vrot.slane %v218_v63, 1  ;;  %v336_v4 = vrot.slane %v1601_v52, 2  ;;  %v895_v21 = vld [vmem:[%s2180_s1 + $0x18] sm:$0x7] }
  0x25   : > { %v297_v60 = vsel %vm264_vm0, %v295_v56, %v296_v57  ;;  %v277_v61 = vsel %vm264_vm0, %v275_v58, %v276_v59  ;;  %v337_v5 = vrot.slane %v1614_v54, 2  ;;  %v316_v9 = vrot.slane %v1604_v53, 2  ;;  %2199 = vst [vmem:[#allocation9_spill] sm:$0xff] %v1708_v41 }
  0x26   : > { %v299_v7 = vsel %vm264_vm0, %v296_v57, %v298_v1  ;;  %v279_v8 = vsel %vm264_vm0, %v276_v59, %v278_v3  ;;  %v317_v11 = vrot.slane %v1617_v55, 2  ;;  %v1309_v14 = vpack.c.bf16 %v893_v13, %v892_v12 }
  0x27   : > { %v338_v15 = vsel %vm305_vm1, %v336_v4, %v337_v5  ;;  %v1313_v22 = vpack.c.bf16 %v895_v21, %v894_v19  ;;  %v339_v23 = vrot.slane %v230_v62, 2  ;;  %v300_v44 = vrot.slane %v1684_v32, 1 }
  0x28   : > { %438 = vrot.lane.b32.xlu1 %v1527_v24, %s1414_s26  ;;  %422 = vrot.lane.b32.xlu0 %v310_v25, %s1414_s26  ;;  %v318_v18 = vsel %vm305_vm1, %v316_v9, %v317_v11  ;;  %v319_v25 = vrot.slane %v218_v63, 2  ;;  %v301_v45 = vrot.slane %v1708_v41, 1  ;;  %v341_v9 = vrot.slane %v1684_v32, 2 }
  0x29   : > { %1310 = vmatprep.subr.bf16.mxu0 %v1309_v14  ;;  %1319 = vmatprep.subr.bf16.mxu1 %v1309_v14  ;;  %v340_v30 = vsel %vm305_vm1, %v337_v5, %v339_v23  ;;  %v321_v12 = vrot.slane %v1687_v33, 2 }
  0x2a   : > { %1312 = vmatpush3.bf16.msra.mxu0 %v1309_v14  ;;  %1321 = vmatpush3.bf16.msra.mxu1 %v1309_v14  ;;  %v320_v31 = vsel %vm305_vm1, %v317_v11, %v319_v25  ;;  %v302_v56 = vsel %vm264_vm0, %v300_v44, %v301_v45  ;;  %v342_v11 = vrot.slane %v1708_v41, 2 }
  0x2b   : > { %1315 = vmatprep.subr.msk.bf16.mxu0 %vm1314_vm4, %v1313_v22  ;;  %1320 = vmatprep.subr.msk.bf16.mxu1 %vm1314_vm4, %v1313_v22 }
  0x2c   : > { %484 = vrot.lane.b32.xlu1 %v1534_v26, %s1415_s27  ;;  %468 = vrot.lane.b32.xlu0 %v1537_v27, %s1415_s27 }
  0x2e   : > { %1318 = vmatpush3.bf16.msk.msra.mxu0 %vm1314_vm4, %v1313_v22  ;;  %1322 = vmatpush3.bf16.msk.msra.mxu1 %vm1314_vm4, %v1313_v22 }
  0x30   : > { %486 = vrot.lane.b32.xlu1 %v1540_v28, %s1415_s27  ;;  %470 = vrot.lane.b32.xlu0 %v1543_v29, %s1415_s27 }
  0x34   : > { %532 = vrot.lane.b32.xlu1 %v1558_v34, %s1416_s28  ;;  %516 = vrot.lane.b32.xlu0 %v272_v35, %s1416_s28 }
  0x38   : > { %392 = vrot.lane.b32.xlu1 %v1558_v34, %s1413_s25  ;;  %376 = vrot.lane.b32.xlu0 %v272_v35, %s1413_s25 }
  0x3c   : > { %534 = vrot.lane.b32.xlu1 %v1572_v42, %s1416_s28  ;;  %518 = vrot.lane.b32.xlu0 %v274_v43, %s1416_s28 }
  0x40   : > { %580 = vrot.lane.b32.xlu1 %v1581_v46, %s1417_s29  ;;  %564 = vrot.lane.b32.xlu0 %v313_v47, %s1417_s29 }
  0x44   : > { %394 = vrot.lane.b32.xlu1 %v1572_v42, %s1413_s25  ;;  %378 = vrot.lane.b32.xlu0 %v274_v43, %s1413_s25  ;;  %v1711_v43 = vld [vmem:[%s1481_s24 + $0x50] sm:$0xff] }
  0x45   : > { %2200 = vst [vmem:[#allocation10_spill] sm:$0xff] %v1711_v43  ;;  %v281_v48 = vrot.slane %v1711_v43, 1  ;;  %v322_v13 = vrot.slane %v1711_v43, 2 }
  0x47   : > { %v323_v19 = vsel %vm305_vm1, %v321_v12, %v322_v13 }
  0x48   : > { %440 = vrot.lane.b32.xlu1 %v1581_v46, %s1414_s26  ;;  %424 = vrot.lane.b32.xlu0 %v313_v47, %s1414_s26  ;;  %v280_v47 = vrot.slane %v1687_v33, 1 }
  0x4a   : > { %v282_v57 = vsel %vm264_vm0, %v280_v47, %v281_v48 }
  0x4c   : > { %582 = vrot.lane.b32.xlu1 %v1594_v50, %s1417_s29  ;;  %566 = vrot.lane.b32.xlu0 %v315_v51, %s1417_s29 }
  0x50   : > { %628 = vrot.lane.b32.xlu1 %v1601_v52, %s1418_s30  ;;  %612 = vrot.lane.b32.xlu0 %v1604_v53, %s1418_s30 }
  0x54   : > { %442 = vrot.lane.b32.xlu1 %v1594_v50, %s1414_s26  ;;  %426 = vrot.lane.b32.xlu0 %v315_v51, %s1414_s26 }
  0x58   : > { %488 = vrot.lane.b32.xlu1 %v1601_v52, %s1415_s27  ;;  %472 = vrot.lane.b32.xlu0 %v1604_v53, %s1415_s27 }
  0x5c   : > { %630 = vrot.lane.b32.xlu1 %v1614_v54, %s1418_s30  ;;  %614 = vrot.lane.b32.xlu0 %v1617_v55, %s1418_s30 }
  0x60   : > { %676 = vrot.lane.b32.xlu1 %v297_v60, %s1419_s4  ;;  %660 = vrot.lane.b32.xlu0 %v277_v61, %s1419_s4 }
  0x64   : > { %490 = vrot.lane.b32.xlu1 %v1614_v54, %s1415_s27  ;;  %474 = vrot.lane.b32.xlu0 %v1617_v55, %s1415_s27 }
  0x68   : > { %536 = vrot.lane.b32.xlu1 %v297_v60, %s1416_s28  ;;  %520 = vrot.lane.b32.xlu0 %v277_v61, %s1416_s28 }
  0x6c   : > { %678 = vrot.lane.b32.xlu1 %v299_v7, %s1419_s4  ;;  %662 = vrot.lane.b32.xlu0 %v279_v8, %s1419_s4 }
  0x70   : > { %724 = vrot.lane.b32.xlu1 %v338_v15, %s1420_s20  ;;  %708 = vrot.lane.b32.xlu0 %v318_v18, %s1420_s20 }
  0x74   : > { %396 = vrot.lane.b32.xlu1 %v297_v60, %s1413_s25  ;;  %380 = vrot.lane.b32.xlu0 %v277_v61, %s1413_s25  ;;  %v233_v60 = vld [vmem:[%s1481_s24 + $0xb8] sm:$0x3] }
  0x75   : > { %v221_v61 = vld [vmem:[%s1481_s24 + $0x58] sm:$0x3]  ;;  %v303_v1 = vrot.slane %v233_v60, 1  ;;  %v344_v44 = vrot.slane %v233_v60, 2 }
  0x76   : > { %v283_v3 = vrot.slane %v221_v61, 1 }
  0x78   : > { %538 = vrot.lane.b32.xlu1 %v299_v7, %s1416_s28  ;;  %522 = vrot.lane.b32.xlu0 %v279_v8, %s1416_s28 }
  0x7c   : > { %584 = vrot.lane.b32.xlu1 %v338_v15, %s1417_s29  ;;  %568 = vrot.lane.b32.xlu0 %v318_v18, %s1417_s29 }
  0x80   : > { %726 = vrot.lane.b32.xlu1 %v340_v30, %s1420_s20  ;;  %710 = vrot.lane.b32.xlu0 %v320_v31, %s1420_s20 }
  0x84   : > { %398 = vrot.lane.b32.xlu1 %v299_v7, %s1413_s25  ;;  %382 = vrot.lane.b32.xlu0 %v279_v8, %s1413_s25  ;;  %v304_v7 = vsel %vm264_vm0, %v301_v45, %v303_v1  ;;  %v284_v8 = vsel %vm264_vm0, %v281_v48, %v283_v3  ;;  %v324_v45 = vrot.slane %v221_v61, 2 }
  0x88   : > { %444 = vrot.lane.b32.xlu1 %v338_v15, %s1414_s26  ;;  %428 = vrot.lane.b32.xlu0 %v318_v18, %s1414_s26  ;;  %v343_v18 = vsel %vm305_vm1, %v341_v9, %v342_v11 }
  0x8c   : > { %586 = vrot.lane.b32.xlu1 %v340_v30, %s1417_s29  ;;  %570 = vrot.lane.b32.xlu0 %v320_v31, %s1417_s29 }
  0x8e   : > { %v1689_v35 = vpop.permute.xlu1 %374  ;;  %v1691_v36 = vpop.permute.xlu0 %372 }
  0x90   : > { %632 = vrot.lane.b32.xlu1 %v1684_v32, %s1418_s30  ;;  %616 = vrot.lane.b32.xlu0 %v1687_v33, %s1418_s30 }
  0x92   : > { %v1697_v37 = vpop.permute.xlu1 %390  ;;  %v1699_v38 = vpop.permute.xlu0 %388 }
  0x94   : > { %446 = vrot.lane.b32.xlu1 %v340_v30, %s1414_s26  ;;  %430 = vrot.lane.b32.xlu0 %v320_v31, %s1414_s26 }
  0x96   : > { %v1703_v39 = vpop.permute.xlu1 %436  ;;  %v1705_v40 = vpop.permute.xlu0 %420 }
  0x98   : > { %492 = vrot.lane.b32.xlu1 %v1684_v32, %s1415_s27  ;;  %476 = vrot.lane.b32.xlu0 %v1687_v33, %s1415_s27 }
  0x9a   : > { %v1721_v49 = vpop.permute.xlu1 %438  ;;  %v1723_v51 = vpop.permute.xlu0 %422 }
  0x9c   : > { %634 = vrot.lane.b32.xlu1 %v1708_v41, %s1418_s30  ;;  %618 = vrot.lane.b32.xlu0 %v1711_v43, %s1418_s30 }
  0x9e   : > { %v1731_v58 = vpop.permute.xlu1 %484  ;;  %v1733_v59 = vpop.permute.xlu0 %468 }
  0xa0   : > { %680 = vrot.lane.b32.xlu1 %v302_v56, %s1419_s4  ;;  %664 = vrot.lane.b32.xlu0 %v282_v57, %s1419_s4 }
  0xa2   : > { %v1739_v62 = vpop.permute.xlu1 %486  ;;  %v1741_v63 = vpop.permute.xlu0 %470 }
  0xa4   : > { %494 = vrot.lane.b32.xlu1 %v1708_v41, %s1415_s27  ;;  %478 = vrot.lane.b32.xlu0 %v1711_v43, %s1415_s27  ;;  %v1823_v41 = vld [vmem:[%s1481_s24 + $0xc8] sm:$0xff] }
  0xa5   : > { %v350_v46 = vrot.slane %v1823_v41, 1 }
  0xa6   : > { %v1747_v4 = vpop.permute.xlu1 %532  ;;  %v1749_v5 = vpop.permute.xlu0 %516 }
  0xa8   : > { %540 = vrot.lane.b32.xlu1 %v302_v56, %s1416_s28  ;;  %524 = vrot.lane.b32.xlu0 %v282_v57, %s1416_s28 }
  0xaa   : > { %v393_v14 = vpop.permute.xlu1 %392  ;;  %v377_v15 = vpop.permute.xlu0 %376 }
  0xab   : > { %v767_v33 = vsel %vm756_vm5, %v1534_v26, %v393_v14  ;;  %v759_v32 = vsel %vm756_vm5, %v1537_v27, %v377_v15 }
  0xac   : > { %682 = vrot.lane.b32.xlu1 %v304_v7, %s1419_s4  ;;  %666 = vrot.lane.b32.xlu0 %v284_v8, %s1419_s4 }
  0xae   : > { %v1763_v21 = vpop.permute.xlu1 %534  ;;  %v1765_v22 = vpop.permute.xlu0 %518 }
  0xb0   : > { %728 = vrot.lane.b32.xlu1 %v343_v18, %s1420_s20  ;;  %712 = vrot.lane.b32.xlu0 %v323_v19, %s1420_s20 }
  0xb2   : > { %v1769_v23 = vpop.permute.xlu1 %580  ;;  %v1771_v25 = vpop.permute.xlu0 %564 }
  0xb4   : > { %400 = vrot.lane.b32.xlu1 %v302_v56, %s1413_s25  ;;  %384 = vrot.lane.b32.xlu0 %v282_v57, %s1413_s25  ;;  %v345_v56 = vsel %vm305_vm1, %v342_v11, %v344_v44  ;;  %v325_v57 = vsel %vm305_vm1, %v322_v13, %v324_v45  ;;  %v1806_v44 = vld [vmem:[%s1481_s24 + $0xc0] sm:$0xff] }
  0xb5   : > { %v349_v50 = vrot.slane %v1806_v44, 1 }
  0xb6   : > { %v1775_v30 = vpop.permute.xlu1 %394  ;;  %v1777_v31 = vpop.permute.xlu0 %378 }
  0xb8   : > { %542 = vrot.lane.b32.xlu1 %v304_v7, %s1416_s28  ;;  %526 = vrot.lane.b32.xlu0 %v284_v8, %s1416_s28 }
  0xba   : > { %v441_v47 = vpop.permute.xlu1 %440  ;;  %v425_v48 = vpop.permute.xlu0 %424 }
  0xbc   : > { %588 = vrot.lane.b32.xlu1 %v343_v18, %s1417_s29  ;;  %572 = vrot.lane.b32.xlu0 %v323_v19, %s1417_s29 }
  0xbe   : > { %v1785_v1 = vpop.permute.xlu1 %582  ;;  %v1787_v3 = vpop.permute.xlu0 %566 }
  0xc0   : > { %730 = vrot.lane.b32.xlu1 %v345_v56, %s1420_s20  ;;  %714 = vrot.lane.b32.xlu0 %v325_v57, %s1420_s20 }
  0xc2   : > { %v1791_v60 = vpop.permute.xlu1 %628  ;;  %v1793_v61 = vpop.permute.xlu0 %612 }
  0xc4   : > { %402 = vrot.lane.b32.xlu1 %v304_v7, %s1413_s25  ;;  %386 = vrot.lane.b32.xlu0 %v284_v8, %s1413_s25 }
  0xc6   : > { %v1797_v9 = vpop.permute.xlu1 %442  ;;  %v1799_v11 = vpop.permute.xlu0 %426 }
  0xc8   : > { %448 = vrot.lane.b32.xlu1 %v343_v18, %s1414_s26  ;;  %432 = vrot.lane.b32.xlu0 %v323_v19, %s1414_s26 }
  0xca   : > { %v489_v12 = vpop.permute.xlu1 %488  ;;  %v473_v13 = vpop.permute.xlu0 %472 }
  0xcc   : > { %590 = vrot.lane.b32.xlu1 %v345_v56, %s1417_s29  ;;  %574 = vrot.lane.b32.xlu0 %v325_v57, %s1417_s29 }
  0xce   : > { %v1808_v7 = vpop.permute.xlu1 %630  ;;  %v1810_v8 = vpop.permute.xlu0 %614 }
  0xd0   : > { %636 = vrot.lane.b32.xlu1 %v1806_v44, %s1418_s30  ;;  %620 = vrot.lane.b32.xlu0 %v1498_v10, %s1418_s30 }
  0xd2   : > { %v677_v18 = vpop.permute.xlu1 %676  ;;  %v661_v19 = vpop.permute.xlu0 %660 }
  0xd4   : > { %450 = vrot.lane.b32.xlu1 %v345_v56, %s1414_s26  ;;  %434 = vrot.lane.b32.xlu0 %v325_v57, %s1414_s26  ;;  %v784_v56 = vsel %vm773_vm6, %v767_v33, %v441_v47  ;;  %v776_v57 = vsel %vm773_vm6, %v759_v32, %v425_v48  ;;  %v757_v32 = vsel %vm756_vm5, %v1488_v2, %v1691_v36 }
  0xd5   : > { %v801_v14 = vsel %vm790_vm7, %v784_v56, %v489_v12  ;;  %v793_v42 = vsel %vm790_vm7, %v776_v57, %v473_v13  ;;  %v765_v33 = vsel %vm756_vm5, %v1498_v10, %v1699_v38  ;;  %v351_v48 = vsel %vm264_vm0, %v349_v50, %v350_v46 }
  0xd6   : > { %v1818_v45 = vpop.permute.xlu1 %490  ;;  %v1820_v43 = vpop.permute.xlu0 %474  ;;  %v782_v47 = vsel %vm773_vm6, %v765_v33, %v1703_v39  ;;  %v355_v33 = vrot.slane %v1823_v41, 2 }
  0xd7   : > { %v799_v2 = vsel %vm790_vm7, %v782_v47, %v1731_v58 }
  0xd8   : > { %496 = vrot.lane.b32.xlu1 %v1806_v44, %s1415_s27  ;;  %480 = vrot.lane.b32.xlu0 %v1498_v10, %s1415_s27  ;;  %v816_v12 = vsel %vm807_vm8, %v799_v2, %v1747_v4 }
  0xd9   : > { %v833_v50 = vsel %vm824_vm9, %v816_v12, %v1769_v23 }
  0xda   : > { %v537_v27 = vpop.permute.xlu1 %536  ;;  %v521_v15 = vpop.permute.xlu0 %520  ;;  %v850_v58 = vsel %vm841_vm10, %v833_v50, %v1791_v60 }
  0xdb   : > { %v1840_v34 = vsel %vm807_vm8, %v801_v14, %v537_v27  ;;  %v1843_v55 = vsel %vm807_vm8, %v793_v42, %v521_v15  ;;  %v774_v42 = vsel %vm773_vm6, %v757_v32, %v1705_v40  ;;  %v867_v4 = vsel %vm858_vm11, %v850_v58, %v677_v18 }
  0xdc   : > { %638 = vrot.lane.b32.xlu1 %v1823_v41, %s1418_s30  ;;  %622 = vrot.lane.b32.xlu0 %v1493_v6, %s1418_s30  ;;  %v791_v10 = vsel %vm790_vm7, %v774_v42, %v1733_v59  ;;  %v760_v14 = vsel %vm756_vm5, %v1543_v29, %v1777_v31  ;;  %v354_v27 = vrot.slane %v1806_v44, 2 }
  0xdd   : > { %v808_v39 = vsel %vm807_vm8, %v791_v10, %v1749_v5  ;;  %v777_v32 = vsel %vm773_vm6, %v760_v14, %v1799_v11 }
  0xde   : > { %v679_v36 = vpop.permute.xlu1 %678  ;;  %v663_v38 = vpop.permute.xlu0 %662  ;;  %v825_v40 = vsel %vm824_vm9, %v808_v39, %v1771_v25  ;;  %v236_v25 = vld [vmem:[%s1481_s24 + $0xd0] sm:$0x3]  ;;  %v794_v31 = vsel %vm790_vm7, %v777_v32, %v1820_v43 }
  0xdf   : > { %v842_v59 = vsel %vm841_vm10, %v825_v40, %v1793_v61  ;;  %v352_v60 = vrot.slane %v236_v25, 1 }
  0xe0   : > { %684 = vrot.lane.b32.xlu1 %v351_v48, %s1419_s4  ;;  %668 = vrot.lane.b32.xlu0 %v1511_v17, %s1419_s4  ;;  %v859_v5 = vsel %vm858_vm11, %v842_v59, %v661_v19  ;;  %v768_v19 = vsel %vm756_vm5, %v1540_v28, %v1775_v30 }
  0xe1   : > { %v785_v15 = vsel %vm773_vm6, %v768_v19, %v1797_v9  ;;  %v353_v30 = vsel %vm264_vm0, %v350_v46, %v352_v60  ;;  %v766_v46 = vsel %vm756_vm5, %v1493_v6, %v1697_v37 }
  0xe2   : > { %v725_v23 = vpop.permute.xlu1 %724  ;;  %v709_v13 = vpop.permute.xlu0 %708  ;;  %v802_v29 = vsel %vm790_vm7, %v785_v15, %v1818_v45  ;;  %v356_v45 = vsel %vm305_vm1, %v354_v27, %v355_v33 }
  0xe3   : > { %v884_v56 = vsel %vm875_vm12, %v867_v4, %v725_v23  ;;  %v876_v57 = vsel %vm875_vm12, %v859_v5, %v709_v13  ;;  %v238_v5 = vld [vmem:[%s1481_s24 + $0xe0] sm:$0xff] }
  0xe4   : > { %498 = vrot.lane.b32.xlu1 %v1823_v41, %s1415_s27  ;;  %1297 = vmatprep.mubr.msk.f32.mxu1 %vm903_vm13, %v884_v56  ;;  %v783_v41 = vsel %vm773_vm6, %v766_v46, %v1721_v49  ;;  %v363_v13 = vrot.slane %v238_v5, 1  ;;  %v2201_v56 = vld [vmem:[#allocation6_spill] sm:$0xff] }
  0xe5   : > { %482 = vrot.lane.b32.xlu0 %v1493_v6, %s1415_s27  ;;  %1285 = vmatprep.mubr.msk.f32.mxu0 %vm903_vm13, %v876_v57 }
  0xe6   : > { %v397_v61 = vpop.permute.xlu1 %396  ;;  %v381_v18 = vpop.permute.xlu0 %380 }
  0xe7   : > { %v769_v12 = vsel %vm756_vm5, %v1601_v52, %v397_v61  ;;  %v237_v52 = vld [vmem:[%s1481_s24 + $0xd8] sm:$0xff] }
  0xe8   : > { %544 = vrot.lane.b32.xlu1 %v351_v48, %s1416_s28  ;;  %v362_v23 = vrot.slane %v237_v52, 1 }
  0xe9   : > { %528 = vrot.lane.b32.xlu0 %v1511_v17, %s1416_s28  ;;  %v758_v17 = vsel %vm756_vm5, %v1484_v0, %v1689_v35  ;;  %v800_v0 = vsel %vm790_vm7, %v783_v41, %v1739_v62 }
  0xea   : > { %v539_v44 = vpop.permute.xlu1 %538  ;;  %v523_v47 = vpop.permute.xlu0 %522  ;;  %v775_v43 = vsel %vm773_vm6, %v758_v17, %v1723_v51  ;;  %v817_v49 = vsel %vm807_vm8, %v800_v0, %v1763_v21 }
  0xeb   : > { %v1911_v9 = vsel %vm807_vm8, %v802_v29, %v539_v44  ;;  %v1914_v11 = vsel %vm807_vm8, %v794_v31, %v523_v47  ;;  %v792_v35 = vsel %vm790_vm7, %v775_v43, %v1741_v63  ;;  %v834_v42 = vsel %vm824_vm9, %v817_v49, %v1785_v1  ;;  %v2202_v29 = vld [vmem:[#allocation2_spill] sm:$0xff]  ;;  %v2203_v47 = vld [vmem:[#allocation3_spill] sm:$0xff] }
  0xec   : > { %686 = vrot.lane.b32.xlu1 %v353_v30, %s1419_s4  ;;  %v809_v51 = vsel %vm807_vm8, %v792_v35, %v1765_v22  ;;  %v851_v62 = vsel %vm841_vm10, %v834_v42, %v1808_v7  ;;  %v357_v7 = vrot.slane %v236_v25, 2 }
  0xed   : > { %670 = vrot.lane.b32.xlu0 %v1508_v16, %s1419_s4  ;;  %v826_v48 = vsel %vm824_vm9, %v809_v51, %v1787_v3  ;;  %v868_v21 = vsel %vm858_vm11, %v851_v62, %v679_v36 }
  0xee   : > { %v1934_v6 = vpop.permute.xlu1 %584  ;;  %v1936_v37 = vpop.permute.xlu0 %568  ;;  %v843_v63 = vsel %vm841_vm10, %v826_v48, %v1810_v8  ;;  %v2205_v48 = vld [vmem:[#allocation5_spill] sm:$0xff] }
  0xef   : > { %v860_v22 = vsel %vm858_vm11, %v843_v63, %v663_v38  ;;  %v358_v38 = vsel %vm305_vm1, %v355_v33, %v357_v7  ;;  %v367_v33 = vrot.slane %v237_v52, 2 }
  0xf0   : > { %732 = vrot.lane.b32.xlu1 %v356_v45, %s1420_s20 }
  0xf1   : > { %716 = vrot.lane.b32.xlu0 %v1520_v20, %s1420_s20 }
  0xf2   : > { %v727_v2 = vpop.permute.xlu1 %726  ;;  %v711_v1 = vpop.permute.xlu0 %710 }
  0xf3   : > { %v885_v10 = vsel %vm875_vm12, %v868_v21, %v727_v2  ;;  %v877_v3 = vsel %vm875_vm12, %v860_v22, %v711_v1 }
  0xf4   : > { %546 = vrot.lane.b32.xlu1 %v353_v30, %s1416_s28  ;;  %1298 = vmatmul.mubr.msk.f32.vlgmr.msra.gmra.mrb[0].mxu1 %vm903_vm13, %v885_v10  ;;  %v368_v30 = vrot.slane %v238_v5, 2  ;;  %v835_v10 = vsel %vm824_vm9, %v1840_v34, %v1934_v6 }
  0xf5   : > { %530 = vrot.lane.b32.xlu0 %v1508_v16, %s1416_s28  ;;  %1286 = vmatmul.mubr.msk.f32.vlgmr.msra.gmra.mrb[0].mxu0 %vm903_vm13, %v877_v3  ;;  %v761_v16 = vsel %vm756_vm5, %v1604_v53, %v381_v18  ;;  %v827_v3 = vsel %vm824_vm9, %v1843_v55, %v1936_v37 }
  0xf6   : > { %v399_v8 = vpop.permute.xlu1 %398  ;;  %v383_v36 = vpop.permute.xlu0 %382  ;;  %v369_v17 = vsel %vm305_vm1, %v367_v33, %v368_v30 }
  0xf7   : > { %v770_v25 = vsel %vm756_vm5, %v1614_v54, %v399_v8  ;;  %v762_v57 = vsel %vm756_vm5, %v2201_v56, %v383_v36 }
  0xf8   : > { %592 = vrot.lane.b32.xlu1 %v356_v45, %s1417_s29  ;;  %v2204_v45 = vld [vmem:[#allocation4_spill] sm:$0xff] }
  0xf9   : > { %576 = vrot.lane.b32.xlu0 %v1520_v20, %s1417_s29 }
  0xfa   : > { %v445_v39 = vpop.permute.xlu1 %444  ;;  %v429_v50 = vpop.permute.xlu0 %428 }
  0xfb   : > { %v786_v40 = vsel %vm773_vm6, %v769_v12, %v445_v39  ;;  %v778_v58 = vsel %vm773_vm6, %v761_v16, %v429_v50 }
  0xfc   : > { %734 = vrot.lane.b32.xlu1 %v358_v38, %s1420_s20 }
  0xfd   : > { %718 = vrot.lane.b32.xlu0 %v1527_v24, %s1420_s20 }
  0xfe   : > { %v1975_v20 = vpop.permute.xlu1 %586  ;;  %v1977_v59 = vpop.permute.xlu0 %570 }
 0x100   : > { %594 = vrot.lane.b32.xlu1 %v358_v38, %s1417_s29 }
 0x101   : > { %578 = vrot.lane.b32.xlu0 %v1527_v24, %s1417_s29  ;;  %v239_v24 = vld [vmem:[%s1481_s24 + $0xe8] sm:$0x3]  ;;  %s206_s24 = sadd.s32 %s1235_s23, %s1234_s22 }
 0x102   : > { %v633_v53 = vpop.permute.xlu1 %632  ;;  %v617_v4 = vpop.permute.xlu0 %616  ;;  %v365_v14 = vrot.slane %v239_v24, 1  ;;  %v370_v46 = vrot.slane %v239_v24, 2  ;;  %s1236_s27 = sshll.u32 %s206_s24, 3 }
 0x103   : > { %v852_v7 = vsel %vm841_vm10, %v835_v10, %v633_v53  ;;  %v844_v8 = vsel %vm841_vm10, %v827_v3, %v617_v4  ;;  %v836_v4 = vsel %vm824_vm9, %v1911_v9, %v1975_v20  ;;  %v2206_v20 = vld [vmem:[#allocation7_spill] sm:$0xff]  ;;  %s2130_s12 = scalar_lea.vmem %s2182_s3, %s1236_s27 }
 0x104   : > { %640 = vrot.lane.b32.xlu1 %v237_v52, %s1418_s30  ;;  %v366_v31 = vsel %vm264_vm0, %v363_v13, %v365_v14  ;;  %v371_v0 = vsel %vm305_vm1, %v368_v30, %v370_v46 }
 0x105   : > { %624 = vrot.lane.b32.xlu0 %v1534_v26, %s1418_s30  ;;  %v364_v26 = vsel %vm264_vm0, %v362_v23, %v363_v13 }
 0x106   : > { %v447_v60 = vpop.permute.xlu1 %446  ;;  %v431_v61 = vpop.permute.xlu0 %430 }
 0x107   : > { %v787_v18 = vsel %vm773_vm6, %v770_v25, %v447_v60  ;;  %v779_v19 = vsel %vm773_vm6, %v762_v57, %v431_v61 }
 0x108   : > { %642 = vrot.lane.b32.xlu1 %v238_v5, %s1418_s30  ;;  %v828_v5 = vsel %vm824_vm9, %v1914_v11, %v1977_v59 }
 0x109   : > { %626 = vrot.lane.b32.xlu0 %v1540_v28, %s1418_s30 }
 0x10a   : > { %v493_v27 = vpop.permute.xlu1 %492  ;;  %v477_v54 = vpop.permute.xlu0 %476 }
 0x10b   : > { %v803_v15 = vsel %vm790_vm7, %v786_v40, %v493_v27  ;;  %v795_v32 = vsel %vm790_vm7, %v778_v58, %v477_v54 }
 0x10c   : > { %688 = vrot.lane.b32.xlu1 %v364_v26, %s1419_s4 }
 0x10d   : > { %672 = vrot.lane.b32.xlu0 %v2202_v29, %s1419_s4 }
 0x10e   : > { %v635_v44 = vpop.permute.xlu1 %634  ;;  %v619_v28 = vpop.permute.xlu0 %618 }
 0x10f   : > { %v853_v23 = vsel %vm841_vm10, %v836_v4, %v635_v44  ;;  %v845_v13 = vsel %vm841_vm10, %v828_v5, %v619_v28 }
 0x110   : > { %690 = vrot.lane.b32.xlu1 %v366_v31, %s1419_s4 }
 0x111   : > { %674 = vrot.lane.b32.xlu0 %v2203_v47, %s1419_s4 }
 0x112   : > { %v681_v41 = vpop.permute.xlu1 %680  ;;  %v665_v43 = vpop.permute.xlu0 %664 }
 0x113   : > { %v869_v36 = vsel %vm858_vm11, %v852_v7, %v681_v41  ;;  %v861_v38 = vsel %vm858_vm11, %v844_v8, %v665_v43 }
 0x114   : > { %736 = vrot.lane.b32.xlu1 %v369_v17, %s1420_s20 }
 0x115   : > { %720 = vrot.lane.b32.xlu0 %v2204_v45, %s1420_s20 }
 0x116   : > { %v495_v35 = vpop.permute.xlu1 %494  ;;  %v479_v49 = vpop.permute.xlu0 %478 }
 0x117   : > { %v804_v51 = vsel %vm790_vm7, %v787_v18, %v495_v35  ;;  %v796_v42 = vsel %vm790_vm7, %v779_v19, %v479_v49  ;;  %v2207_v18 = vld [vmem:[#allocation8_spill] sm:$0xff] }
 0x118   : > { %738 = vrot.lane.b32.xlu1 %v371_v0, %s1420_s20 }
 0x119   : > { %722 = vrot.lane.b32.xlu0 %v2205_v48, %s1420_s20 }
 0x11a   : > { %v541_v62 = vpop.permute.xlu1 %540  ;;  %v525_v63 = vpop.permute.xlu0 %524 }
 0x11b   : > { %v2018_v21 = vsel %vm807_vm8, %v803_v15, %v541_v62  ;;  %v2021_v22 = vsel %vm807_vm8, %v795_v32, %v525_v63 }
 0x11e   : > { %v683_v2 = vpop.permute.xlu1 %682  ;;  %v667_v1 = vpop.permute.xlu0 %666 }
 0x11f   : > { %v870_v25 = vsel %vm858_vm11, %v853_v23, %v683_v2  ;;  %v862_v56 = vsel %vm858_vm11, %v845_v13, %v667_v1 }
 0x122   : > { %v729_v12 = vpop.permute.xlu1 %728  ;;  %v713_v16 = vpop.permute.xlu0 %712 }
 0x123   : > { %v886_v39 = vsel %vm875_vm12, %v869_v36, %v729_v12  ;;  %v878_v50 = vsel %vm875_vm12, %v861_v38, %v713_v16 }
 0x124   : > { %1288 = vmatprep.mubr.msk.f32.mxu0 %vm903_vm13, %v878_v50  ;;  %1300 = vmatprep.mubr.msk.f32.mxu1 %vm903_vm13, %v886_v39 }
 0x126   : > { %v401_v34 = vpop.permute.xlu1 %400  ;;  %v385_v55 = vpop.permute.xlu0 %384 }
 0x127   : > { %v771_v59 = vsel %vm756_vm5, %v2206_v20, %v401_v34  ;;  %v763_v19 = vsel %vm756_vm5, %v2207_v18, %v385_v55 }
 0x12a   : > { %v543_v6 = vpop.permute.xlu1 %542  ;;  %v527_v37 = vpop.permute.xlu0 %526 }
 0x12b   : > { %v821_v40 = vsel %vm807_vm8, %v804_v51, %v543_v6  ;;  %v813_v58 = vsel %vm807_vm8, %v796_v42, %v527_v37 }
 0x12e   : > { %v589_v52 = vpop.permute.xlu1 %588  ;;  %v573_v53 = vpop.permute.xlu0 %572 }
 0x12f   : > { %v837_v42 = vsel %vm824_vm9, %v2018_v21, %v589_v52  ;;  %v829_v48 = vsel %vm824_vm9, %v2021_v22, %v573_v53 }
 0x132   : > { %v731_v57 = vpop.permute.xlu1 %730  ;;  %v715_v60 = vpop.permute.xlu0 %714 }
 0x133   : > { %v887_v61 = vsel %vm875_vm12, %v870_v25, %v731_v57  ;;  %v879_v24 = vsel %vm875_vm12, %v862_v56, %v715_v60 }
 0x134   : > { %1289 = vmatmul.mubr.msk.f32.gmra.mrb[2].mxu0 %vm903_vm13, %v879_v24  ;;  %1301 = vmatmul.mubr.msk.f32.gmra.mrb[2].mxu1 %vm903_vm13, %v887_v61 }
 0x136   : > { %v2053_v9 = vpop.permute.xlu1 %402  ;;  %v2055_v11 = vpop.permute.xlu0 %386 }
 0x13a   : > { %v449_v26 = vpop.permute.xlu1 %448  ;;  %v433_v14 = vpop.permute.xlu0 %432 }
 0x13b   : > { %v788_v27 = vsel %vm773_vm6, %v771_v59, %v449_v26  ;;  %v780_v54 = vsel %vm773_vm6, %v763_v19, %v433_v14  ;;  %v2208_v59 = vld [vmem:[#allocation9_spill] sm:$0xff]  ;;  %v2209_v14 = vld [vmem:[#allocation10_spill] sm:$0xff] }
 0x13c   : > { %v772_v18 = vsel %vm756_vm5, %v2208_v59, %v2053_v9 }
 0x13e   : > { %v591_v15 = vpop.permute.xlu1 %590  ;;  %v575_v32 = vpop.permute.xlu0 %574 }
 0x13f   : > { %v838_v12 = vsel %vm824_vm9, %v821_v40, %v591_v15  ;;  %v830_v16 = vsel %vm824_vm9, %v813_v58, %v575_v32  ;;  %v764_v15 = vsel %vm756_vm5, %v2209_v14, %v2055_v11 }
 0x142   : > { %v637_v33 = vpop.permute.xlu1 %636  ;;  %v621_v30 = vpop.permute.xlu0 %620 }
 0x143   : > { %v854_v62 = vsel %vm841_vm10, %v837_v42, %v637_v33  ;;  %v846_v63 = vsel %vm841_vm10, %v829_v48, %v621_v30 }
 0x146   : > { %v451_v29 = vpop.permute.xlu1 %450  ;;  %v435_v31 = vpop.permute.xlu0 %434 }
 0x147   : > { %v781_v33 = vsel %vm773_vm6, %v764_v15, %v435_v31 }
 0x14a   : > { %v497_v44 = vpop.permute.xlu1 %496  ;;  %v481_v28 = vpop.permute.xlu0 %480 }
 0x14b   : > { %v805_v57 = vsel %vm790_vm7, %v788_v27, %v497_v44  ;;  %v797_v61 = vsel %vm790_vm7, %v780_v54, %v481_v28  ;;  %v789_v27 = vsel %vm773_vm6, %v772_v18, %v451_v29 }
 0x14e   : > { %v639_v47 = vpop.permute.xlu1 %638  ;;  %v623_v17 = vpop.permute.xlu0 %622 }
 0x14f   : > { %v855_v39 = vsel %vm841_vm10, %v838_v12, %v639_v47  ;;  %v847_v50 = vsel %vm841_vm10, %v830_v16, %v623_v17 }
 0x152   : > { %v685_v46 = vpop.permute.xlu1 %684  ;;  %v669_v41 = vpop.permute.xlu0 %668 }
 0x153   : > { %v871_v2 = vsel %vm858_vm11, %v854_v62, %v685_v46  ;;  %v863_v10 = vsel %vm858_vm11, %v846_v63, %v669_v41 }
 0x156   : > { %v499_v43 = vpop.permute.xlu1 %498 }
 0x157   : > { %v483_v45 = vpop.permute.xlu0 %482  ;;  %v806_v30 = vsel %vm790_vm7, %v789_v27, %v499_v43 }
 0x158   : > { %v798_v47 = vsel %vm790_vm7, %v781_v33, %v483_v45 }
 0x15a   : > { %v545_v0 = vpop.permute.xlu1 %544 }
 0x15b   : > { %v529_v35 = vpop.permute.xlu0 %528  ;;  %v822_v24 = vsel %vm807_vm8, %v805_v57, %v545_v0 }
 0x15c   : > { %v814_v19 = vsel %vm807_vm8, %v797_v61, %v529_v35 }
 0x15e   : > { %v687_v49 = vpop.permute.xlu1 %686 }
 0x15f   : > { %v671_v51 = vpop.permute.xlu0 %670  ;;  %v872_v34 = vsel %vm858_vm11, %v855_v39, %v687_v49 }
 0x160   : > { %v864_v6 = vsel %vm858_vm11, %v847_v50, %v671_v51 }
 0x162   : > { %v733_v1 = vpop.permute.xlu1 %732 }
 0x163   : > { %v888_v3 = vsel %vm875_vm12, %v871_v2, %v733_v1  ;;  %v717_v7 = vpop.permute.xlu0 %716  ;;  %v1237_v2 = vld [vmem:[%s2181_s2] ss:$0 sm:$0xff] }
 0x164   : > { %v880_v8 = vsel %vm875_vm12, %v863_v10, %v717_v7  ;;  %1303 = vmatprep.mubr.msk.f32.mxu1 %vm903_vm13, %v888_v3 }
 0x165   : > { %1291 = vmatprep.mubr.msk.f32.mxu0 %vm903_vm13, %v880_v8 }
 0x166   : > { %v547_v21 = vpop.permute.xlu1 %546 }
 0x167   : > { %v531_v22 = vpop.permute.xlu0 %530  ;;  %v823_v17 = vsel %vm807_vm8, %v806_v30, %v547_v21 }
 0x168   : > { %v815_v41 = vsel %vm807_vm8, %v798_v47, %v531_v22 }
 0x16a   : > { %v593_v36 = vpop.permute.xlu1 %592 }
 0x16b   : > { %v577_v38 = vpop.permute.xlu0 %576  ;;  %v839_v26 = vsel %vm824_vm9, %v822_v24, %v593_v36 }
 0x16c   : > { %v831_v32 = vsel %vm824_vm9, %v814_v19, %v577_v38 }
 0x16e   : > { %v735_v55 = vpop.permute.xlu1 %734 }
 0x16f   : > { %v889_v37 = vsel %vm875_vm12, %v872_v34, %v735_v55  ;;  %v719_v52 = vpop.permute.xlu0 %718 }
 0x170   : > { %v881_v53 = vsel %vm875_vm12, %v864_v6, %v719_v52  ;;  %1304 = vmatmul.mubr.msk.f32.gmra.mrb[4].mxu1 %vm903_vm13, %v889_v37 }
 0x171   : > { %1292 = vmatmul.mubr.msk.f32.gmra.mrb[4].mxu0 %vm903_vm13, %v881_v53 }
 0x172   : > { %v595_v40 = vpop.permute.xlu1 %594 }
 0x173   : > { %v579_v58 = vpop.permute.xlu0 %578  ;;  %v840_v31 = vsel %vm824_vm9, %v823_v17, %v595_v40 }
 0x174   : > { %v832_v45 = vsel %vm824_vm9, %v815_v41, %v579_v58 }
 0x176   : > { %v641_v4 = vpop.permute.xlu1 %640 }
 0x177   : > { %v625_v5 = vpop.permute.xlu0 %624  ;;  %v856_v54 = vsel %vm841_vm10, %v839_v26, %v641_v4 }
 0x178   : > { %v848_v9 = vsel %vm841_vm10, %v831_v32, %v625_v5 }
 0x17a   : > { %v643_v23 = vpop.permute.xlu1 %642 }
 0x17b   : > { %v627_v13 = vpop.permute.xlu0 %626  ;;  %v857_v0 = vsel %vm841_vm10, %v840_v31, %v643_v23 }
 0x17c   : > { %v849_v35 = vsel %vm841_vm10, %v832_v45, %v627_v13 }
 0x17e   : > { %v689_v25 = vpop.permute.xlu1 %688 }
 0x17f   : > { %v673_v56 = vpop.permute.xlu0 %672  ;;  %v873_v44 = vsel %vm858_vm11, %v856_v54, %v689_v25 }
 0x180   : > { %v865_v11 = vsel %vm858_vm11, %v848_v9, %v673_v56 }
 0x182   : > { %v691_v60 = vpop.permute.xlu1 %690 }
 0x183   : > { %v675_v20 = vpop.permute.xlu0 %674  ;;  %v874_v49 = vsel %vm858_vm11, %v857_v0, %v691_v60 }
 0x184   : > { %v866_v42 = vsel %vm858_vm11, %v849_v35, %v675_v20 }
 0x186   : > { %v737_v28 = vpop.permute.xlu1 %736 }
 0x187   : > { %v890_v29 = vsel %vm875_vm12, %v873_v44, %v737_v28  ;;  %v721_v46 = vpop.permute.xlu0 %720 }
 0x188   : > { %v882_v43 = vsel %vm875_vm12, %v865_v11, %v721_v46  ;;  %1306 = vmatprep.mubr.msk.f32.mxu1 %vm903_vm13, %v890_v29 }
 0x189   : > { %1294 = vmatprep.mubr.msk.f32.mxu0 %vm903_vm13, %v882_v43 }
 0x18a   : > { %v739_v51 = vpop.permute.xlu1 %738 }
 0x18b   : > { %v891_v48 = vsel %vm875_vm12, %v874_v49, %v739_v51  ;;  %v723_v62 = vpop.permute.xlu0 %722 }
 0x18c   : > { %v883_v63 = vsel %vm875_vm12, %v866_v42, %v723_v62  ;;  %1307 = vmatmul.mubr.msk.f32.gmra.mrb[6].mxu1 %vm903_vm13, %v891_v48 }
 0x18d   : > { %1295 = vmatmul.mubr.msk.f32.gmra.mrb[6].mxu0 %vm903_vm13, %v883_v63 }
 0x1c7   : > { %v1299_v1 = vpop.f32.mrb[0].mxu1 }
 0x1c8   : > { %v1287_v10 = vpop.f32.mrb[0].mxu0  ;;  %v1068_v3 = vadd.f32 %v1299_v1, %v1237_v2  ;;  %v1062_v7 = vpop.f32.mrb[1].mxu1 }
 0x1c9   : > { %v1028_v8 = vadd.f32 %v1287_v10, %v1237_v2  ;;  %v1022_v21 = vpop.f32.mrb[1].mxu0  ;;  %v1063_v22 = vadd.f32 %v1237_v2, %v1062_v7 }
 0x1ca   : > { %v1110_v36 = vmax.f32 %v1068_v3, 0.0  ;;  %v1023_v38 = vadd.f32 %v1237_v2, %v1022_v21 }
 0x1cb   : > { %v1102_v12 = vmax.f32 %v1028_v8, 0.0  ;;  %v1109_v16 = vmax.f32 %v1063_v22, 0.0 }
 0x1cc   : > { %1127 = vst.msk [vmem:[%s2130_s12 + $0x48] sm:$0xff] %vm1117_vm14, %v1110_v36  ;;  %v1101_v39 = vmax.f32 %v1023_v38, 0.0 }
 0x1cd   : > { %1119 = vst.msk [vmem:[%s2130_s12 + $0x8] sm:$0xff] %vm1117_vm14, %v1102_v12  ;;  %1126 = vst.msk [vmem:[%s2130_s12 + $0x40] sm:$0xff] %vm1117_vm14, %v1109_v16 }
 0x1ce   : > { %1118 = vst.msk [vmem:[%s2130_s12] sm:$0xff] %vm1117_vm14, %v1101_v39 }
 0x207   : > { %v1290_v50 = vpop.f32.mrb[2].mxu0  ;;  %v1302_v34 = vpop.f32.mrb[2].mxu1 }
 0x208   : > { %v1038_v55 = vadd.f32 %v1290_v50, %v1237_v2  ;;  %v1078_v6 = vadd.f32 %v1302_v34, %v1237_v2  ;;  %v1032_v37 = vpop.f32.mrb[3].mxu0  ;;  %v1072_v52 = vpop.f32.mrb[3].mxu1 }
 0x209   : > { %v1033_v53 = vadd.f32 %v1237_v2, %v1032_v37  ;;  %v1073_v40 = vadd.f32 %v1237_v2, %v1072_v52 }
 0x20a   : > { %v1104_v58 = vmax.f32 %v1038_v55, 0.0  ;;  %v1112_v4 = vmax.f32 %v1078_v6, 0.0 }
 0x20b   : > { %v1103_v5 = vmax.f32 %v1033_v53, 0.0  ;;  %v1111_v23 = vmax.f32 %v1073_v40, 0.0 }
 0x20c   : > { %1121 = vst.msk [vmem:[%s2130_s12 + $0x18] sm:$0xff] %vm1117_vm14, %v1104_v58  ;;  %1129 = vst.msk [vmem:[%s2130_s12 + $0x58] sm:$0xff] %vm1117_vm14, %v1112_v4 }
 0x20d   : > { %1120 = vst.msk [vmem:[%s2130_s12 + $0x10] sm:$0xff] %vm1117_vm14, %v1103_v5  ;;  %1128 = vst.msk [vmem:[%s2130_s12 + $0x50] sm:$0xff] %vm1117_vm14, %v1111_v23 }
 0x243   : > { %v1305_v13 = vpop.f32.mrb[4].mxu1 }
 0x244   : > { %v1293_v25 = vpop.f32.mrb[4].mxu0  ;;  %v1088_v56 = vadd.f32 %v1305_v13, %v1237_v2  ;;  %v1082_v57 = vpop.f32.mrb[5].mxu1 }
 0x245   : > { %v1048_v60 = vadd.f32 %v1293_v25, %v1237_v2  ;;  %v1042_v61 = vpop.f32.mrb[5].mxu0  ;;  %v1083_v24 = vadd.f32 %v1237_v2, %v1082_v57 }
 0x246   : > { %v1114_v20 = vmax.f32 %v1088_v56, 0.0  ;;  %v1043_v59 = vadd.f32 %v1237_v2, %v1042_v61 }
 0x247   : > { %v1106_v18 = vmax.f32 %v1048_v60, 0.0  ;;  %v1113_v19 = vmax.f32 %v1083_v24, 0.0 }
 0x248   : > { %1131 = vst.msk [vmem:[%s2130_s12 + $0x68] sm:$0xff] %vm1117_vm14, %v1114_v20  ;;  %v1105_v26 = vmax.f32 %v1043_v59, 0.0 }
 0x249   : > { %1123 = vst.msk [vmem:[%s2130_s12 + $0x28] sm:$0xff] %vm1117_vm14, %v1106_v18  ;;  %1130 = vst.msk [vmem:[%s2130_s12 + $0x60] sm:$0xff] %vm1117_vm14, %v1113_v19 }
 0x24a   : > { %1122 = vst.msk [vmem:[%s2130_s12 + $0x20] sm:$0xff] %vm1117_vm14, %v1105_v26 }
 0x25f   : > { %v1308_v14 = vpop.f32.mrb[6].mxu1 }
 0x260   : > { %v1296_v15 = vpop.f32.mrb[6].mxu0  ;;  %v1098_v27 = vadd.f32 %v1308_v14, %v1237_v2  ;;  %v1092_v32 = vpop.f32.mrb[7].mxu1 }
 0x261   : > { %v1058_v54 = vadd.f32 %v1296_v15, %v1237_v2  ;;  %v1052_v33 = vpop.f32.mrb[7].mxu0  ;;  %v1093_v30 = vadd.f32 %v1237_v2, %v1092_v32 }
 0x262   : > { %v1116_v9 = vmax.f32 %v1098_v27, 0.0  ;;  %v1053_v44 = vadd.f32 %v1237_v2, %v1052_v33 }
 0x263   : > { %v1108_v28 = vmax.f32 %v1058_v54, 0.0  ;;  %v1115_v47 = vmax.f32 %v1093_v30, 0.0 }
 0x264   : > { %1133 = vst.msk [vmem:[%s2130_s12 + $0x78] sm:$0xff] %vm1117_vm14, %v1116_v9  ;;  %v1107_v17 = vmax.f32 %v1053_v44, 0.0 }
 0x265   : > { %1125 = vst.msk [vmem:[%s2130_s12 + $0x38] sm:$0xff] %vm1117_vm14, %v1108_v28  ;;  %1132 = vst.msk [vmem:[%s2130_s12 + $0x70] sm:$0xff] %vm1117_vm14, %v1115_v47 }
 0x266   : > { %1124 = vst.msk [vmem:[%s2130_s12 + $0x30] sm:$0xff] %vm1117_vm14, %v1107_v17 }
 0x267 PF: > { %s13_s16 = sadd.s32 1, %s1411_s16   ;;  %s2210_s12 = smov %s1403_s14 }
 0x268   : > { %p10_p8 = scmp.ge.s32.totalorder %s13_s16, 6   ;;  %s2211_s13 = smov %s1407_s15 }
 0x269   : > { %s2212_s14 = smov %s2215_s17  ;;  %s2213_s15 = smov %s2219_s18 }
 0x26a   :  { %12 = sbr.rel (!%p10_p8) target bundleno = 3 (0x3), region = 62 }

// kernel: _lambda_.8
= control target key start
LH: loop header
LB: loop body
LE: loop exit
PB: predicated region body
PF: predicated region fallthrough
CT: control target
= control target key end

     0   :  { %s389_s6 = smov 0   ;;  %s391_s7 = smov 0   ;;  %s434_s0 = inlined_call_operand.vmem [shape: f32[2,16,8,128], index: 0, kind: input, shape index: {}]   ;;  %s435_s1 = inlined_call_operand.vmem [shape: f32[2,8,8,64], index: 1, kind: output, shape index: {}]  }
   0x1   :  { %s393_s8 = smov 0  }
   0x2 LB: > { %s23_s9 = sadd.s32 1, %s372_s7  ;;  %p320_p0 = scmp.ge.s32.totalorder %s376_s8, 1  ;;  %s376_s8 = sphi %s393_s8, %s11_s8   ;;  %s372_s7 = sphi %s391_s7, %s437_s7   ;;  %s368_s6 = sphi %s389_s6, %s436_s6  }
   0x3   : > { %p25_p1 = scmp.ge.s32.totalorder %s23_s9, 2  ;;  %p108_p2 = scmp.lt.s32.totalorder %s376_s8, 3 }
   0x5   : > { %s439_s9 = smov (%p25_p1, %s23_s9), 0  ;;  %p109_p3 = pnand %p320_p0, %p108_p2 }
   0x6   : > { %p137_p4 = scmp.lt.s32.totalorder (!%p109_p3), %s368_s6, 1  ;;  %s378_s14 = smov (!%p109_p3), 64   ;;  %vm220_vm0 = vcmask (!%p109_p3), 523264  }
   0x7   : > { %112 = sbr.rel (%p109_p3) target bundleno = 151 (0x97), region = 24 }
   0xe   : > { %s441_s6 = smov (!%p137_p4, %s368_s6), 1 }
   0xf   : > { %s327_s10 = sshll.u32 %s441_s6, 7  ;;  %s328_s15 = sshll.u32 %s441_s6, 6 }
  0x10   : > { %s144_s13 = scalar_lea.vmem %s434_s0, %s327_s10  ;;  %s154_s18 = scalar_lea.vmem %s435_s1, %s328_s15 }
  0x11   : > { %v160_v0 = vld [vmem:[%s144_s13 + $0x20] sm:$0xff]  ;;  %v161_v1 = vld [vmem:[%s144_s13 + $0x28] sm:$0xff]  ;;  %v162_v5 = vld [vmem:[%s144_s13 + $0x30] sm:$0xff] }
  0x12   : > { %v156_v2 = vld [vmem:[%s144_s13] sm:$0xff]  ;;  %v174_v3 = vmax.f32 %v160_v0, %v161_v1  ;;  %v157_v4 = vld [vmem:[%s144_s13 + $0x8] sm:$0xff]  ;;  %v163_v6 = vld [vmem:[%s144_s13 + $0x38] sm:$0xff] }
  0x13   : > { %v172_v7 = vmax.f32 %v156_v2, %v157_v4  ;;  %v158_v8 = vld [vmem:[%s144_s13 + $0x10] sm:$0xff]  ;;  %v159_v9 = vld [vmem:[%s144_s13 + $0x18] sm:$0xff]  ;;  %v175_v10 = vmax.f32 %v162_v5, %v163_v6  ;;  %v164_v14 = vld [vmem:[%s144_s13 + $0x40] sm:$0xff] }
  0x14   : > { %192 = vrot.lane.b32.xlu1 %v174_v3, %s378_s14  ;;  %v173_v11 = vmax.f32 %v158_v8, %v159_v9  ;;  %v166_v12 = vld [vmem:[%s144_s13 + $0x50] sm:$0xff]  ;;  %v167_v13 = vld [vmem:[%s144_s13 + $0x58] sm:$0xff]  ;;  %v165_v15 = vld [vmem:[%s144_s13 + $0x48] sm:$0xff] }
  0x15   : > { %188 = vrot.lane.b32.xlu0 %v172_v7, %s378_s14  ;;  %v177_v16 = vmax.f32 %v166_v12, %v167_v13  ;;  %v176_v17 = vmax.f32 %v164_v14, %v165_v15  ;;  %v170_v18 = vld [vmem:[%s144_s13 + $0x70] sm:$0xff]  ;;  %v171_v19 = vld [vmem:[%s144_s13 + $0x78] sm:$0xff]  ;;  %v168_v20 = vld [vmem:[%s144_s13 + $0x60] sm:$0xff] }
  0x16   : > { %v169_v21 = vld [vmem:[%s144_s13 + $0x68] sm:$0xff]  ;;  %v179_v22 = vmax.f32 %v170_v18, %v171_v19 }
  0x17   : > { %v178_v23 = vmax.f32 %v168_v20, %v169_v21 }
  0x18   : > { %194 = vrot.lane.b32.xlu1 %v175_v10, %s378_s14 }
  0x19   : > { %190 = vrot.lane.b32.xlu0 %v173_v11, %s378_s14 }
  0x1c   : > { %198 = vrot.lane.b32.xlu1 %v177_v16, %s378_s14 }
  0x1d   : > { %196 = vrot.lane.b32.xlu0 %v176_v17, %s378_s14 }
  0x20   : > { %202 = vrot.lane.b32.xlu1 %v179_v22, %s378_s14 }
  0x21   : > { %200 = vrot.lane.b32.xlu0 %v178_v23, %s378_s14 }
  0x86   : > { %v193_v24 = vpop.permute.xlu1 %192 }
  0x87   : > { %v214_v25 = vmax.f32 %v174_v3, %v193_v24  ;;  %v189_v26 = vpop.permute.xlu0 %188 }
  0x88   : > { %v212_v27 = vmax.f32 %v172_v7, %v189_v26 }
  0x89   : > { %223 = vst.msk [vmem:[%s154_s18 + $0x10] sm:$0xff] %vm220_vm0, %v214_v25 }
  0x8a   : > { %221 = vst.msk [vmem:[%s154_s18] sm:$0xff] %vm220_vm0, %v212_v27  ;;  %v195_v28 = vpop.permute.xlu1 %194 }
  0x8b   : > { %v215_v29 = vmax.f32 %v175_v10, %v195_v28  ;;  %v191_v30 = vpop.permute.xlu0 %190 }
  0x8c   : > { %v213_v31 = vmax.f32 %v173_v11, %v191_v30 }
  0x8d   : > { %224 = vst.msk [vmem:[%s154_s18 + $0x18] sm:$0xff] %vm220_vm0, %v215_v29 }
  0x8e   : > { %222 = vst.msk [vmem:[%s154_s18 + $0x8] sm:$0xff] %vm220_vm0, %v213_v31  ;;  %v199_v32 = vpop.permute.xlu1 %198 }
  0x8f   : > { %v217_v33 = vmax.f32 %v177_v16, %v199_v32  ;;  %v197_v34 = vpop.permute.xlu0 %196 }
  0x90   : > { %v216_v35 = vmax.f32 %v176_v17, %v197_v34 }
  0x91   : > { %226 = vst.msk [vmem:[%s154_s18 + $0x28] sm:$0xff] %vm220_vm0, %v217_v33 }
  0x92   : > { %225 = vst.msk [vmem:[%s154_s18 + $0x20] sm:$0xff] %vm220_vm0, %v216_v35  ;;  %v203_v36 = vpop.permute.xlu1 %202 }
  0x93   : > { %v219_v37 = vmax.f32 %v179_v22, %v203_v36  ;;  %v201_v38 = vpop.permute.xlu0 %200 }
  0x94   : > { %v218_v39 = vmax.f32 %v178_v23, %v201_v38 }
  0x95   : > { %228 = vst.msk [vmem:[%s154_s18 + $0x38] sm:$0xff] %vm220_vm0, %v219_v37 }
  0x96   : > { %227 = vst.msk [vmem:[%s154_s18 + $0x30] sm:$0xff] %vm220_vm0, %v218_v39 }
  0x97 PF: > { %s11_s8 = sadd.s32 1, %s376_s8   ;;  %s436_s6 = smov %s372_s7 }
  0x98   : > { %p8_p5 = scmp.ge.s32.totalorder %s11_s8, 4   ;;  %s437_s7 = smov %s439_s9 }
  0x9a   :  { %10 = sbr.rel (!%p8_p5) target bundleno = 2 (0x2), region = 54 }

// kernel: _lambda_.7
= control target key start
LH: loop header
LB: loop body
LE: loop exit
PB: predicated region body
PF: predicated region fallthrough
CT: control target
= control target key end

     0   :  { %s1858_s12 = smov 0   ;;  %s1860_s13 = smov 0   ;;  %s2696_s0 = inlined_call_operand.vmem [shape: f32[4,10,18,64], index: 0, kind: input, shape index: {}]   ;;  %s2697_s1 = inlined_call_operand.vmem [shape: f32[576,64], index: 1, kind: input, shape index: {}]   ;;  %s2698_s2 = inlined_call_operand.vmem [shape: f32[1,64], index: 2, kind: input, shape index: {}]   ;;  %s2699_s3 = inlined_call_operand.vmem [shape: f32[2,16,16,64], index: 3, kind: output, shape index: {}]  }
   0x1   :  { %s1862_s14 = smov 0   ;;  %s1864_s15 = smov 0  }
   0x2   :  { %s1866_s16 = smov 0  }
   0x3 LB: > { %s22_s17 = sadd.s32 1, %s1827_s14  ;;  %s25_s18 = sadd.s32 1, %s1831_s15  ;;  %s1835_s16 = sphi %s1866_s16, %s13_s16   ;;  %s1831_s15 = sphi %s1864_s15, %s2751_s15   ;;  %s1827_s14 = sphi %s1862_s14, %s2750_s14   ;;  %s1823_s13 = sphi %s1860_s13, %s2749_s13   ;;  %s1819_s12 = sphi %s1858_s12, %s2748_s12  }
   0x4   : > { %p23_p0 = scmp.ge.s32.totalorder %s22_s17, 2  ;;  %p1287_p1 = scmp.ge.s32.totalorder %s1835_s16, 1 }
   0x5   : > { %p159_p2 = scmp.lt.s32.totalorder %s1835_s16, 5 }
   0x6   : > { %s2753_s17 = smov (%p23_p0, %s22_s17), 0  ;;  %s2755_s18 = smov (!%p23_p0, %s25_s18), %s1831_s15 }
   0x7   : > { %p160_p3 = pnand %p1287_p1, %p159_p2  ;;  %p27_p4 = scmp.ge.s32.totalorder %s2755_s18, 2 }
   0x9   : > { %s2757_s18 = smov (%p27_p4, %s2755_s18), 0  ;;  %163 = sbr.rel (%p160_p3) target bundleno = 447 (0x1bf), region = 32 }
  0x10   : > { %s1288_s19 = sshll.u32 %s1823_s13, 1  ;;  %v629_v0 = vld [vmem:[%s2697_s1 + $0x80] sm:$0xff]  ;;  %v630_v1 = vld [vmem:[%s2697_s1 + $0x88] sm:$0xff]  ;;  %v631_v12 = vld [vmem:[%s2697_s1 + $0x90] sm:$0xff]  ;;  %vm264_vm0 = vcmask 1046528   ;;  %vm305_vm1 = vcmask 1045504  }
  0x11   : > { %s191_s24 = sadd.s32 %s1819_s12, %s1288_s19  ;;  %v1537_v2 = vpack.c.bf16 %v630_v1, %v629_v0  ;;  %v661_v3 = vld [vmem:[%s2697_s1 + $0x180] sm:$0xff]  ;;  %v662_v4 = vld [vmem:[%s2697_s1 + $0x188] sm:$0xff]  ;;  %v632_v13 = vld [vmem:[%s2697_s1 + $0x98] sm:$0xff]  ;;  %vm560_vm2 = vcmask 523264   ;;  %p200_p6 = scmp.lt.s32.totalorder %s1823_s13, 1 }
  0x12   : > { %v613_v5 = vld [vmem:[%s2697_s1] sm:$0xff]  ;;  %p192_p5 = scmp.lt.s32.totalorder %s191_s24, 3  ;;  %v1569_v6 = vpack.c.bf16 %v662_v4, %v661_v3  ;;  %v614_v7 = vld [vmem:[%s2697_s1 + $0x8] sm:$0xff]  ;;  %v663_v14 = vld [vmem:[%s2697_s1 + $0x190] sm:$0xff]  ;;  %v1541_v15 = vpack.c.bf16 %v632_v13, %v631_v12 }
  0x13   : > { %v645_v8 = vld [vmem:[%s2697_s1 + $0x100] sm:$0xff]  ;;  %v646_v9 = vld [vmem:[%s2697_s1 + $0x108] sm:$0xff]  ;;  %1538 = vmatprep.subr.bf16.mxu0 %v1537_v2  ;;  %v1539_v10 = vpack.c.bf16 %v614_v7, %v613_v5  ;;  %v664_v16 = vld [vmem:[%s2697_s1 + $0x198] sm:$0xff]  ;;  %s2761_s13 = smov (!%p200_p6, %s1823_s13), 1 }
  0x14   : > { %v1571_v11 = vpack.c.bf16 %v646_v9, %v645_v8  ;;  %s2759_s24 = smov (!%p192_p5, %s191_s24), 3  ;;  %1570 = vmatprep.subr.bf16.mxu1 %v1569_v6  ;;  %v615_v17 = vld [vmem:[%s2697_s1 + $0x10] sm:$0xff]  ;;  %v616_v18 = vld [vmem:[%s2697_s1 + $0x18] sm:$0xff]  ;;  %v1573_v19 = vpack.c.bf16 %v664_v16, %v663_v14  ;;  %v633_v23 = vld [vmem:[%s2697_s1 + $0xa0] sm:$0xff]  ;;  %s1292_s21 = sshll.u32 %s2761_s13, 5 }
  0x15   : > { %1540 = vmatpush3.bf16.msra.mxu0 %v1539_v10  ;;  %v1543_v20 = vpack.c.bf16 %v616_v18, %v615_v17  ;;  %v647_v21 = vld [vmem:[%s2697_s1 + $0x110] sm:$0xff]  ;;  %v648_v22 = vld [vmem:[%s2697_s1 + $0x118] sm:$0xff]  ;;  %s1625_s9 = smul.u32 240, %s2759_s24  ;;  %v634_v25 = vld [vmem:[%s2697_s1 + $0xa8] sm:$0xff] }
  0x16   : > { %1572 = vmatpush3.bf16.msra.mxu1 %v1571_v11  ;;  %1542 = vmatprep.subr.bf16.mxu0 %v1541_v15  ;;  %v1575_v24 = vpack.c.bf16 %v648_v22, %v647_v21  ;;  %v665_v26 = vld [vmem:[%s2697_s1 + $0x1a0] sm:$0xff]  ;;  %v666_v27 = vld [vmem:[%s2697_s1 + $0x1a8] sm:$0xff]  ;;  %v1545_v28 = vpack.c.bf16 %v634_v25, %v633_v23  ;;  %v635_v34 = vld [vmem:[%s2697_s1 + $0xb0] sm:$0xff] }
  0x17   : > { %1574 = vmatprep.subr.bf16.mxu1 %v1573_v19  ;;  %v1577_v29 = vpack.c.bf16 %v666_v27, %v665_v26  ;;  %v617_v30 = vld [vmem:[%s2697_s1 + $0x20] sm:$0xff]  ;;  %v618_v31 = vld [vmem:[%s2697_s1 + $0x28] sm:$0xff]  ;;  %s1966_s4 = scalar_lea.vmem %s2696_s0, %s1625_s9  ;;  %v636_v35 = vld [vmem:[%s2697_s1 + $0xb8] sm:$0xff]  ;;  %s1837_s9 = smov 64  }
  0x18   : > { %v649_v32 = vld [vmem:[%s2697_s1 + $0x120] sm:$0xff]  ;;  %v650_v33 = vld [vmem:[%s2697_s1 + $0x128] sm:$0xff]  ;;  %v1978_v36 = vld [vmem:[%s1966_s4 + $0x18] sm:$0xff]  ;;  %v1547_v39 = vpack.c.bf16 %v618_v31, %v617_v30  ;;  %v1549_v46 = vpack.c.bf16 %v636_v35, %v635_v34 }
  0x19   : > { %v1981_v37 = vld [vmem:[%s1966_s4 + $0x30] sm:$0xff]  ;;  %v1984_v38 = vld [vmem:[%s1966_s4 + $0x38] sm:$0xff]  ;;  %1544 = vmatpush3.bf16.msra.mxu0 %v1543_v20  ;;  %v1579_v40 = vpack.c.bf16 %v650_v33, %v649_v32  ;;  %v1989_v43 = vld [vmem:[%s1966_s4 + $0x20] sm:$0xff]  ;;  %v311_v51 = vrot.slane %v1978_v36, 2  ;;  %v270_v9 = vrot.slane %v1978_v36, 1 }
  0x1a   : > { %1576 = vmatpush3.bf16.msra.mxu1 %v1575_v24  ;;  %v275_v41 = vrot.slane %v1981_v37, 1  ;;  %v276_v42 = vrot.slane %v1984_v38, 1  ;;  %v218_v44 = vld [vmem:[%s1966_s4 + $0x40] sm:$0x3]  ;;  %1546 = vmatprep.subr.bf16.mxu0 %v1545_v28  ;;  %v1996_v49 = vld [vmem:[%s1966_s4 + $0x8] sm:$0xff]  ;;  %v312_v55 = vrot.slane %v1989_v43, 2 }
  0x1b   : > { %v1993_v45 = vld [vmem:[%s1966_s4] sm:$0xff]  ;;  %1578 = vmatprep.subr.bf16.mxu1 %v1577_v29  ;;  %v278_v47 = vrot.slane %v218_v44, 1  ;;  %v319_v48 = vrot.slane %v218_v44, 2  ;;  %v2001_v52 = vld [vmem:[%s1966_s4 + $0x48] sm:$0xff]  ;;  %v266_v54 = vrot.slane %v1996_v49, 1  ;;  %v2019_v62 = vld [vmem:[%s1966_s4 + $0x50] sm:$0xff] }
  0x1c   : > { %v265_v50 = vrot.slane %v1993_v45, 1  ;;  %v2004_v53 = vsel %vm264_vm0, %v275_v41, %v276_v42  ;;  %v2009_v56 = vld [vmem:[%s1966_s4 + $0x10] sm:$0x3]  ;;  %v215_v57 = vld [vmem:[%s1966_s4 + $0x28] sm:$0x3]  ;;  %v2025_v1 = vsel %vm305_vm1, %v311_v51, %v312_v55  ;;  %v280_v2 = vrot.slane %v2001_v52, 1 }
  0x1d   : > { %v1667_v58 = vpack.i.bf16 %v1978_v36, %v2004_v53  ;;  %v2015_v59 = vsel %vm264_vm0, %v276_v42, %v278_v47  ;;  %v268_v60 = vrot.slane %v2009_v56, 1  ;;  %v314_v61 = vrot.slane %v215_v57, 2  ;;  %1548 = vmatpush3.bf16.msra.mxu0 %v1547_v39  ;;  %v221_v3 = vld [vmem:[%s1966_s4 + $0x58] sm:$0x3]  ;;  %v2042_v12 = vld [vmem:[%s1966_s4 + $0x60] sm:$0xff]  ;;  %v2049_v17 = vld [vmem:[%s1966_s4 + $0x68] sm:$0xff] }
  0x1e   : > { %1580 = vmatpush3.bf16.msra.mxu1 %v1579_v40  ;;  %v1677_v63 = vpack.i.bf16 %v1989_v43, %v2015_v59  ;;  %v267_v0 = vsel %vm264_vm0, %v265_v50, %v266_v54  ;;  %1550 = vmatprep.subr.bf16.mxu0 %v1549_v46  ;;  %v281_v7 = vrot.slane %v2019_v62, 1  ;;  %v271_v10 = vrot.slane %v1989_v43, 1  ;;  %v224_v19 = vld [vmem:[%s1966_s4 + $0x70] sm:$0x3]  ;;  %v2078_v31 = vld [vmem:[%s1966_s4 + $0x78] sm:$0xff]  ;;  %v2081_v32 = vld [vmem:[%s1966_s4 + $0x80] sm:$0xff] }
  0x1f   : > { %1668 = vrot.lane.b32.xlu0 %v1667_v58, %s1837_s9  ;;  %v1672_v4 = vpack.i.bf16 %v2025_v1, %v267_v0  ;;  %v269_v5 = vsel %vm264_vm0, %v266_v54, %v268_v60  ;;  %v2033_v6 = vsel %vm305_vm1, %v312_v55, %v314_v61  ;;  %v316_v11 = vrot.slane %v1981_v37, 2  ;;  %v2087_v35 = vld [vmem:[%s1966_s4 + $0x88] sm:$0x3]  ;;  %v2119_v60 = vld [vmem:[%s1966_s4 + $0x90] sm:$0xff]  ;;  %v2122_v61 = vld [vmem:[%s1966_s4 + $0x98] sm:$0xff] }
  0x20   : > { %1678 = vrot.lane.b32.xlu1 %v1677_v63, %s1837_s9  ;;  %v1682_v8 = vpack.i.bf16 %v2033_v6, %v269_v5  ;;  %v2045_v13 = vsel %vm264_vm0, %v280_v2, %v281_v7  ;;  %v317_v14 = vrot.slane %v1984_v38, 2  ;;  %v283_v15 = vrot.slane %v221_v3, 1  ;;  %2722 = vst [vmem:[#allocation4_spill] sm:$0xff] %v2119_v60  ;;  %v2125_v63 = vld [vmem:[%s1966_s4 + $0xa0] sm:$0x3] }
  0x21   : > { %v273_v16 = vrot.slane %v215_v57, 1  ;;  %v2052_v18 = vsel %vm264_vm0, %v270_v9, %v271_v10  ;;  %v1687_v20 = vpack.i.bf16 %v1981_v37, %v2045_v13  ;;  %v285_v22 = vrot.slane %v2042_v12, 1 }
  0x22   : > { %v2059_v21 = vsel %vm305_vm1, %v316_v11, %v317_v14  ;;  %v2066_v24 = vsel %vm264_vm0, %v281_v7, %v283_v15  ;;  %v286_v26 = vrot.slane %v2049_v17, 1  ;;  %v2073_v27 = vsel %vm305_vm1, %v317_v14, %v319_v48  ;;  %v2148_v14 = vld [vmem:[%s1966_s4 + $0xa8] sm:$0xff]  ;;  %v2151_v15 = vld [vmem:[%s1966_s4 + $0xb0] sm:$0xff] }
  0x23   : > { %1673 = vrot.lane.b32.xlu0 %v1672_v4, %s1837_s9  ;;  %v1692_v23 = vpack.i.bf16 %v2059_v21, %v2052_v18  ;;  %v2069_v25 = vsel %vm264_vm0, %v271_v10, %v273_v16  ;;  %v288_v28 = vrot.slane %v224_v19, 1  ;;  %v321_v29 = vrot.slane %v2001_v52, 2  ;;  %v2154_v16 = vld [vmem:[%s1966_s4 + $0xb8] sm:$0x3] }
  0x24   : > { %1683 = vrot.lane.b32.xlu1 %v1682_v8, %s1837_s9  ;;  %v322_v30 = vrot.slane %v2019_v62, 2  ;;  %v1697_v33 = vpack.i.bf16 %v1984_v38, %v2066_v24  ;;  %v324_v34 = vrot.slane %v221_v3, 2  ;;  %v1702_v39 = vpack.i.bf16 %v2073_v27, %v2069_v25 }
  0x25   : > { %v2093_v40 = vsel %vm264_vm0, %v285_v22, %v286_v26  ;;  %v290_v41 = vrot.slane %v2078_v31, 1  ;;  %v291_v42 = vrot.slane %v2081_v32, 1  ;;  %v2098_v44 = vsel %vm264_vm0, %v286_v26, %v288_v28  ;;  %v619_v22 = vld [vmem:[%s2697_s1 + $0x30] sm:$0xff] }
  0x26   : > { %2720 = vst [vmem:[#allocation2_spill] sm:$0xff] %v2098_v44  ;;  %v2101_v46 = vsel %vm305_vm1, %v321_v29, %v322_v30  ;;  %v293_v47 = vrot.slane %v2087_v35, 1  ;;  %v1707_v48 = vpack.i.bf16 %v2001_v52, %v2093_v40  ;;  %v2108_v50 = vsel %vm305_vm1, %v322_v30, %v324_v34  ;;  %v620_v30 = vld [vmem:[%s2697_s1 + $0x38] sm:$0xff] }
  0x27   : > { %1688 = vrot.lane.b32.xlu0 %v1687_v20, %s1837_s9  ;;  %v326_v51 = vrot.slane %v2042_v12, 2  ;;  %v327_v54 = vrot.slane %v2049_v17, 2  ;;  %v1712_v55 = vpack.i.bf16 %v2098_v44, %v2101_v46  ;;  %v2116_v57 = vsel %vm264_vm0, %v290_v41, %v291_v42  ;;  %v668_v20 = vld [vmem:[%s2697_s1 + $0x1b8] sm:$0xff] }
  0x28   : > { %1693 = vrot.lane.b32.xlu1 %v1692_v23, %s1837_s9  ;;  %2721 = vst [vmem:[#allocation3_spill] sm:$0xff] %v2116_v57  ;;  %v329_v58 = vrot.slane %v224_v19, 2  ;;  %v1717_v0 = vpack.i.bf16 %v2108_v50, %v2019_v62  ;;  %v2130_v2 = vsel %vm264_vm0, %v291_v42, %v293_v47  ;;  %v1722_v3 = vpack.i.bf16 %v2042_v12, %v2116_v57  ;;  %v667_v19 = vld [vmem:[%s2697_s1 + $0x1b0] sm:$0xff]  ;;  %v652_v34 = vld [vmem:[%s2697_s1 + $0x138] sm:$0xff]  ;;  %v637_v47 = vld [vmem:[%s2697_s1 + $0xc0] sm:$0xff] }
  0x29   : > { %2723 = vst [vmem:[#allocation5_spill] sm:$0xff] %v2130_v2  ;;  %v2136_v4 = vsel %vm305_vm1, %v326_v51, %v327_v54  ;;  %v295_v5 = vrot.slane %v2119_v60, 1  ;;  %v296_v7 = vrot.slane %v2122_v61, 1  ;;  %v298_v9 = vrot.slane %v2125_v63, 1  ;;  %v669_v51 = vld [vmem:[%s2697_s1 + $0x1c0] sm:$0xff]  ;;  %v624_v44 = vld [vmem:[%s2697_s1 + $0x58] sm:$0xff] }
  0x2a   : > { %2724 = vst [vmem:[#allocation6_spill] sm:$0xff] %v2136_v4  ;;  %v2142_v8 = vsel %vm305_vm1, %v327_v54, %v329_v58  ;;  %v331_v10 = vrot.slane %v2078_v31, 2  ;;  %v332_v11 = vrot.slane %v2081_v32, 2  ;;  %v1727_v23 = vpack.i.bf16 %v2130_v2, %v2136_v4  ;;  %v670_v54 = vld [vmem:[%s2697_s1 + $0x1c8] sm:$0xff] }
  0x2b   : > { %1698 = vrot.lane.b32.xlu0 %v1697_v33, %s1837_s9  ;;  %2725 = vst [vmem:[#allocation7_spill] sm:$0xff] %v2142_v8  ;;  %v1732_v26 = vpack.i.bf16 %v2142_v8, %v2049_v17  ;;  %v2171_v28 = vsel %vm264_vm0, %v295_v5, %v296_v7  ;;  %v334_v29 = vrot.slane %v2087_v35, 2  ;;  %v651_v33 = vld [vmem:[%s2697_s1 + $0x130] sm:$0xff]  ;;  %v300_v35 = vrot.slane %v2148_v14, 1  ;;  %v622_v58 = vld [vmem:[%s2697_s1 + $0x48] sm:$0xff] }
  0x2c   : > { %1703 = vrot.lane.b32.xlu1 %v1702_v39, %s1837_s9  ;;  %2726 = vst [vmem:[#allocation8_spill] sm:$0xff] %v2171_v28  ;;  %v2185_v39 = vsel %vm264_vm0, %v296_v7, %v298_v9  ;;  %v2188_v41 = vsel %vm305_vm1, %v331_v10, %v332_v11  ;;  %v301_v42 = vrot.slane %v2151_v15, 1  ;;  %v1583_v5 = vpack.c.bf16 %v652_v34, %v651_v33  ;;  %v653_v7 = vld [vmem:[%s2697_s1 + $0x140] sm:$0xff]  ;;  %v654_v9 = vld [vmem:[%s2697_s1 + $0x148] sm:$0xff]  ;;  %v639_v10 = vld [vmem:[%s2697_s1 + $0xd0] sm:$0xff] }
  0x2d   : > { %2727 = vst [vmem:[#allocation9_spill] sm:$0xff] %v2185_v39  ;;  %2728 = vst [vmem:[#allocation10_spill] sm:$0xff] %v2188_v41  ;;  %v640_v33 = vld [vmem:[%s2697_s1 + $0xd8] sm:$0xff]  ;;  %v339_v2 = vrot.slane %v2125_v63, 2  ;;  %v2248_v8 = vld [vmem:[%s1966_s4 + $0xc8] sm:$0xff]  ;;  %v1585_v57 = vpack.c.bf16 %v670_v54, %v669_v51 }
  0x2e   : > { %v672_v34 = vld [vmem:[%s2697_s1 + $0x1d8] sm:$0xff]  ;;  %v655_v63 = vld [vmem:[%s2697_s1 + $0x150] sm:$0xff]  ;;  %v641_v51 = vld [vmem:[%s2697_s1 + $0xe0] sm:$0xff] }
  0x2f   : > { %1708 = vrot.lane.b32.xlu0 %v1707_v48, %s1837_s9  ;;  %v638_v48 = vld [vmem:[%s2697_s1 + $0xc8] sm:$0xff] }
  0x30   : > { %1713 = vrot.lane.b32.xlu1 %v1712_v55, %s1837_s9  ;;  %v621_v55 = vld [vmem:[%s2697_s1 + $0x40] sm:$0xff] }
  0x31   : > { %v1555_v4 = vpack.c.bf16 %v622_v58, %v621_v55 }
  0x33   : > { %1718 = vrot.lane.b32.xlu0 %v1717_v0, %s1837_s9  ;;  %v1581_v0 = vpack.c.bf16 %v668_v20, %v667_v19  ;;  %v1737_v19 = vpack.i.bf16 %v2078_v31, %v2171_v28  ;;  %v1742_v20 = vpack.i.bf16 %v2185_v39, %v2188_v41  ;;  %v2239_v39 = vsel %vm264_vm0, %v300_v35, %v301_v42  ;;  %v2244_v28 = vld [vmem:[%s1966_s4 + $0xc0] sm:$0xff]  ;;  %v623_v35 = vld [vmem:[%s2697_s1 + $0x50] sm:$0xff] }
  0x34   : > { %1723 = vrot.lane.b32.xlu1 %v1722_v3, %s1837_s9  ;;  %v1551_v3 = vpack.c.bf16 %v620_v30, %v619_v22  ;;  %v2225_v22 = vsel %vm305_vm1, %v332_v11, %v334_v29  ;;  %v303_v30 = vrot.slane %v2154_v16, 1  ;;  %2730 = vst [vmem:[#allocation12_spill] sm:$0xff] %v2239_v39  ;;  %v336_v11 = vrot.slane %v2119_v60, 2 }
  0x35   : > { %2729 = vst [vmem:[#allocation11_spill] sm:$0xff] %v2225_v22  ;;  %v337_v29 = vrot.slane %v2122_v61, 2  ;;  %1582 = vmatprep.subr.bf16.mxu1 %v1581_v0  ;;  %v1553_v41 = vpack.c.bf16 %v638_v48, %v637_v47  ;;  %v1557_v0 = vpack.c.bf16 %v640_v33, %v639_v10  ;;  %v656_v48 = vld [vmem:[%s2697_s1 + $0x158] sm:$0xff]  ;;  %v1752_v54 = vpack.i.bf16 %v2119_v60, %v2239_v39  ;;  %v626_v39 = vld [vmem:[%s2697_s1 + $0x68] sm:$0xff] }
  0x36   : > { %1552 = vmatpush3.bf16.msra.mxu0 %v1551_v3  ;;  %1584 = vmatpush3.bf16.msra.mxu1 %v1583_v5  ;;  %v2271_v55 = vsel %vm264_vm0, %v301_v42, %v303_v30  ;;  %v365_v58 = vrot.slane %v2244_v28, 1  ;;  %v642_v3 = vld [vmem:[%s2697_s1 + $0xe8] sm:$0xff]  ;;  %v673_v5 = vld [vmem:[%s2697_s1 + $0x1e0] sm:$0xff]  ;;  %v342_v10 = vrot.slane %v2151_v15, 2  ;;  %v2294_v30 = vld [vmem:[%s1966_s4 + $0xd8] sm:$0xff] }
  0x37   : > { %1728 = vrot.lane.b32.xlu0 %v1727_v23, %s1837_s9  ;;  %v671_v23 = vld [vmem:[%s2697_s1 + $0x1d0] sm:$0xff]  ;;  %1554 = vmatprep.subr.bf16.mxu0 %v1553_v41  ;;  %v1747_v41 = vpack.i.bf16 %v2225_v22, %v2081_v32  ;;  %2731 = vst [vmem:[#allocation13_spill] sm:$0xff] %v2271_v55  ;;  %v2285_v42 = vsel %vm305_vm1, %v336_v11, %v337_v29  ;;  %2732 = vst [vmem:[#allocation14_spill] sm:$0xff] %v2294_v30  ;;  %v625_v11 = vld [vmem:[%s2697_s1 + $0x60] sm:$0xff] }
  0x38   : > { %1733 = vrot.lane.b32.xlu1 %v1732_v26, %s1837_s9  ;;  %v1587_v26 = vpack.c.bf16 %v654_v9, %v653_v7  ;;  %v1589_v47 = vpack.c.bf16 %v672_v34, %v671_v23  ;;  %1586 = vmatprep.subr.bf16.mxu1 %v1585_v57  ;;  %v674_v7 = vld [vmem:[%s2697_s1 + $0x1e8] sm:$0xff]  ;;  %v366_v9 = vrot.slane %v2248_v8, 1  ;;  %v341_v57 = vrot.slane %v2148_v14, 2  ;;  %v2300_v23 = vld [vmem:[%s1966_s4 + $0xe0] sm:$0xff] }
  0x39   : > { %v2297_v33 = vsel %vm305_vm1, %v337_v29, %v339_v2  ;;  %2733 = vst [vmem:[#allocation15_spill] sm:$0xff] %v2300_v23  ;;  %v1591_v34 = vpack.c.bf16 %v656_v48, %v655_v63  ;;  %v1561_v22 = vpack.c.bf16 %v642_v3, %v641_v51  ;;  %v1593_v60 = vpack.c.bf16 %v674_v7, %v673_v5  ;;  %v657_v2 = vld [vmem:[%s2697_s1 + $0x160] sm:$0xff]  ;;  %v2343_v5 = vld [vmem:[%s1966_s4 + $0xe8] sm:$0x3] }
  0x3a   : > { %1556 = vmatpush3.bf16.msra.mxu0 %v1555_v4  ;;  %1588 = vmatpush3.bf16.msra.mxu1 %v1587_v26  ;;  %v643_v4 = vld [vmem:[%s2697_s1 + $0xf0] sm:$0xff]  ;;  %v1757_v29 = vpack.i.bf16 %v2271_v55, %v2285_v42  ;;  %v344_v26 = vrot.slane %v2154_v16, 2  ;;  %v1762_v63 = vpack.i.bf16 %v2297_v33, %v2122_v61  ;;  %v2334_v48 = vsel %vm264_vm0, %v365_v58, %v366_v9 }
  0x3b   : > { %1738 = vrot.lane.b32.xlu0 %v1737_v19, %s1837_s9  ;;  %v2291_v19 = vld [vmem:[%s1966_s4 + $0xd0] sm:$0x3]  ;;  %1558 = vmatprep.subr.bf16.mxu0 %v1557_v0  ;;  %v2337_v16 = vsel %vm305_vm1, %v341_v57, %v342_v10  ;;  %v395_v3 = vrot.slane %v2300_v23, 1  ;;  %s1290_s4 = sshll.u32 %s1819_s12, 3 }
  0x3c   : > { %1743 = vrot.lane.b32.xlu1 %v1742_v20, %s1837_s9  ;;  %v1559_v20 = vpack.c.bf16 %v624_v44, %v623_v35  ;;  %1590 = vmatprep.subr.bf16.mxu1 %v1589_v47  ;;  %v658_v44 = vld [vmem:[%s2697_s1 + $0x168] sm:$0xff]  ;;  %v644_v35 = vld [vmem:[%s2697_s1 + $0xf8] sm:$0xff]  ;;  %v675_v0 = vld [vmem:[%s2697_s1 + $0x1f0] sm:$0xff]  ;;  %v368_v51 = vrot.slane %v2291_v19, 1  ;;  %p202_p7 = scmp.lt.s32.totalorder %s1290_s4, 15 }
  0x3d   : > { %v676_v47 = vld [vmem:[%s2697_s1 + $0x1f8] sm:$0xff]  ;;  %v1595_v7 = vpack.c.bf16 %v658_v44, %v657_v2  ;;  %v627_v58 = vld [vmem:[%s2697_s1 + $0x70] sm:$0xff]  ;;  %v1565_v57 = vpack.c.bf16 %v644_v35, %v643_v4  ;;  %v386_v44 = vrot.slane %v2244_v28, 2  ;;  %v387_v4 = vrot.slane %v2248_v8, 2 }
  0x3e   : > { %1560 = vmatpush3.bf16.msra.mxu0 %v1559_v20  ;;  %1592 = vmatpush3.bf16.msra.mxu1 %v1591_v34  ;;  %v1597_v55 = vpack.c.bf16 %v676_v47, %v675_v0  ;;  %v659_v23 = vld [vmem:[%s2697_s1 + $0x170] sm:$0xff]  ;;  %v2363_v20 = vsel %vm305_vm1, %v342_v10, %v344_v26  ;;  %v677_v34 = vld [vmem:[%s2697_s1 + $0x200] sm:$0xff]  ;;  %v2373_v2 = vsel %vm264_vm0, %v366_v9, %v368_v51  ;;  %v389_v10 = vrot.slane %v2291_v19, 2  ;;  %s2763_s4 = smov (!%p202_p7, %s1290_s4), 15 }
  0x3f   : > { %1748 = vrot.lane.b32.xlu0 %v1747_v41, %s1837_s9  ;;  %v394_v41 = vrot.slane %v2294_v30, 1  ;;  %1562 = vmatprep.subr.bf16.mxu0 %v1561_v22  ;;  %v628_v30 = vld [vmem:[%s2697_s1 + $0x78] sm:$0xff]  ;;  %v1767_v22 = vpack.i.bf16 %v2334_v48, %v2148_v14  ;;  %v397_v26 = vrot.slane %v2343_v5, 1  ;;  %v1777_v9 = vpack.i.bf16 %v2363_v20, %v2373_v2  ;;  %s1291_s12 = sshll.u32 %s2763_s4, 1 }
  0x40   : > { %1753 = vrot.lane.b32.xlu1 %v1752_v54, %s1837_s9  ;;  %v1563_v54 = vpack.c.bf16 %v626_v39, %v625_v11  ;;  %1594 = vmatprep.subr.bf16.mxu1 %v1593_v60  ;;  %v660_v39 = vld [vmem:[%s2697_s1 + $0x178] sm:$0xff]  ;;  %v1772_v60 = vpack.i.bf16 %v2151_v15, %v2337_v16  ;;  %v678_v11 = vld [vmem:[%s2697_s1 + $0x208] sm:$0xff]  ;;  %v1567_v35 = vpack.c.bf16 %v628_v30, %v627_v58  ;;  %v309_v58 = vrot.slane %v2009_v56, 2  ;;  %s206_s22 = sadd.s32 %s1292_s21, %s1291_s12 }
  0x41   : > { %v1599_v0 = vpack.c.bf16 %v660_v39, %v659_v23  ;;  %v1601_v47 = vpack.c.bf16 %v678_v11, %v677_v34  ;;  %v2389_v51 = vsel %vm305_vm1, %v387_v4, %v389_v10  ;;  %v398_v30 = vsel %vm264_vm0, %v395_v3, %v397_v26  ;;  %v680_v10 = vld [vmem:[%s2697_s1 + $0x218] sm:$0xff]  ;;  %s1293_s23 = sshll.u32 %s206_s22, 3 }
  0x42   : > { %1564 = vmatpush3.bf16.msra.mxu0 %v1563_v54  ;;  %1596 = vmatpush3.bf16.msra.mxu1 %v1595_v7  ;;  %v1792_v23 = vpack.i.bf16 %v2389_v51, %v398_v30  ;;  %s2637_s24 = scalar_lea.vmem %s2699_s3, %s1293_s23 }
  0x43   : > { %1758 = vrot.lane.b32.xlu0 %v1757_v29, %s1837_s9  ;;  %v396_v29 = vsel %vm264_vm0, %v394_v41, %v395_v3  ;;  %1566 = vmatprep.subr.bf16.mxu0 %v1565_v57  ;;  %v306_v41 = vrot.slane %v1993_v45, 2  ;;  %v307_v3 = vrot.slane %v1996_v49, 2 }
  0x44   : > { %1763 = vrot.lane.b32.xlu1 %v1762_v63, %s1837_s9  ;;  %1598 = vmatprep.subr.bf16.mxu1 %v1597_v55  ;;  %v1782_v19 = vpack.i.bf16 %v396_v29, %v2244_v28  ;;  %v2386_v63 = vsel %vm305_vm1, %v386_v44, %v387_v4  ;;  %v679_v4 = vld [vmem:[%s2697_s1 + $0x210] sm:$0xff] }
  0x45   : > { %v1787_v55 = vpack.i.bf16 %v2248_v8, %v2386_v63  ;;  %v308_v7 = vsel %vm305_vm1, %v306_v41, %v307_v3  ;;  %v310_v29 = vsel %vm305_vm1, %v307_v3, %v309_v58 }
  0x46   : > { %1568 = vmatpush3.bf16.msra.mxu0 %v1567_v35  ;;  %1600 = vmatpush3.bf16.msra.mxu1 %v1599_v0 }
  0x47   : > { %1768 = vrot.lane.b32.xlu0 %v1767_v22, %s1837_s9  ;;  %1602 = vmatprep.subr.bf16.mxu0 %v1601_v47 }
  0x48   : > { %1773 = vrot.lane.b32.xlu1 %v1772_v60, %s1837_s9  ;;  %1617 = vmatprep.subr.bf16.mxu1 %v1601_v47 }
  0x4b   : > { %1778 = vrot.lane.b32.xlu0 %v1777_v9, %s1837_s9 }
  0x4c   : > { %1783 = vrot.lane.b32.xlu1 %v1782_v19, %s1837_s9  ;;  %v1605_v19 = vpack.c.bf16 %v680_v10, %v679_v4 }
  0x4f   : > { %1788 = vrot.lane.b32.xlu0 %v1787_v55, %s1837_s9 }
  0x50   : > { %1793 = vrot.lane.b32.xlu1 %v1792_v23, %s1837_s9 }
  0x91   : > { %v1669_v54 = vpop.permute.xlu0 %1668 }
  0x92   : > { %v1671_v57 = vunpack.i.h.bf16 %v1669_v54  ;;  %v1670_v39 = vunpack.i.l.bf16 %v1669_v54  ;;  %v1679_v22 = vpop.permute.xlu1 %1678  ;;  %v681_v54 = vld [vmem:[%s2697_s1 + $0x220] sm:$0xff] }
  0x93   : > { %v1681_v60 = vunpack.i.h.bf16 %v1679_v22  ;;  %v1680_v34 = vunpack.i.l.bf16 %v1679_v22 }
  0x94   : > { %v577_v11 = vsel %vm560_vm2, %v308_v7, %v1671_v57  ;;  %v2406_v44 = vsel %vm560_vm2, %v1981_v37, %v1670_v39 }
  0x95   : > { %788 = vmatprep.mubr.f32.mxu0 %v577_v11  ;;  %933 = vmatprep.mubr.f32.mxu1 %v2406_v44  ;;  %v1674_v56 = vpop.permute.xlu0 %1673  ;;  %v578_v23 = vsel %vm560_vm2, %v310_v29, %v1681_v60  ;;  %v2423_v41 = vsel %vm560_vm2, %v1984_v38, %v1680_v34  ;;  %v684_v11 = vld [vmem:[%s2697_s1 + $0x238] sm:$0xff] }
  0x96   : > { %v1676_v26 = vunpack.i.h.bf16 %v1674_v56  ;;  %v1675_v35 = vunpack.i.l.bf16 %v1674_v56  ;;  %v1684_v0 = vpop.permute.xlu1 %1683 }
  0x97   : > { %v1686_v9 = vunpack.i.h.bf16 %v1684_v0  ;;  %v1685_v37 = vunpack.i.l.bf16 %v1684_v0 }
  0x98   : > { %v561_v30 = vsel %vm560_vm2, %v1993_v45, %v1675_v35  ;;  %v593_v55 = vsel %vm560_vm2, %v2052_v18, %v1676_v26  ;;  %v682_v45 = vld [vmem:[%s2697_s1 + $0x228] sm:$0xff] }
  0x99   : > { %789 = vmatmul.mubr.f32.vlgmr.msra.gmra.mrb[0].mxu0 %v561_v30  ;;  %934 = vmatmul.mubr.f32.vlgmr.msra.gmra.mrb[0].mxu1 %v593_v55  ;;  %v1689_v3 = vpop.permute.xlu0 %1688  ;;  %v562_v38 = vsel %vm560_vm2, %v1996_v49, %v1685_v37  ;;  %v594_v57 = vsel %vm560_vm2, %v2069_v25, %v1686_v9  ;;  %v1609_v34 = vpack.c.bf16 %v682_v45, %v681_v54  ;;  %v683_v25 = vld [vmem:[%s2697_s1 + $0x230] sm:$0xff] }
  0x9a   : > { %1604 = vmatpush3.bf16.msra.mxu0 %v1601_v47  ;;  %1621 = vmatpush3.bf16.msra.mxu1 %v1601_v47  ;;  %v1691_v18 = vunpack.i.h.bf16 %v1689_v3  ;;  %v1690_v7 = vunpack.i.l.bf16 %v1689_v3  ;;  %v1694_v58 = vpop.permute.xlu1 %1693  ;;  %v1613_v9 = vpack.c.bf16 %v684_v11, %v683_v25 }
  0x9b   : > { %793 = vmatprep.mubr.f32.mxu0 %v578_v23  ;;  %938 = vmatprep.mubr.f32.mxu1 %v2423_v41  ;;  %v1696_v39 = vunpack.i.h.bf16 %v1694_v58  ;;  %v1695_v22 = vunpack.i.l.bf16 %v1694_v58 }
  0x9c   : > { %v579_v60 = vsel %vm560_vm2, %v2025_v1, %v1691_v18  ;;  %v2440_v47 = vsel %vm560_vm2, %v2001_v52, %v1690_v7  ;;  %1606 = vmatprep.subr.bf16.mxu0 %v1605_v19  ;;  %1618 = vmatprep.subr.bf16.mxu1 %v1605_v19 }
  0x9d   : > { %794 = vmatmul.mubr.f32.gmra.mrb[2].mxu0 %v562_v38  ;;  %939 = vmatmul.mubr.f32.gmra.mrb[2].mxu1 %v594_v57  ;;  %v1699_v49 = vpop.permute.xlu0 %1698  ;;  %v563_v10 = vsel %vm560_vm2, %v1978_v36, %v1695_v22  ;;  %v595_v56 = vsel %vm560_vm2, %v2004_v53, %v1696_v39 }
  0x9e   : > { %v1701_v4 = vunpack.i.h.bf16 %v1699_v49  ;;  %v1700_v1 = vunpack.i.l.bf16 %v1699_v49  ;;  %798 = vmatprep.mubr.f32.mxu0 %v579_v60  ;;  %943 = vmatprep.mubr.f32.mxu1 %v2440_v47  ;;  %v1704_v52 = vpop.permute.xlu1 %1703 }
  0x9f   : > { %v1706_v29 = vunpack.i.h.bf16 %v1704_v52  ;;  %v1705_v26 = vunpack.i.l.bf16 %v1704_v52  ;;  %1608 = vmatpush3.bf16.msra.mxu0 %v1605_v19  ;;  %1622 = vmatpush3.bf16.msra.mxu1 %v1605_v19 }
  0xa0   : > { %v580_v35 = vsel %vm560_vm2, %v2033_v6, %v1701_v4  ;;  %v2457_v0 = vsel %vm560_vm2, %v2019_v62, %v1700_v1  ;;  %1610 = vmatprep.subr.bf16.mxu0 %v1609_v34  ;;  %1619 = vmatprep.subr.bf16.mxu1 %v1609_v34 }
  0xa1   : > { %799 = vmatmul.mubr.f32.gmra.mrb[4].mxu0 %v563_v10  ;;  %944 = vmatmul.mubr.f32.gmra.mrb[4].mxu1 %v595_v56  ;;  %v1709_v36 = vpop.permute.xlu0 %1708  ;;  %v564_v19 = vsel %vm560_vm2, %v1989_v43, %v1705_v26  ;;  %v596_v6 = vsel %vm560_vm2, %v2015_v59, %v1706_v29  ;;  %v2734_v56 = vld [vmem:[#allocation2_spill] sm:$0xff] }
  0xa2   : > { %v1711_v37 = vunpack.i.h.bf16 %v1709_v36  ;;  %v1710_v30 = vunpack.i.l.bf16 %v1709_v36  ;;  %803 = vmatprep.mubr.f32.mxu0 %v580_v35  ;;  %948 = vmatprep.mubr.f32.mxu1 %v2457_v0  ;;  %v1714_v53 = vpop.permute.xlu1 %1713  ;;  %v2735_v35 = vld [vmem:[#allocation6_spill] sm:$0xff]  ;;  %v2736_v36 = vld [vmem:[#allocation4_spill] sm:$0xff] }
  0xa3   : > { %v1716_v62 = vunpack.i.h.bf16 %v1714_v53  ;;  %v1715_v55 = vunpack.i.l.bf16 %v1714_v53  ;;  %1612 = vmatpush3.bf16.msra.mxu0 %v1609_v34  ;;  %1623 = vmatpush3.bf16.msra.mxu1 %v1609_v34 }
  0xa4   : > { %v581_v23 = vsel %vm560_vm2, %v2059_v21, %v1711_v37  ;;  %v2468_v3 = vsel %vm560_vm2, %v2042_v12, %v1710_v30  ;;  %1614 = vmatprep.subr.bf16.mxu0 %v1613_v9  ;;  %1620 = vmatprep.subr.bf16.mxu1 %v1613_v9  ;;  %v2737_v30 = vld [vmem:[#allocation3_spill] sm:$0xff] }
  0xa5   : > { %804 = vmatmul.mubr.f32.gmra.mrb[6].mxu0 %v564_v19  ;;  %949 = vmatmul.mubr.f32.gmra.mrb[6].mxu1 %v596_v6  ;;  %v1719_v54 = vpop.permute.xlu0 %1718  ;;  %v597_v59 = vsel %vm560_vm2, %v2045_v13, %v1715_v55  ;;  %v2475_v7 = vsel %vm560_vm2, %v2049_v17, %v1716_v62 }
  0xa6   : > { %v1721_v43 = vunpack.i.h.bf16 %v1719_v54  ;;  %v1720_v45 = vunpack.i.l.bf16 %v1719_v54  ;;  %808 = vmatprep.mubr.f32.mxu0 %v581_v23  ;;  %953 = vmatprep.mubr.f32.mxu1 %v2468_v3  ;;  %v1724_v18 = vpop.permute.xlu1 %1723  ;;  %v2738_v23 = vld [vmem:[#allocation7_spill] sm:$0xff] }
  0xa7   : > { %v1726_v12 = vunpack.i.h.bf16 %v1724_v18  ;;  %v1725_v58 = vunpack.i.l.bf16 %v1724_v18  ;;  %1616 = vmatpush3.bf16.msra.mxu0 %v1613_v9  ;;  %1624 = vmatpush3.bf16.msra.mxu1 %v1613_v9 }
  0xa8   : > { %v582_v38 = vsel %vm560_vm2, %v2073_v27, %v1720_v45  ;;  %v598_v39 = vsel %vm560_vm2, %v2066_v24, %v1721_v43  ;;  %v2739_v45 = vld [vmem:[#allocation5_spill] sm:$0xff] }
  0xa9   : > { %809 = vmatmul.mubr.f32.gmra.mrb[8].mxu0 %v2406_v44  ;;  %954 = vmatmul.mubr.f32.gmra.mrb[8].mxu1 %v597_v59  ;;  %v1729_v57 = vpop.permute.xlu0 %1728  ;;  %v583_v34 = vsel %vm560_vm2, %v2101_v46, %v1726_v12  ;;  %v571_v49 = vsel %vm560_vm2, %v2078_v31, %v1725_v58 }
  0xaa   : > { %958 = vmatprep.mubr.f32.mxu1 %v2475_v7  ;;  %813 = vmatprep.mubr.f32.mxu0 %v582_v38  ;;  %v1730_v13 = vunpack.i.l.bf16 %v1729_v57  ;;  %v1734_v17 = vpop.permute.xlu1 %1733  ;;  %v1731_v22 = vunpack.i.h.bf16 %v1729_v57  ;;  %v2740_v38 = vld [vmem:[#allocation10_spill] sm:$0xff] }
  0xab   : > { %v1735_v60 = vunpack.i.l.bf16 %v1734_v17  ;;  %v1736_v25 = vunpack.i.h.bf16 %v1734_v17 }
  0xac   : > { %v599_v11 = vsel %vm560_vm2, %v2093_v40, %v1730_v13  ;;  %v2492_v4 = vsel %vm560_vm2, %v2081_v32, %v1731_v22  ;;  %v2741_v13 = vld [vmem:[#allocation8_spill] sm:$0xff] }
  0xad   : > { %814 = vmatmul.mubr.f32.gmra.mrb[10].mxu0 %v2423_v41  ;;  %959 = vmatmul.mubr.f32.gmra.mrb[10].mxu1 %v598_v39  ;;  %v1739_v44 = vpop.permute.xlu0 %1738  ;;  %v584_v31 = vsel %vm560_vm2, %v2108_v50, %v1735_v60  ;;  %v600_v40 = vsel %vm560_vm2, %v2734_v56, %v1736_v25 }
  0xae   : > { %818 = vmatprep.mubr.f32.mxu0 %v583_v34  ;;  %963 = vmatprep.mubr.f32.mxu1 %v571_v49  ;;  %v1744_v24 = vpop.permute.xlu1 %1743  ;;  %v1741_v1 = vunpack.i.h.bf16 %v1739_v44  ;;  %v1740_v52 = vunpack.i.l.bf16 %v1739_v44  ;;  %v2742_v44 = vld [vmem:[#allocation11_spill] sm:$0xff] }
  0xaf   : > { %v1745_v10 = vunpack.i.l.bf16 %v1744_v24  ;;  %v1746_v26 = vunpack.i.h.bf16 %v1744_v24 }
  0xb0   : > { %v585_v9 = vsel %vm560_vm2, %v2735_v35, %v1741_v1  ;;  %v573_v37 = vsel %vm560_vm2, %v2736_v36, %v1740_v52 }
  0xb1   : > { %819 = vmatmul.mubr.f32.gmra.mrb[12].mxu0 %v2440_v47  ;;  %964 = vmatmul.mubr.f32.gmra.mrb[12].mxu1 %v599_v11  ;;  %v1749_v41 = vpop.permute.xlu0 %1748  ;;  %v601_v53 = vsel %vm560_vm2, %v2737_v30, %v1745_v10  ;;  %v574_v6 = vsel %vm560_vm2, %v2122_v61, %v1746_v26  ;;  %v2744_v10 = vld [vmem:[#allocation12_spill] sm:$0xff] }
  0xb2   : > { %968 = vmatprep.mubr.f32.mxu1 %v2492_v4  ;;  %823 = vmatprep.mubr.f32.mxu0 %v584_v31  ;;  %v1754_v29 = vpop.permute.xlu1 %1753  ;;  %v1750_v32 = vunpack.i.l.bf16 %v1749_v41  ;;  %v1751_v47 = vunpack.i.h.bf16 %v1749_v41 }
  0xb3   : > { %v1756_v62 = vunpack.i.h.bf16 %v1754_v29  ;;  %v1755_v55 = vunpack.i.l.bf16 %v1754_v29 }
  0xb4   : > { %v586_v54 = vsel %vm560_vm2, %v2738_v23, %v1750_v32  ;;  %v602_v59 = vsel %vm560_vm2, %v2739_v45, %v1751_v47 }
  0xb5   : > { %824 = vmatmul.mubr.f32.gmra.mrb[14].mxu0 %v2457_v0  ;;  %969 = vmatmul.mubr.f32.gmra.mrb[14].mxu1 %v600_v40  ;;  %v1759_v19 = vpop.permute.xlu0 %1758  ;;  %v587_v61 = vsel %vm560_vm2, %v2740_v38, %v1756_v62  ;;  %v575_v57 = vsel %vm560_vm2, %v2148_v14, %v1755_v55  ;;  %v2746_v62 = vld [vmem:[#allocation14_spill] sm:$0xff] }
  0xb6   : > { %828 = vmatprep.mubr.f32.mxu0 %v585_v9  ;;  %973 = vmatprep.mubr.f32.mxu1 %v573_v37  ;;  %v1764_v43 = vpop.permute.xlu1 %1763  ;;  %v1760_v0 = vunpack.i.l.bf16 %v1759_v19  ;;  %v1761_v12 = vunpack.i.h.bf16 %v1759_v19 }
  0xb7   : > { %v1765_v58 = vunpack.i.l.bf16 %v1764_v43 }
  0xb8   : > { %v603_v39 = vsel %vm560_vm2, %v2741_v13, %v1760_v0  ;;  %v576_v22 = vsel %vm560_vm2, %v2151_v15, %v1761_v12 }
  0xb9   : > { %829 = vmatmul.mubr.f32.gmra.mrb[16].mxu0 %v2468_v3  ;;  %974 = vmatmul.mubr.f32.gmra.mrb[16].mxu1 %v601_v53  ;;  %v1769_v18 = vpop.permute.xlu0 %1768  ;;  %v1766_v3 = vunpack.i.h.bf16 %v1764_v43  ;;  %v588_v25 = vsel %vm560_vm2, %v2742_v44, %v1765_v58  ;;  %v2747_v43 = vld [vmem:[#allocation15_spill] sm:$0xff] }
  0xba   : > { %978 = vmatprep.mubr.f32.mxu1 %v574_v6  ;;  %833 = vmatprep.mubr.f32.mxu0 %v586_v54  ;;  %v1774_v17 = vpop.permute.xlu1 %1773  ;;  %v1771_v60 = vunpack.i.h.bf16 %v1769_v18  ;;  %v1770_v34 = vunpack.i.l.bf16 %v1769_v18 }
  0xbb   : > { %v1775_v14 = vunpack.i.l.bf16 %v1774_v17  ;;  %v1776_v52 = vunpack.i.h.bf16 %v1774_v17 }
  0xbc   : > { %v589_v15 = vsel %vm560_vm2, %v2285_v42, %v1770_v34  ;;  %v609_v41 = vsel %vm560_vm2, %v2244_v28, %v1771_v60 }
  0xbd   : > { %834 = vmatmul.mubr.f32.gmra.mrb[18].mxu0 %v2475_v7  ;;  %979 = vmatmul.mubr.f32.gmra.mrb[18].mxu1 %v602_v59  ;;  %v1779_v11 = vpop.permute.xlu0 %1778  ;;  %v2743_v7 = vld [vmem:[#allocation9_spill] sm:$0xff]  ;;  %v605_v56 = vsel %vm560_vm2, %v2744_v10, %v1775_v14  ;;  %v590_v40 = vsel %vm560_vm2, %v2297_v33, %v1776_v52 }
  0xbe   : > { %838 = vmatprep.mubr.f32.mxu0 %v587_v61  ;;  %983 = vmatprep.mubr.f32.mxu1 %v575_v57  ;;  %v604_v24 = vsel %vm560_vm2, %v2743_v7, %v1766_v3  ;;  %v1784_v1 = vpop.permute.xlu1 %1783  ;;  %v1780_v31 = vunpack.i.l.bf16 %v1779_v11 }
  0xbf   : > { %v1786_v29 = vunpack.i.h.bf16 %v1784_v1  ;;  %v1785_v26 = vunpack.i.l.bf16 %v1784_v1 }
  0xc0   : > { %v610_v32 = vsel %vm560_vm2, %v2248_v8, %v1780_v31 }
  0xc1   : > { %839 = vmatmul.mubr.f32.gmra.mrb[20].mxu0 %v571_v49  ;;  %984 = vmatmul.mubr.f32.gmra.mrb[20].mxu1 %v603_v39  ;;  %v1781_v49 = vunpack.i.h.bf16 %v1779_v11  ;;  %v1789_v9 = vpop.permute.xlu0 %1788  ;;  %v591_v19 = vsel %vm560_vm2, %v2337_v16, %v1785_v26  ;;  %v611_v55 = vsel %vm560_vm2, %v2746_v62, %v1786_v29 }
  0xc2   : > { %988 = vmatprep.mubr.f32.mxu1 %v576_v22  ;;  %843 = vmatprep.mubr.f32.mxu0 %v588_v25  ;;  %v1794_v36 = vpop.permute.xlu1 %1793  ;;  %v1790_v28 = vunpack.i.l.bf16 %v1789_v9  ;;  %v1791_v30 = vunpack.i.h.bf16 %v1789_v9 }
  0xc3   : > { %v1795_v53 = vunpack.i.l.bf16 %v1794_v36  ;;  %v1796_v8 = vunpack.i.h.bf16 %v1794_v36 }
  0xc4   : > { %v592_v54 = vsel %vm560_vm2, %v2363_v20, %v1791_v30 }
  0xc5   : > { %844 = vmatmul.mubr.f32.gmra.mrb[22].mxu0 %v2492_v4  ;;  %989 = vmatmul.mubr.f32.gmra.mrb[22].mxu1 %v604_v24  ;;  %v2745_v4 = vld [vmem:[#allocation13_spill] sm:$0xff]  ;;  %v612_v0 = vsel %vm560_vm2, %v2747_v43, %v1795_v53 }
  0xc6   : > { %848 = vmatprep.mubr.f32.mxu0 %v589_v15  ;;  %993 = vmatprep.mubr.f32.mxu1 %v609_v41  ;;  %v606_v47 = vsel %vm560_vm2, %v2745_v4, %v1781_v49 }
  0xc9   : > { %849 = vmatmul.mubr.f32.gmra.mrb[24].mxu0 %v573_v37  ;;  %994 = vmatmul.mubr.f32.gmra.mrb[24].mxu1 %v605_v56  ;;  %v607_v37 = vsel %vm560_vm2, %v2334_v48, %v1790_v28  ;;  %v399_v48 = vrot.slane %v2746_v62, 2 }
  0xca   : > { %853 = vmatprep.mubr.f32.mxu0 %v590_v40  ;;  %998 = vmatprep.mubr.f32.mxu1 %v610_v32 }
  0xcd   : > { %854 = vmatmul.mubr.f32.gmra.mrb[26].mxu0 %v574_v6  ;;  %999 = vmatmul.mubr.f32.gmra.mrb[26].mxu1 %v606_v47  ;;  %v608_v6 = vsel %vm560_vm2, %v2373_v2, %v1796_v8  ;;  %v400_v2 = vrot.slane %v2747_v43, 2 }
  0xce   : > { %858 = vmatprep.mubr.f32.mxu0 %v591_v19  ;;  %1003 = vmatprep.mubr.f32.mxu1 %v611_v55 }
  0xd1   : > { %859 = vmatmul.mubr.f32.gmra.mrb[28].mxu0 %v575_v57  ;;  %1004 = vmatmul.mubr.f32.gmra.mrb[28].mxu1 %v607_v37 }
  0xd2   : > { %863 = vmatprep.mubr.f32.mxu0 %v592_v54  ;;  %1008 = vmatprep.mubr.f32.mxu1 %v612_v0 }
  0xd5   : > { %864 = vmatmul.mubr.f32.gmra.mrb[30].mxu0 %v576_v22  ;;  %1009 = vmatmul.mubr.f32.gmra.mrb[30].mxu1 %v608_v6 }
  0xd6   : > { %1513 = vmatprep.mubr.msk.f32.mxu0 %vm560_vm2, %v2059_v21  ;;  %1525 = vmatprep.mubr.msk.f32.mxu1 %vm560_vm2, %v2285_v42  ;;  %v402_v21 = vrot.slane %v2343_v5, 2 }
  0xd9   : > { %1514 = vmatmul.mubr.msk.f32.vlgmr.msra.gmra.mrb[32].mxu0 %vm560_vm2, %v2073_v27  ;;  %1526 = vmatmul.mubr.msk.f32.vlgmr.msra.gmra.mrb[32].mxu1 %vm560_vm2, %v2297_v33  ;;  %v401_v27 = vsel %vm305_vm1, %v399_v48, %v400_v2  ;;  %v2590_v33 = vld [vmem:[%s2698_s2] ss:$0 sm:$0xff] }
  0xda   : > { %1516 = vmatprep.mubr.msk.f32.mxu0 %vm560_vm2, %v2101_v46  ;;  %1528 = vmatprep.mubr.msk.f32.mxu1 %vm560_vm2, %v2337_v16  ;;  %v403_v46 = vsel %vm305_vm1, %v400_v2, %v402_v21 }
  0xdd   : > { %1517 = vmatmul.mubr.msk.f32.gmra.mrb[34].mxu0 %vm560_vm2, %v2108_v50  ;;  %1529 = vmatmul.mubr.msk.f32.gmra.mrb[34].mxu1 %vm560_vm2, %v2363_v20 }
  0xde   : > { %1519 = vmatprep.mubr.msk.f32.mxu0 %vm560_vm2, %v2735_v35  ;;  %1531 = vmatprep.mubr.msk.f32.mxu1 %vm560_vm2, %v2386_v63 }
  0xe1   : > { %1520 = vmatmul.mubr.msk.f32.gmra.mrb[36].mxu0 %vm560_vm2, %v2738_v23  ;;  %1532 = vmatmul.mubr.msk.f32.gmra.mrb[36].mxu1 %vm560_vm2, %v2389_v51 }
  0xe2   : > { %1522 = vmatprep.mubr.msk.f32.mxu0 %vm560_vm2, %v2740_v38  ;;  %1534 = vmatprep.mubr.msk.f32.mxu1 %vm560_vm2, %v401_v27 }
  0xe5   : > { %1523 = vmatmul.mubr.msk.f32.gmra.mrb[38].mxu0 %vm560_vm2, %v2742_v44  ;;  %1535 = vmatmul.mubr.msk.f32.gmra.mrb[38].mxu1 %vm560_vm2, %v403_v46 }
 0x16c   : > { %v1345_v50 = vpop.f32.mrb[0].mxu0  ;;  %v1425_v42 = vpop.f32.mrb[0].mxu1 }
 0x16d   : > { %v1346_v16 = vpop.f32.mrb[1].mxu0  ;;  %v1426_v5 = vpop.f32.mrb[1].mxu1 }
 0x16e   : > { %v1347_v20 = vadd.f32 %v1346_v16, %v1345_v50  ;;  %v1427_v63 = vadd.f32 %v1426_v5, %v1425_v42 }
 0x170   : > { %v791_v51 = vadd.f32 %v1347_v20, %v2590_v33  ;;  %v1348_v35 = vpop.f32.mrb[2].mxu0  ;;  %v1428_v23 = vpop.f32.mrb[2].mxu1 }
 0x171   : > { %v1349_v45 = vpop.f32.mrb[3].mxu0  ;;  %v1429_v59 = vpop.f32.mrb[3].mxu1 }
 0x172   : > { %v1350_v18 = vadd.f32 %v1349_v45, %v1348_v35  ;;  %v1430_v12 = vadd.f32 %v1429_v59, %v1428_v23  ;;  %v2593_v58 = vadd.f32 %v1427_v63, %v791_v51 }
 0x174   : > { %v796_v38 = vadd.f32 %v1350_v18, %v2590_v33  ;;  %v1351_v61 = vpop.f32.mrb[4].mxu0  ;;  %v1431_v57 = vpop.f32.mrb[4].mxu1 }
 0x175   : > { %v1352_v3 = vpop.f32.mrb[5].mxu0  ;;  %v1432_v13 = vpop.f32.mrb[5].mxu1 }
 0x176   : > { %v1353_v39 = vadd.f32 %v1352_v3, %v1351_v61  ;;  %v1433_v17 = vadd.f32 %v1432_v13, %v1431_v57  ;;  %v2596_v22 = vadd.f32 %v1430_v12, %v796_v38 }
 0x178   : > { %v801_v60 = vadd.f32 %v1353_v39, %v2590_v33  ;;  %v1354_v34 = vpop.f32.mrb[6].mxu0  ;;  %v1434_v44 = vpop.f32.mrb[6].mxu1 }
 0x179   : > { %v1355_v25 = vpop.f32.mrb[7].mxu0  ;;  %v1435_v11 = vpop.f32.mrb[7].mxu1 }
 0x17a   : > { %v1356_v14 = vadd.f32 %v1355_v25, %v1354_v34  ;;  %v1436_v7 = vadd.f32 %v1435_v11, %v1434_v44  ;;  %v2599_v24 = vadd.f32 %v1433_v17, %v801_v60 }
 0x17c   : > { %v806_v1 = vadd.f32 %v1356_v14, %v2590_v33  ;;  %v1357_v52 = vpop.f32.mrb[8].mxu0  ;;  %v1437_v31 = vpop.f32.mrb[8].mxu1 }
 0x17d   : > { %v1358_v15 = vpop.f32.mrb[9].mxu0  ;;  %v1438_v41 = vpop.f32.mrb[9].mxu1 }
 0x17e   : > { %v1359_v49 = vadd.f32 %v1358_v15, %v1357_v52  ;;  %v1439_v10 = vadd.f32 %v1438_v41, %v1437_v31  ;;  %v2602_v56 = vadd.f32 %v1436_v7, %v806_v1 }
 0x180   : > { %v811_v40 = vadd.f32 %v1359_v49, %v2590_v33  ;;  %v1360_v29 = vpop.f32.mrb[10].mxu0  ;;  %v1440_v26 = vpop.f32.mrb[10].mxu1 }
 0x181   : > { %v1361_v32 = vpop.f32.mrb[11].mxu0  ;;  %v1441_v9 = vpop.f32.mrb[11].mxu1 }
 0x182   : > { %v1362_v36 = vadd.f32 %v1361_v32, %v1360_v29  ;;  %v1442_v28 = vadd.f32 %v1441_v9, %v1440_v26  ;;  %v2605_v4 = vadd.f32 %v1439_v10, %v811_v40 }
 0x184   : > { %v816_v47 = vadd.f32 %v1362_v36, %v2590_v33  ;;  %v1363_v30 = vpop.f32.mrb[12].mxu0  ;;  %v1443_v53 = vpop.f32.mrb[12].mxu1 }
 0x185   : > { %v1364_v19 = vpop.f32.mrb[13].mxu0  ;;  %v1444_v62 = vpop.f32.mrb[13].mxu1 }
 0x186   : > { %v1365_v55 = vadd.f32 %v1364_v19, %v1363_v30  ;;  %v1445_v8 = vadd.f32 %v1444_v62, %v1443_v53  ;;  %v2608_v37 = vadd.f32 %v1442_v28, %v816_v47 }
 0x188   : > { %v821_v54 = vadd.f32 %v1365_v55, %v2590_v33  ;;  %v1366_v43 = vpop.f32.mrb[14].mxu0  ;;  %v1446_v0 = vpop.f32.mrb[14].mxu1 }
 0x189   : > { %v1367_v6 = vpop.f32.mrb[15].mxu0  ;;  %v1447_v48 = vpop.f32.mrb[15].mxu1 }
 0x18a   : > { %v1368_v2 = vadd.f32 %v1367_v6, %v1366_v43  ;;  %v1448_v21 = vadd.f32 %v1447_v48, %v1446_v0  ;;  %v2611_v27 = vadd.f32 %v1445_v8, %v821_v54 }
 0x18c   : > { %v826_v46 = vadd.f32 %v1368_v2, %v2590_v33  ;;  %v1369_v50 = vpop.f32.mrb[16].mxu0  ;;  %v1449_v42 = vpop.f32.mrb[16].mxu1 }
 0x18d   : > { %v1370_v16 = vpop.f32.mrb[17].mxu0  ;;  %v1450_v5 = vpop.f32.mrb[17].mxu1 }
 0x18e   : > { %v1371_v20 = vadd.f32 %v1370_v16, %v1369_v50  ;;  %v1451_v63 = vadd.f32 %v1450_v5, %v1449_v42  ;;  %v2614_v51 = vadd.f32 %v1448_v21, %v826_v46 }
 0x190   : > { %v831_v35 = vadd.f32 %v1371_v20, %v2590_v33  ;;  %v1372_v23 = vpop.f32.mrb[18].mxu0  ;;  %v1452_v45 = vpop.f32.mrb[18].mxu1 }
 0x191   : > { %v1373_v59 = vpop.f32.mrb[19].mxu0  ;;  %v1453_v18 = vpop.f32.mrb[19].mxu1 }
 0x192   : > { %v1374_v12 = vadd.f32 %v1373_v59, %v1372_v23  ;;  %v1454_v38 = vadd.f32 %v1453_v18, %v1452_v45  ;;  %v2617_v61 = vadd.f32 %v1451_v63, %v831_v35 }
 0x194   : > { %v836_v57 = vadd.f32 %v1374_v12, %v2590_v33  ;;  %v1375_v3 = vpop.f32.mrb[20].mxu0  ;;  %v1455_v13 = vpop.f32.mrb[20].mxu1 }
 0x195   : > { %v1376_v39 = vpop.f32.mrb[21].mxu0  ;;  %v1456_v17 = vpop.f32.mrb[21].mxu1 }
 0x196   : > { %v1377_v60 = vadd.f32 %v1376_v39, %v1375_v3  ;;  %v1457_v34 = vadd.f32 %v1456_v17, %v1455_v13  ;;  %v981_v44 = vadd.f32 %v1454_v38, %v836_v57 }
 0x198   : > { %v841_v25 = vadd.f32 %v1377_v60, %v2590_v33  ;;  %v1378_v11 = vpop.f32.mrb[22].mxu0  ;;  %v1458_v14 = vpop.f32.mrb[22].mxu1 }
 0x199   : > { %v1379_v7 = vpop.f32.mrb[23].mxu0  ;;  %v1459_v1 = vpop.f32.mrb[23].mxu1 }
 0x19a   : > { %v1380_v52 = vadd.f32 %v1379_v7, %v1378_v11  ;;  %v1460_v31 = vadd.f32 %v1459_v1, %v1458_v14  ;;  %v2622_v15 = vadd.f32 %v1457_v34, %v841_v25 }
 0x19c   : > { %v846_v41 = vadd.f32 %v1380_v52, %v2590_v33  ;;  %v1381_v49 = vpop.f32.mrb[24].mxu0  ;;  %v1461_v10 = vpop.f32.mrb[24].mxu1 }
 0x19d   : > { %v1382_v40 = vpop.f32.mrb[25].mxu0  ;;  %v1462_v29 = vpop.f32.mrb[25].mxu1 }
 0x19e   : > { %v1383_v26 = vadd.f32 %v1382_v40, %v1381_v49  ;;  %v1463_v32 = vadd.f32 %v1462_v29, %v1461_v10  ;;  %v991_v9 = vadd.f32 %v1460_v31, %v846_v41 }
 0x1a0   : > { %v851_v36 = vadd.f32 %v1383_v26, %v2590_v33  ;;  %v1384_v28 = vpop.f32.mrb[26].mxu0  ;;  %v1464_v47 = vpop.f32.mrb[26].mxu1 }
 0x1a1   : > { %v1385_v30 = vpop.f32.mrb[27].mxu0  ;;  %v1465_v53 = vpop.f32.mrb[27].mxu1 }
 0x1a2   : > { %v1386_v19 = vadd.f32 %v1385_v30, %v1384_v28  ;;  %v1466_v62 = vadd.f32 %v1465_v53, %v1464_v47  ;;  %v2628_v55 = vadd.f32 %v1463_v32, %v851_v36 }
 0x1a4   : > { %v856_v8 = vadd.f32 %v1386_v19, %v2590_v33  ;;  %v1387_v54 = vpop.f32.mrb[28].mxu0  ;;  %v1467_v43 = vpop.f32.mrb[28].mxu1 }
 0x1a5   : > { %v1388_v0 = vpop.f32.mrb[29].mxu0  ;;  %v1468_v6 = vpop.f32.mrb[29].mxu1 }
 0x1a6   : > { %v1389_v48 = vadd.f32 %v1388_v0, %v1387_v54  ;;  %v1469_v2 = vadd.f32 %v1468_v6, %v1467_v43  ;;  %v1001_v21 = vadd.f32 %v1466_v62, %v856_v8 }
 0x1a8   : > { %v861_v46 = vadd.f32 %v1389_v48, %v2590_v33  ;;  %v1390_v50 = vpop.f32.mrb[30].mxu0  ;;  %v1470_v42 = vpop.f32.mrb[30].mxu1 }
 0x1a9   : > { %v1391_v16 = vpop.f32.mrb[31].mxu0  ;;  %v1471_v5 = vpop.f32.mrb[31].mxu1 }
 0x1aa   : > { %v1392_v20 = vadd.f32 %v1391_v16, %v1390_v50  ;;  %v1472_v63 = vadd.f32 %v1471_v5, %v1470_v42  ;;  %v1006_v35 = vadd.f32 %v1469_v2, %v861_v46 }
 0x1ac   : > { %v866_v23 = vadd.f32 %v1392_v20, %v2590_v33  ;;  %v1515_v45 = vpop.f32.mrb[32].mxu0  ;;  %v1527_v59 = vpop.f32.mrb[32].mxu1 }
 0x1ad   : > { %v1086_v18 = vadd.f32 %v1515_v45, %v2596_v22  ;;  %v1126_v12 = vadd.f32 %v1527_v59, %v981_v44  ;;  %v1080_v38 = vpop.f32.mrb[33].mxu0  ;;  %v1120_v57 = vpop.f32.mrb[33].mxu1 }
 0x1ae   : > { %v1081_v3 = vadd.f32 %v1080_v38, %v2593_v58  ;;  %v1121_v33 = vadd.f32 %v1120_v57, %v2617_v61  ;;  %v1011_v13 = vadd.f32 %v1472_v63, %v866_v23 }
 0x1af   : > { %v1160_v39 = vmax.f32 %v1086_v18, 0.0  ;;  %v1168_v17 = vmax.f32 %v1126_v12, 0.0 }
 0x1b0   : > { %v1159_v22 = vmax.f32 %v1081_v3, 0.0  ;;  %v1167_v60 = vmax.f32 %v1121_v33, 0.0  ;;  %v1518_v34 = vpop.f32.mrb[34].mxu0  ;;  %v1530_v44 = vpop.f32.mrb[34].mxu1 }
 0x1b1   : > { %1176 = vst.msk [vmem:[%s2637_s24 + $0x8] sm:$0xff] %vm560_vm2, %v1160_v39  ;;  %1184 = vst.msk [vmem:[%s2637_s24 + $0x48] sm:$0xff] %vm560_vm2, %v1168_v17  ;;  %v1096_v25 = vadd.f32 %v1518_v34, %v2602_v56  ;;  %v1136_v11 = vadd.f32 %v1530_v44, %v991_v9  ;;  %v1090_v58 = vpop.f32.mrb[35].mxu0  ;;  %v1130_v14 = vpop.f32.mrb[35].mxu1 }
 0x1b2   : > { %1175 = vst.msk [vmem:[%s2637_s24] sm:$0xff] %vm560_vm2, %v1159_v22  ;;  %1183 = vst.msk [vmem:[%s2637_s24 + $0x40] sm:$0xff] %vm560_vm2, %v1167_v60  ;;  %v1091_v61 = vadd.f32 %v1090_v58, %v2599_v24  ;;  %v1131_v7 = vadd.f32 %v1130_v14, %v2622_v15 }
 0x1b3   : > { %v1162_v1 = vmax.f32 %v1096_v25, 0.0  ;;  %v1170_v52 = vmax.f32 %v1136_v11, 0.0 }
 0x1b4   : > { %v1161_v31 = vmax.f32 %v1091_v61, 0.0  ;;  %v1169_v41 = vmax.f32 %v1131_v7, 0.0  ;;  %v1521_v49 = vpop.f32.mrb[36].mxu0  ;;  %v1533_v10 = vpop.f32.mrb[36].mxu1 }
 0x1b5   : > { %1178 = vst.msk [vmem:[%s2637_s24 + $0x18] sm:$0xff] %vm560_vm2, %v1162_v1  ;;  %1186 = vst.msk [vmem:[%s2637_s24 + $0x58] sm:$0xff] %vm560_vm2, %v1170_v52  ;;  %v1106_v56 = vadd.f32 %v1521_v49, %v2608_v37  ;;  %v1146_v40 = vadd.f32 %v1533_v10, %v1001_v21  ;;  %v1100_v29 = vpop.f32.mrb[37].mxu0  ;;  %v1140_v26 = vpop.f32.mrb[37].mxu1 }
 0x1b6   : > { %1177 = vst.msk [vmem:[%s2637_s24 + $0x10] sm:$0xff] %vm560_vm2, %v1161_v31  ;;  %1185 = vst.msk [vmem:[%s2637_s24 + $0x50] sm:$0xff] %vm560_vm2, %v1169_v41  ;;  %v1101_v24 = vadd.f32 %v1100_v29, %v2605_v4  ;;  %v1141_v15 = vadd.f32 %v1140_v26, %v2628_v55 }
 0x1b7   : > { %v1164_v32 = vmax.f32 %v1106_v56, 0.0  ;;  %v1172_v9 = vmax.f32 %v1146_v40, 0.0 }
 0x1b8   : > { %v1163_v36 = vmax.f32 %v1101_v24, 0.0  ;;  %v1171_v28 = vmax.f32 %v1141_v15, 0.0  ;;  %v1524_v47 = vpop.f32.mrb[38].mxu0  ;;  %v1536_v37 = vpop.f32.mrb[38].mxu1 }
 0x1b9   : > { %1180 = vst.msk [vmem:[%s2637_s24 + $0x28] sm:$0xff] %vm560_vm2, %v1164_v32  ;;  %1188 = vst.msk [vmem:[%s2637_s24 + $0x68] sm:$0xff] %vm560_vm2, %v1172_v9  ;;  %v1116_v30 = vadd.f32 %v1524_v47, %v2614_v51  ;;  %v1156_v53 = vadd.f32 %v1536_v37, %v1011_v13  ;;  %v1110_v4 = vpop.f32.mrb[39].mxu0  ;;  %v1150_v19 = vpop.f32.mrb[39].mxu1 }
 0x1ba   : > { %1179 = vst.msk [vmem:[%s2637_s24 + $0x20] sm:$0xff] %vm560_vm2, %v1163_v36  ;;  %1187 = vst.msk [vmem:[%s2637_s24 + $0x60] sm:$0xff] %vm560_vm2, %v1171_v28  ;;  %v1111_v62 = vadd.f32 %v1110_v4, %v2611_v27  ;;  %v1151_v55 = vadd.f32 %v1150_v19, %v1006_v35 }
 0x1bb   : > { %v1166_v8 = vmax.f32 %v1116_v30, 0.0  ;;  %v1174_v54 = vmax.f32 %v1156_v53, 0.0 }
 0x1bc   : > { %v1165_v43 = vmax.f32 %v1111_v62, 0.0  ;;  %v1173_v0 = vmax.f32 %v1151_v55, 0.0 }
 0x1bd   : > { %1182 = vst.msk [vmem:[%s2637_s24 + $0x38] sm:$0xff] %vm560_vm2, %v1166_v8  ;;  %1190 = vst.msk [vmem:[%s2637_s24 + $0x78] sm:$0xff] %vm560_vm2, %v1174_v54 }
 0x1be   : > { %1181 = vst.msk [vmem:[%s2637_s24 + $0x30] sm:$0xff] %vm560_vm2, %v1165_v43  ;;  %1189 = vst.msk [vmem:[%s2637_s24 + $0x70] sm:$0xff] %vm560_vm2, %v1173_v0 }
 0x1bf PF: > { %s13_s16 = sadd.s32 1, %s1835_s16   ;;  %s2748_s12 = smov %s1827_s14 }
 0x1c0   : > { %p10_p8 = scmp.ge.s32.totalorder %s13_s16, 6   ;;  %s2749_s13 = smov %s1831_s15 }
 0x1c1   : > { %s2750_s14 = smov %s2753_s17  ;;  %s2751_s15 = smov %s2757_s18 }
 0x1c2   :  { %12 = sbr.rel (!%p10_p8) target bundleno = 3 (0x3), region = 62 }

// kernel: _lambda_.9
= control target key start
LH: loop header
LB: loop body
LE: loop exit
PB: predicated region body
PF: predicated region fallthrough
CT: control target
= control target key end

     0   :  { %s1331_s12 = smov 0   ;;  %s1333_s13 = smov 0   ;;  %s1826_s0 = inlined_call_operand.vmem [shape: f32[2,10,10,64], index: 0, kind: input, shape index: {}]   ;;  %s1827_s1 = inlined_call_operand.vmem [shape: f32[576,128], index: 1, kind: input, shape index: {}]   ;;  %s1828_s2 = inlined_call_operand.vmem [shape: f32[1,128], index: 2, kind: input, shape index: {}]   ;;  %s1829_s3 = inlined_call_operand.vmem [shape: f32[2,8,8,128], index: 3, kind: output, shape index: {}]  }
   0x1   :  { %s1335_s14 = smov 0  }
   0x2 LB: > { %s25_s15 = sadd.s32 1, %s1304_s13  ;;  %p935_p0 = scmp.ge.s32.totalorder %s1308_s14, 1  ;;  %s1308_s14 = sphi %s1335_s14, %s13_s14   ;;  %s1304_s13 = sphi %s1333_s13, %s1831_s13   ;;  %s1300_s12 = sphi %s1331_s12, %s1830_s12  }
   0x3   : > { %p27_p1 = scmp.ge.s32.totalorder %s25_s15, 2  ;;  %p155_p2 = scmp.lt.s32.totalorder %s1308_s14, 3 }
   0x5   : > { %s1833_s15 = smov (%p27_p1, %s25_s15), 0  ;;  %p156_p3 = pnand %p935_p0, %p155_p2 }
   0x6   : > { %p185_p4 = scmp.lt.s32.totalorder (!%p156_p3), %s1300_s12, 1  ;;  %v440_v0 = vld [vmem:[%s1827_s1 + $0x80] sm:$0xff] (!%p156_p3)  ;;  %v441_v1 = vld [vmem:[%s1827_s1 + $0x88] sm:$0xff] (!%p156_p3)  ;;  %v442_v12 = vld [vmem:[%s1827_s1 + $0x90] sm:$0xff] (!%p156_p3)  ;;  %vm237_vm0 = vcmask (!%p156_p3), 1046528   ;;  %vm262_vm1 = vcmask (!%p156_p3), 1045504  }
   0x7   : > { %159 = sbr.rel (%p156_p3) target bundleno = 400 (0x190), region = 32  ;;  %v1107_v2 = vpack.c.bf16 (!%p156_p3), %v441_v1, %v440_v0  ;;  %v472_v3 = vld [vmem:[%s1827_s1 + $0x180] sm:$0xff] (!%p156_p3)  ;;  %v473_v4 = vld [vmem:[%s1827_s1 + $0x188] sm:$0xff] (!%p156_p3)  ;;  %v443_v13 = vld [vmem:[%s1827_s1 + $0x98] sm:$0xff] (!%p156_p3)  ;;  %s1310_s10 = smov (!%p156_p3), 64   ;;  %vm397_vm2 = vcmask (!%p156_p3), 523264  }
   0x8   : > { %v424_v5 = vld [vmem:[%s1827_s1] sm:$0xff] (!%p156_p3)  ;;  %v1139_v6 = vpack.c.bf16 (!%p156_p3), %v473_v4, %v472_v3  ;;  %v425_v7 = vld [vmem:[%s1827_s1 + $0x8] sm:$0xff] (!%p156_p3)  ;;  %v474_v14 = vld [vmem:[%s1827_s1 + $0x190] sm:$0xff] (!%p156_p3)  ;;  %v1111_v15 = vpack.c.bf16 (!%p156_p3), %v443_v13, %v442_v12 }
   0x9   : > { %v456_v8 = vld [vmem:[%s1827_s1 + $0x100] sm:$0xff] (!%p156_p3)  ;;  %v457_v9 = vld [vmem:[%s1827_s1 + $0x108] sm:$0xff] (!%p156_p3)  ;;  %1108 = vmatprep.subr.bf16.mxu0 (!%p156_p3), %v1107_v2  ;;  %v1109_v10 = vpack.c.bf16 (!%p156_p3), %v425_v7, %v424_v5  ;;  %v475_v16 = vld [vmem:[%s1827_s1 + $0x198] sm:$0xff] (!%p156_p3) }
   0xa   : > { %v1141_v11 = vpack.c.bf16 (!%p156_p3), %v457_v9, %v456_v8  ;;  %1140 = vmatprep.subr.bf16.mxu1 (!%p156_p3), %v1139_v6  ;;  %v426_v17 = vld [vmem:[%s1827_s1 + $0x10] sm:$0xff] (!%p156_p3)  ;;  %v427_v18 = vld [vmem:[%s1827_s1 + $0x18] sm:$0xff] (!%p156_p3)  ;;  %v1143_v19 = vpack.c.bf16 (!%p156_p3), %v475_v16, %v474_v14  ;;  %v444_v23 = vld [vmem:[%s1827_s1 + $0xa0] sm:$0xff] (!%p156_p3) }
   0xb   : > { %1110 = vmatpush3.bf16.msra.mxu0 (!%p156_p3), %v1109_v10  ;;  %v1113_v20 = vpack.c.bf16 (!%p156_p3), %v427_v18, %v426_v17  ;;  %v458_v21 = vld [vmem:[%s1827_s1 + $0x110] sm:$0xff] (!%p156_p3)  ;;  %v459_v22 = vld [vmem:[%s1827_s1 + $0x118] sm:$0xff] (!%p156_p3)  ;;  %v445_v25 = vld [vmem:[%s1827_s1 + $0xa8] sm:$0xff] (!%p156_p3) }
   0xc   : > { %1142 = vmatpush3.bf16.msra.mxu1 (!%p156_p3), %v1141_v11  ;;  %1112 = vmatprep.subr.bf16.mxu0 (!%p156_p3), %v1111_v15  ;;  %v1145_v24 = vpack.c.bf16 (!%p156_p3), %v459_v22, %v458_v21  ;;  %v476_v26 = vld [vmem:[%s1827_s1 + $0x1a0] sm:$0xff] (!%p156_p3)  ;;  %v477_v27 = vld [vmem:[%s1827_s1 + $0x1a8] sm:$0xff] (!%p156_p3)  ;;  %v1115_v31 = vpack.c.bf16 (!%p156_p3), %v445_v25, %v444_v23 }
   0xd   : > { %1144 = vmatprep.subr.bf16.mxu1 (!%p156_p3), %v1143_v19  ;;  %v1147_v32 = vpack.c.bf16 (!%p156_p3), %v477_v27, %v476_v26 }
   0xe   : > { %s1835_s12 = smov (!%p185_p4, %s1300_s12), 1 }
   0xf   : > { %s1195_s11 = smul.u32 160, %s1835_s12  ;;  %1114 = vmatpush3.bf16.msra.mxu0 %v1113_v20 }
  0x10   : > { %1146 = vmatpush3.bf16.msra.mxu1 %v1145_v24  ;;  %1116 = vmatprep.subr.bf16.mxu0 %v1115_v31 }
  0x11   : > { %s1406_s30 = scalar_lea.vmem %s1826_s0, %s1195_s11  ;;  %1148 = vmatprep.subr.bf16.mxu1 %v1147_v32 }
  0x12   : > { %v1418_v28 = vld [vmem:[%s1406_s30 + $0x10] sm:$0xff]  ;;  %v1421_v29 = vld [vmem:[%s1406_s30 + $0x20] sm:$0xff]  ;;  %v206_v30 = vld [vmem:[%s1406_s30 + $0x28] sm:$0x3] }
  0x13   : > { %v244_v33 = vrot.slane %v1421_v29, 1  ;;  %v245_v34 = vrot.slane %v206_v30, 1  ;;  %v270_v35 = vrot.slane %v206_v30, 2  ;;  %v1426_v36 = vld [vmem:[%s1406_s30 + $0x30] sm:$0xff]  ;;  %v208_v37 = vld [vmem:[%s1406_s30 + $0x38] sm:$0x3] }
  0x14   : > { %v247_v38 = vrot.slane %v1426_v36, 1  ;;  %v248_v39 = vrot.slane %v208_v37, 1  ;;  %v273_v40 = vrot.slane %v208_v37, 2  ;;  %v1431_v41 = vld [vmem:[%s1406_s30] sm:$0xff]  ;;  %v1434_v42 = vld [vmem:[%s1406_s30 + $0x8] sm:$0x3] }
  0x15   : > { %v1437_v43 = vsel %vm237_vm0, %v244_v33, %v245_v34  ;;  %v204_v44 = vld [vmem:[%s1406_s30 + $0x18] sm:$0x3]  ;;  %v238_v45 = vrot.slane %v1431_v41, 1  ;;  %v239_v46 = vrot.slane %v1434_v42, 1  ;;  %v266_v47 = vrot.slane %v1418_v28, 2  ;;  %v1444_v48 = vld [vmem:[%s1406_s30 + $0x40] sm:$0xff] }
  0x16   : > { %v1221_v49 = vpack.i.bf16 %v1418_v28, %v1437_v43  ;;  %v1449_v50 = vsel %vm237_vm0, %v247_v38, %v248_v39  ;;  %v267_v51 = vrot.slane %v204_v44, 2  ;;  %v241_v52 = vrot.slane %v1418_v28, 1  ;;  %v210_v53 = vld [vmem:[%s1406_s30 + $0x48] sm:$0x3]  ;;  %v1454_v54 = vld [vmem:[%s1406_s30 + $0x50] sm:$0xff]  ;;  %v1468_v0 = vld [vmem:[%s1406_s30 + $0x60] sm:$0xff] }
  0x17   : > { %v1231_v55 = vpack.i.bf16 %v1421_v29, %v1449_v50  ;;  %v240_v56 = vsel %vm237_vm0, %v238_v45, %v239_v46  ;;  %v242_v57 = vrot.slane %v204_v44, 1  ;;  %v269_v58 = vrot.slane %v1421_v29, 2  ;;  %v212_v59 = vld [vmem:[%s1406_s30 + $0x58] sm:$0x3]  ;;  %v214_v5 = vld [vmem:[%s1406_s30 + $0x68] sm:$0x3] }
  0x18   : > { %1222 = vrot.lane.b32.xlu0 %v1221_v49, %s1310_s10  ;;  %v1463_v60 = vsel %vm262_vm1, %v266_v47, %v267_v51  ;;  %v250_v61 = vrot.slane %v1444_v48, 1  ;;  %v251_v62 = vrot.slane %v210_v53, 1  ;;  %v253_v63 = vrot.slane %v1454_v54, 1  ;;  %v1480_v6 = vld [vmem:[%s1406_s30 + $0x70] sm:$0xff]  ;;  %v1483_v7 = vld [vmem:[%s1406_s30 + $0x78] sm:$0x3] }
  0x19   : > { %1232 = vrot.lane.b32.xlu1 %v1231_v55, %s1310_s10  ;;  %v1226_v1 = vpack.i.bf16 %v1463_v60, %v240_v56  ;;  %v1473_v2 = vsel %vm237_vm0, %v241_v52, %v242_v57  ;;  %v1476_v3 = vsel %vm262_vm1, %v269_v58, %v270_v35  ;;  %v254_v4 = vrot.slane %v212_v59, 1  ;;  %v1512_v24 = vld [vmem:[%s1406_s30 + $0x80] sm:$0xff]  ;;  %v1519_v27 = vld [vmem:[%s1406_s30 + $0x88] sm:$0x3]  ;;  %v1528_v33 = vld [vmem:[%s1406_s30 + $0x90] sm:$0xff] }
  0x1a   : > { %v1236_v8 = vpack.i.bf16 %v1476_v3, %v1473_v2  ;;  %v1488_v9 = vsel %vm237_vm0, %v250_v61, %v251_v62  ;;  %v272_v10 = vrot.slane %v1426_v36, 2  ;;  %v275_v11 = vrot.slane %v1444_v48, 2  ;;  %v428_v34 = vld [vmem:[%s1827_s1 + $0x20] sm:$0xff]  ;;  %v429_v35 = vld [vmem:[%s1827_s1 + $0x28] sm:$0xff]  ;;  %v446_v46 = vld [vmem:[%s1827_s1 + $0xb0] sm:$0xff] }
  0x1b   : > { %v1241_v12 = vpack.i.bf16 %v1426_v36, %v1488_v9  ;;  %v1495_v13 = vsel %vm237_vm0, %v253_v63, %v254_v4  ;;  %v276_v14 = vrot.slane %v210_v53, 2  ;;  %v256_v15 = vrot.slane %v1468_v0, 1  ;;  %v460_v44 = vld [vmem:[%s1827_s1 + $0x120] sm:$0xff]  ;;  %v461_v45 = vld [vmem:[%s1827_s1 + $0x128] sm:$0xff]  ;;  %v447_v53 = vld [vmem:[%s1827_s1 + $0xb8] sm:$0xff] }
  0x1c   : > { %1227 = vrot.lane.b32.xlu0 %v1226_v1, %s1310_s10  ;;  %v1500_v16 = vsel %vm262_vm1, %v272_v10, %v273_v40  ;;  %v257_v17 = vrot.slane %v214_v5, 1  ;;  %v259_v18 = vrot.slane %v1480_v6, 1  ;;  %v260_v19 = vrot.slane %v1483_v7, 1  ;;  %v1543_v40 = vld [vmem:[%s1406_s30 + $0x98] sm:$0x3]  ;;  %v478_v55 = vld [vmem:[%s1827_s1 + $0x1b0] sm:$0xff] }
  0x1d   : > { %1237 = vrot.lane.b32.xlu1 %v1236_v8, %s1310_s10  ;;  %v1246_v20 = vpack.i.bf16 %v1495_v13, %v1500_v16  ;;  %v1508_v21 = vsel %vm262_vm1, %v275_v11, %v276_v14  ;;  %v278_v22 = vrot.slane %v1454_v54, 2  ;;  %v279_v23 = vrot.slane %v212_v59, 2  ;;  %v479_v56 = vld [vmem:[%s1827_s1 + $0x1b8] sm:$0xff]  ;;  %v430_v58 = vld [vmem:[%s1827_s1 + $0x30] sm:$0xff]  ;;  %v449_v8 = vld [vmem:[%s1827_s1 + $0xc8] sm:$0xff] }
  0x1e   : > { %v1515_v25 = vsel %vm237_vm0, %v256_v15, %v257_v17  ;;  %v281_v26 = vrot.slane %v1468_v0, 2  ;;  %v1522_v30 = vsel %vm237_vm0, %v259_v18, %v260_v19  ;;  %v282_v32 = vrot.slane %v214_v5, 2  ;;  %v431_v59 = vld [vmem:[%s1827_s1 + $0x38] sm:$0xff]  ;;  %v462_v61 = vld [vmem:[%s1827_s1 + $0x130] sm:$0xff]  ;;  %v480_v15 = vld [vmem:[%s1827_s1 + $0x1c0] sm:$0xff] }
  0x1f   : > { %v1525_v31 = vsel %vm262_vm1, %v278_v22, %v279_v23  ;;  %v1251_v37 = vpack.i.bf16 %v1508_v21, %v1444_v48  ;;  %v1256_v38 = vpack.i.bf16 %v1454_v54, %v1515_v25  ;;  %v297_v39 = vrot.slane %v1512_v24, 1  ;;  %v463_v5 = vld [vmem:[%s1827_s1 + $0x138] sm:$0xff]  ;;  %v481_v17 = vld [vmem:[%s1827_s1 + $0x1c8] sm:$0xff] }
  0x20   : > { %1242 = vrot.lane.b32.xlu0 %v1241_v12, %s1310_s10  ;;  %v1556_v47 = vsel %vm262_vm1, %v281_v26, %v282_v32  ;;  %v298_v49 = vrot.slane %v1519_v27, 1  ;;  %v284_v51 = vrot.slane %v1480_v6, 2  ;;  %v285_v52 = vrot.slane %v1483_v7, 2  ;;  %v448_v7 = vld [vmem:[%s1827_s1 + $0xc0] sm:$0xff]  ;;  %v433_v32 = vld [vmem:[%s1827_s1 + $0x48] sm:$0xff] }
  0x21   : > { %1247 = vrot.lane.b32.xlu1 %v1246_v20, %s1310_s10  ;;  %v1261_v57 = vpack.i.bf16 %v1522_v30, %v1525_v31  ;;  %v308_v62 = vrot.slane %v1512_v24, 2  ;;  %v309_v63 = vrot.slane %v1519_v27, 2  ;;  %v313_v1 = vrot.slane %v1528_v33, 1  ;;  %v432_v27 = vld [vmem:[%s1827_s1 + $0x40] sm:$0xff] }
  0x22   : > { %v1117_v4 = vpack.c.bf16 %v429_v35, %v428_v34  ;;  %v1266_v10 = vpack.i.bf16 %v1556_v47, %v1468_v0  ;;  %v1149_v11 = vpack.c.bf16 %v461_v45, %v460_v44  ;;  %v1119_v12 = vpack.c.bf16 %v447_v53, %v446_v46  ;;  %v464_v34 = vld [vmem:[%s1827_s1 + $0x140] sm:$0xff]  ;;  %v450_v44 = vld [vmem:[%s1827_s1 + $0xd0] sm:$0xff]  ;;  %v451_v45 = vld [vmem:[%s1827_s1 + $0xd8] sm:$0xff] }
  0x23   : > { %v1151_v14 = vpack.c.bf16 %v479_v56, %v478_v55  ;;  %v1604_v18 = vsel %vm237_vm0, %v297_v39, %v298_v49  ;;  %v1607_v19 = vsel %vm262_vm1, %v284_v51, %v285_v52  ;;  %v314_v20 = vrot.slane %v1543_v40, 1  ;;  %v465_v39 = vld [vmem:[%s1827_s1 + $0x148] sm:$0xff]  ;;  %v482_v49 = vld [vmem:[%s1827_s1 + $0x1d0] sm:$0xff]  ;;  %v483_v51 = vld [vmem:[%s1827_s1 + $0x1d8] sm:$0xff] }
  0x24   : > { %1252 = vrot.lane.b32.xlu0 %v1251_v37, %s1310_s10  ;;  %1118 = vmatpush3.bf16.msra.mxu0 %v1117_v4  ;;  %v1121_v22 = vpack.c.bf16 %v431_v59, %v430_v58  ;;  %v1153_v23 = vpack.c.bf16 %v463_v5, %v462_v61  ;;  %v1123_v26 = vpack.c.bf16 %v449_v8, %v448_v7  ;;  %v263_v35 = vrot.slane %v1431_v41, 2  ;;  %v434_v58 = vld [vmem:[%s1827_s1 + $0x50] sm:$0xff]  ;;  %v435_v59 = vld [vmem:[%s1827_s1 + $0x58] sm:$0xff]  ;;  %v452_v4 = vld [vmem:[%s1827_s1 + $0xe0] sm:$0xff] }
  0x25   : > { %1257 = vrot.lane.b32.xlu1 %v1256_v38, %s1310_s10  ;;  %1150 = vmatpush3.bf16.msra.mxu1 %v1149_v11  ;;  %v264_v37 = vrot.slane %v1434_v42, 2  ;;  %v1155_v38 = vpack.c.bf16 %v481_v17, %v480_v15  ;;  %v1271_v46 = vpack.i.bf16 %v1604_v18, %v1480_v6  ;;  %v1276_v42 = vpack.i.bf16 %v1512_v24, %v1607_v19  ;;  %v466_v61 = vld [vmem:[%s1827_s1 + $0x150] sm:$0xff]  ;;  %v453_v5 = vld [vmem:[%s1827_s1 + $0xe8] sm:$0xff]  ;;  %v484_v8 = vld [vmem:[%s1827_s1 + $0x1e0] sm:$0xff] }
  0x26   : > { %1120 = vmatprep.subr.bf16.mxu0 %v1119_v12  ;;  %1152 = vmatprep.subr.bf16.mxu1 %v1151_v14  ;;  %v1643_v52 = vsel %vm262_vm1, %v308_v62, %v309_v63  ;;  %v315_v53 = vsel %vm237_vm0, %v313_v1, %v314_v20  ;;  %v1125_v55 = vpack.c.bf16 %v433_v32, %v432_v27  ;;  %v467_v1 = vld [vmem:[%s1827_s1 + $0x158] sm:$0xff]  ;;  %v436_v15 = vld [vmem:[%s1827_s1 + $0x60] sm:$0xff]  ;;  %v437_v17 = vld [vmem:[%s1827_s1 + $0x68] sm:$0xff] }
  0x27   : > { %v1157_v56 = vpack.c.bf16 %v465_v39, %v464_v34  ;;  %v1656_v62 = vsel %vm262_vm1, %v263_v35, %v264_v37  ;;  %v1159_v63 = vpack.c.bf16 %v483_v51, %v482_v49  ;;  %v1281_v7 = vpack.i.bf16 %v1643_v52, %v315_v53  ;;  %v468_v20 = vld [vmem:[%s1827_s1 + $0x160] sm:$0xff]  ;;  %v455_v27 = vld [vmem:[%s1827_s1 + $0xf8] sm:$0xff]  ;;  %v486_v32 = vld [vmem:[%s1827_s1 + $0x1f0] sm:$0xff] }
  0x28   : > { %1262 = vrot.lane.b32.xlu0 %v1261_v57, %s1310_s10  ;;  %1122 = vmatpush3.bf16.msra.mxu0 %v1121_v22  ;;  %v1127_v57 = vpack.c.bf16 %v451_v45, %v450_v44  ;;  %v1129_v11 = vpack.c.bf16 %v435_v59, %v434_v58  ;;  %v1161_v12 = vpack.c.bf16 %v467_v1, %v466_v61  ;;  %v487_v34 = vld [vmem:[%s1827_s1 + $0x1f8] sm:$0xff]  ;;  %v438_v39 = vld [vmem:[%s1827_s1 + $0x70] sm:$0xff]  ;;  %v488_v49 = vld [vmem:[%s1827_s1 + $0x200] sm:$0xff]  ;;  %v316_v53 = vrot.slane %v1528_v33, 2 }
  0x29   : > { %1267 = vrot.lane.b32.xlu1 %v1266_v10, %s1310_s10  ;;  %1154 = vmatpush3.bf16.msra.mxu1 %v1153_v23  ;;  %v485_v10 = vld [vmem:[%s1827_s1 + $0x1e8] sm:$0xff]  ;;  %v1131_v14 = vpack.c.bf16 %v453_v5, %v452_v4  ;;  %v1133_v35 = vpack.c.bf16 %v437_v17, %v436_v15  ;;  %v439_v44 = vld [vmem:[%s1827_s1 + $0x78] sm:$0xff]  ;;  %v470_v45 = vld [vmem:[%s1827_s1 + $0x170] sm:$0xff] }
  0x2a   : > { %1124 = vmatprep.subr.bf16.mxu0 %v1123_v26  ;;  %1156 = vmatprep.subr.bf16.mxu1 %v1155_v38  ;;  %v1163_v22 = vpack.c.bf16 %v485_v10, %v484_v8  ;;  %v469_v23 = vld [vmem:[%s1827_s1 + $0x168] sm:$0xff]  ;;  %v454_v26 = vld [vmem:[%s1827_s1 + $0xf0] sm:$0xff] }
  0x2b   : > { %v1165_v37 = vpack.c.bf16 %v469_v23, %v468_v20  ;;  %v1135_v38 = vpack.c.bf16 %v455_v27, %v454_v26  ;;  %v489_v51 = vld [vmem:[%s1827_s1 + $0x208] sm:$0xff]  ;;  %v490_v10 = vld [vmem:[%s1827_s1 + $0x210] sm:$0xff] }
  0x2c   : > { %1272 = vrot.lane.b32.xlu0 %v1271_v46, %s1310_s10  ;;  %1126 = vmatpush3.bf16.msra.mxu0 %v1125_v55  ;;  %v1167_v46 = vpack.c.bf16 %v487_v34, %v486_v32  ;;  %v317_v55 = vrot.slane %v1543_v40, 2  ;;  %v1171_v58 = vpack.c.bf16 %v489_v51, %v488_v49  ;;  %v492_v34 = vld [vmem:[%s1827_s1 + $0x220] sm:$0xff] }
  0x2d   : > { %1277 = vrot.lane.b32.xlu1 %v1276_v42, %s1310_s10  ;;  %1158 = vmatpush3.bf16.msra.mxu1 %v1157_v56  ;;  %v471_v42 = vld [vmem:[%s1827_s1 + $0x178] sm:$0xff]  ;;  %v1137_v56 = vpack.c.bf16 %v439_v44, %v438_v39 }
  0x2e   : > { %1128 = vmatprep.subr.bf16.mxu0 %v1127_v57  ;;  %1160 = vmatprep.subr.bf16.mxu1 %v1159_v63  ;;  %v1169_v57 = vpack.c.bf16 %v471_v42, %v470_v45  ;;  %v1722_v59 = vsel %vm262_vm1, %v316_v53, %v317_v55 }
  0x30   : > { %1282 = vrot.lane.b32.xlu0 %v1281_v7, %s1310_s10  ;;  %1130 = vmatpush3.bf16.msra.mxu0 %v1129_v11  ;;  %v491_v11 = vld [vmem:[%s1827_s1 + $0x218] sm:$0xff]  ;;  %s950_s10 = sshll.u32 %s1835_s12, 6 }
  0x31   : > { %1162 = vmatpush3.bf16.msra.mxu1 %v1161_v12  ;;  %1132 = vmatprep.subr.bf16.mxu0 %v1131_v14  ;;  %s199_s7 = scalar_lea.vmem %s1829_s3, %s950_s10 }
  0x32   : > { %1164 = vmatprep.subr.bf16.mxu1 %v1163_v22 }
  0x34   : > { %1134 = vmatpush3.bf16.msra.mxu0 %v1133_v35 }
  0x35   : > { %1166 = vmatpush3.bf16.msra.mxu1 %v1165_v37  ;;  %1136 = vmatprep.subr.bf16.mxu0 %v1135_v38 }
  0x36   : > { %1168 = vmatprep.subr.bf16.mxu1 %v1167_v46 }
  0x38   : > { %1138 = vmatpush3.bf16.msra.mxu0 %v1137_v56 }
  0x39   : > { %1170 = vmatpush3.bf16.msra.mxu1 %v1169_v57  ;;  %1172 = vmatprep.subr.bf16.mxu0 %v1171_v58 }
  0x3a   : > { %1187 = vmatprep.subr.bf16.mxu1 %v1171_v58 }
  0x8a   : > { %v1223_v61 = vpop.permute.xlu0 %1222 }
  0x8b   : > { %v1225_v63 = vunpack.i.h.bf16 %v1223_v61  ;;  %v1224_v1 = vunpack.i.l.bf16 %v1223_v61  ;;  %v1233_v4 = vpop.permute.xlu1 %1232 }
  0x8c   : > { %v1235_v40 = vunpack.i.h.bf16 %v1233_v4  ;;  %v1234_v5 = vunpack.i.l.bf16 %v1233_v4 }
  0x8d   : > { %v406_v7 = vsel %vm397_vm2, %v1656_v62, %v1225_v63  ;;  %v400_v8 = vsel %vm397_vm2, %v1421_v29, %v1224_v1  ;;  %v1175_v62 = vpack.c.bf16 %v491_v11, %v490_v10 }
  0x8e   : > { %583 = vmatprep.mubr.f32.mxu0 %v406_v7  ;;  %688 = vmatprep.mubr.f32.mxu1 %v400_v8  ;;  %v1228_v12 = vpop.permute.xlu0 %1227  ;;  %v407_v26 = vsel %vm397_vm2, %v1463_v60, %v1235_v40  ;;  %v401_v27 = vsel %vm397_vm2, %v1426_v36, %v1234_v5 }
  0x8f   : > { %v1230_v14 = vunpack.i.h.bf16 %v1228_v12  ;;  %v1229_v15 = vunpack.i.l.bf16 %v1228_v12  ;;  %v1238_v17 = vpop.permute.xlu1 %1237 }
  0x90   : > { %v1240_v20 = vunpack.i.h.bf16 %v1238_v17  ;;  %v1239_v22 = vunpack.i.l.bf16 %v1238_v17 }
  0x91   : > { %v398_v29 = vsel %vm397_vm2, %v1431_v41, %v1229_v15  ;;  %v414_v23 = vsel %vm397_vm2, %v1473_v2, %v1230_v14  ;;  %v493_v41 = vld [vmem:[%s1827_s1 + $0x228] sm:$0xff] }
  0x92   : > { %584 = vmatmul.mubr.f32.vlgmr.msra.gmra.mrb[0].mxu0 %v398_v29  ;;  %689 = vmatmul.mubr.f32.vlgmr.msra.gmra.mrb[0].mxu1 %v414_v23  ;;  %v1243_v32 = vpop.permute.xlu0 %1242  ;;  %v399_v60 = vsel %vm397_vm2, %v1418_v28, %v1239_v22  ;;  %v415_v36 = vsel %vm397_vm2, %v1437_v43, %v1240_v20  ;;  %v1179_v46 = vpack.c.bf16 %v493_v41, %v492_v34  ;;  %v494_v28 = vld [vmem:[%s1827_s1 + $0x230] sm:$0xff]  ;;  %v495_v43 = vld [vmem:[%s1827_s1 + $0x238] sm:$0xff] }
  0x93   : > { %1174 = vmatpush3.bf16.msra.mxu0 %v1171_v58  ;;  %1191 = vmatpush3.bf16.msra.mxu1 %v1171_v58  ;;  %v1245_v2 = vunpack.i.h.bf16 %v1243_v32  ;;  %v1244_v35 = vunpack.i.l.bf16 %v1243_v32  ;;  %v1248_v37 = vpop.permute.xlu1 %1247  ;;  %v1183_v61 = vpack.c.bf16 %v495_v43, %v494_v28 }
  0x94   : > { %588 = vmatprep.mubr.f32.mxu0 %v407_v26  ;;  %693 = vmatprep.mubr.f32.mxu1 %v401_v27  ;;  %v1250_v38 = vunpack.i.h.bf16 %v1248_v37  ;;  %v1249_v39 = vunpack.i.l.bf16 %v1248_v37 }
  0x95   : > { %v408_v44 = vsel %vm397_vm2, %v1476_v3, %v1245_v2  ;;  %v402_v45 = vsel %vm397_vm2, %v1444_v48, %v1244_v35  ;;  %1176 = vmatprep.subr.bf16.mxu0 %v1175_v62  ;;  %1188 = vmatprep.subr.bf16.mxu1 %v1175_v62 }
  0x96   : > { %589 = vmatmul.mubr.f32.gmra.mrb[2].mxu0 %v399_v60  ;;  %694 = vmatmul.mubr.f32.gmra.mrb[2].mxu1 %v415_v36  ;;  %v1253_v42 = vpop.permute.xlu0 %1252  ;;  %v416_v48 = vsel %vm397_vm2, %v1449_v50, %v1249_v39  ;;  %v403_v55 = vsel %vm397_vm2, %v1454_v54, %v1250_v38 }
  0x97   : > { %v1255_v49 = vunpack.i.h.bf16 %v1253_v42  ;;  %v1254_v51 = vunpack.i.l.bf16 %v1253_v42  ;;  %593 = vmatprep.mubr.f32.mxu0 %v408_v44  ;;  %698 = vmatprep.mubr.f32.mxu1 %v402_v45  ;;  %v1258_v53 = vpop.permute.xlu1 %1257 }
  0x98   : > { %1178 = vmatpush3.bf16.msra.mxu0 %v1175_v62  ;;  %1192 = vmatpush3.bf16.msra.mxu1 %v1175_v62  ;;  %v1260_v56 = vunpack.i.h.bf16 %v1258_v53  ;;  %v1259_v57 = vunpack.i.l.bf16 %v1258_v53 }
  0x99   : > { %v409_v58 = vsel %vm397_vm2, %v1500_v16, %v1254_v51  ;;  %1180 = vmatprep.subr.bf16.mxu0 %v1179_v46  ;;  %1189 = vmatprep.subr.bf16.mxu1 %v1179_v46  ;;  %v417_v1 = vsel %vm397_vm2, %v1488_v9, %v1255_v49 }
  0x9a   : > { %594 = vmatmul.mubr.f32.gmra.mrb[4].mxu0 %v400_v8  ;;  %699 = vmatmul.mubr.f32.gmra.mrb[4].mxu1 %v416_v48  ;;  %v1263_v63 = vpop.permute.xlu0 %1262  ;;  %v410_v5 = vsel %vm397_vm2, %v1508_v21, %v1260_v56  ;;  %v404_v7 = vsel %vm397_vm2, %v1468_v0, %v1259_v57 }
  0x9b   : > { %703 = vmatprep.mubr.f32.mxu1 %v403_v55  ;;  %598 = vmatprep.mubr.f32.mxu0 %v409_v58  ;;  %v1264_v50 = vunpack.i.l.bf16 %v1263_v63  ;;  %v1268_v4 = vpop.permute.xlu1 %1267  ;;  %v1265_v40 = vunpack.i.h.bf16 %v1263_v63 }
  0x9c   : > { %v1269_v54 = vunpack.i.l.bf16 %v1268_v4  ;;  %1182 = vmatpush3.bf16.msra.mxu0 %v1179_v46  ;;  %1193 = vmatpush3.bf16.msra.mxu1 %v1179_v46  ;;  %v1270_v10 = vunpack.i.h.bf16 %v1268_v4 }
  0x9d   : > { %1184 = vmatprep.subr.bf16.mxu0 %v1183_v61  ;;  %1190 = vmatprep.subr.bf16.mxu1 %v1183_v61  ;;  %v418_v9 = vsel %vm397_vm2, %v1495_v13, %v1264_v50  ;;  %v405_v11 = vsel %vm397_vm2, %v1480_v6, %v1265_v40 }
  0x9e   : > { %599 = vmatmul.mubr.f32.gmra.mrb[6].mxu0 %v401_v27  ;;  %704 = vmatmul.mubr.f32.gmra.mrb[6].mxu1 %v417_v1  ;;  %v1273_v8 = vpop.permute.xlu0 %1272  ;;  %v411_v0 = vsel %vm397_vm2, %v1525_v31, %v1269_v54  ;;  %v419_v13 = vsel %vm397_vm2, %v1515_v25, %v1270_v10 }
  0x9f   : > { %603 = vmatprep.mubr.f32.mxu0 %v410_v5  ;;  %708 = vmatprep.mubr.f32.mxu1 %v404_v7  ;;  %v1275_v12 = vunpack.i.h.bf16 %v1273_v8  ;;  %v1274_v14 = vunpack.i.l.bf16 %v1273_v8  ;;  %v1278_v15 = vpop.permute.xlu1 %1277 }
  0xa0   : > { %1186 = vmatpush3.bf16.msra.mxu0 %v1183_v61  ;;  %1194 = vmatpush3.bf16.msra.mxu1 %v1183_v61  ;;  %v1279_v20 = vunpack.i.l.bf16 %v1278_v15  ;;  %v1280_v22 = vunpack.i.h.bf16 %v1278_v15 }
  0xa1   : > { %v412_v6 = vsel %vm397_vm2, %v1556_v47, %v1274_v14  ;;  %v422_v29 = vsel %vm397_vm2, %v1512_v24, %v1275_v12 }
  0xa2   : > { %604 = vmatmul.mubr.f32.gmra.mrb[8].mxu0 %v402_v45  ;;  %709 = vmatmul.mubr.f32.gmra.mrb[8].mxu1 %v418_v9  ;;  %v1283_v17 = vpop.permute.xlu0 %1282  ;;  %v420_v26 = vsel %vm397_vm2, %v1522_v30, %v1279_v20  ;;  %v413_v27 = vsel %vm397_vm2, %v1607_v19, %v1280_v22 }
  0xa3   : > { %713 = vmatprep.mubr.f32.mxu1 %v405_v11  ;;  %608 = vmatprep.mubr.f32.mxu0 %v411_v0  ;;  %v1284_v62 = vunpack.i.l.bf16 %v1283_v17  ;;  %v1285_v23 = vunpack.i.h.bf16 %v1283_v17 }
  0xa5   : > { %v423_v25 = vsel %vm397_vm2, %v1528_v33, %v1284_v62  ;;  %v421_v24 = vsel %vm397_vm2, %v1604_v18, %v1285_v23 }
  0xa6   : > { %609 = vmatmul.mubr.f32.gmra.mrb[10].mxu0 %v403_v55  ;;  %714 = vmatmul.mubr.f32.gmra.mrb[10].mxu1 %v419_v13 }
  0xa7   : > { %613 = vmatprep.mubr.f32.mxu0 %v412_v6  ;;  %718 = vmatprep.mubr.f32.mxu1 %v422_v29 }
  0xaa   : > { %614 = vmatmul.mubr.f32.gmra.mrb[12].mxu0 %v404_v7  ;;  %719 = vmatmul.mubr.f32.gmra.mrb[12].mxu1 %v420_v26 }
  0xab   : > { %618 = vmatprep.mubr.f32.mxu0 %v413_v27  ;;  %723 = vmatprep.mubr.f32.mxu1 %v423_v25 }
  0xae   : > { %619 = vmatmul.mubr.f32.gmra.mrb[14].mxu0 %v405_v11  ;;  %724 = vmatmul.mubr.f32.gmra.mrb[14].mxu1 %v421_v24 }
  0xaf   : > { %1095 = vmatprep.mubr.msk.f32.mxu0 %vm397_vm2, %v1476_v3  ;;  %1101 = vmatprep.mubr.msk.f32.mxu1 %vm397_vm2, %v1556_v47 }
  0xb2   : > { %1096 = vmatmul.mubr.msk.f32.vlgmr.msra.gmra.mrb[16].mxu0 %vm397_vm2, %v1500_v16  ;;  %1102 = vmatmul.mubr.msk.f32.vlgmr.msra.gmra.mrb[16].mxu1 %vm397_vm2, %v1607_v19  ;;  %v939_v16 = vld [vmem:[%s1828_s2] ss:$0 sm:$0xff] }
  0xb3   : > { %1098 = vmatprep.mubr.msk.f32.mxu0 %vm397_vm2, %v1508_v21  ;;  %1104 = vmatprep.mubr.msk.f32.mxu1 %vm397_vm2, %v1643_v52 }
  0xb6   : > { %1099 = vmatmul.mubr.msk.f32.gmra.mrb[18].mxu0 %vm397_vm2, %v1525_v31  ;;  %1105 = vmatmul.mubr.msk.f32.gmra.mrb[18].mxu1 %vm397_vm2, %v1722_v59 }
 0x165   : > { %v983_v3 = vpop.f32.mrb[0].mxu0  ;;  %v1039_v30 = vpop.f32.mrb[0].mxu1 }
 0x166   : > { %v984_v33 = vpop.f32.mrb[1].mxu0  ;;  %v1040_v47 = vpop.f32.mrb[1].mxu1 }
 0x167   : > { %v985_v18 = vadd.f32 %v984_v33, %v983_v3  ;;  %v1041_v19 = vadd.f32 %v1040_v47, %v1039_v30 }
 0x169   : > { %v586_v21 = vadd.f32 %v985_v18, %v939_v16  ;;  %v986_v32 = vpop.f32.mrb[2].mxu0  ;;  %v1042_v34 = vpop.f32.mrb[2].mxu1 }
 0x16a   : > { %v987_v52 = vpop.f32.mrb[3].mxu0  ;;  %v1043_v41 = vpop.f32.mrb[3].mxu1 }
 0x16b   : > { %v988_v2 = vadd.f32 %v987_v52, %v986_v32  ;;  %v1044_v31 = vadd.f32 %v1043_v41, %v1042_v34  ;;  %v691_v35 = vadd.f32 %v1041_v19, %v586_v21 }
 0x16d   : > { %v591_v37 = vadd.f32 %v988_v2, %v939_v16  ;;  %v989_v59 = vpop.f32.mrb[4].mxu0  ;;  %v1045_v60 = vpop.f32.mrb[4].mxu1 }
 0x16e   : > { %v990_v36 = vpop.f32.mrb[5].mxu0  ;;  %v1046_v38 = vpop.f32.mrb[5].mxu1 }
 0x16f   : > { %v991_v39 = vadd.f32 %v990_v36, %v989_v59  ;;  %v1047_v44 = vadd.f32 %v1046_v38, %v1045_v60  ;;  %v696_v45 = vadd.f32 %v1044_v31, %v591_v37 }
 0x171   : > { %v596_v46 = vadd.f32 %v991_v39, %v939_v16  ;;  %v992_v42 = vpop.f32.mrb[6].mxu0  ;;  %v1048_v28 = vpop.f32.mrb[6].mxu1 }
 0x172   : > { %v993_v43 = vpop.f32.mrb[7].mxu0  ;;  %v1049_v49 = vpop.f32.mrb[7].mxu1 }
 0x173   : > { %v994_v51 = vadd.f32 %v993_v43, %v992_v42  ;;  %v1050_v48 = vadd.f32 %v1049_v49, %v1048_v28  ;;  %v701_v53 = vadd.f32 %v1047_v44, %v596_v46 }
 0x175   : > { %v601_v55 = vadd.f32 %v994_v51, %v939_v16  ;;  %v995_v56 = vpop.f32.mrb[8].mxu0  ;;  %v1051_v57 = vpop.f32.mrb[8].mxu1 }
 0x176   : > { %v996_v58 = vpop.f32.mrb[9].mxu0  ;;  %v1052_v61 = vpop.f32.mrb[9].mxu1 }
 0x177   : > { %v997_v63 = vadd.f32 %v996_v58, %v995_v56  ;;  %v1053_v50 = vadd.f32 %v1052_v61, %v1051_v57  ;;  %v706_v1 = vadd.f32 %v1050_v48, %v601_v55 }
 0x179   : > { %v606_v4 = vadd.f32 %v997_v63, %v939_v16  ;;  %v998_v40 = vpop.f32.mrb[10].mxu0  ;;  %v1054_v54 = vpop.f32.mrb[10].mxu1 }
 0x17a   : > { %v999_v5 = vpop.f32.mrb[11].mxu0  ;;  %v1055_v7 = vpop.f32.mrb[11].mxu1 }
 0x17b   : > { %v1000_v8 = vadd.f32 %v999_v5, %v998_v40  ;;  %v1056_v10 = vadd.f32 %v1055_v7, %v1054_v54  ;;  %v711_v9 = vadd.f32 %v1053_v50, %v606_v4 }
 0x17d   : > { %v611_v11 = vadd.f32 %v1000_v8, %v939_v16  ;;  %v1001_v12 = vpop.f32.mrb[12].mxu0  ;;  %v1057_v14 = vpop.f32.mrb[12].mxu1 }
 0x17e   : > { %v1002_v0 = vpop.f32.mrb[13].mxu0  ;;  %v1058_v15 = vpop.f32.mrb[13].mxu1 }
 0x17f   : > { %v1003_v17 = vadd.f32 %v1002_v0, %v1001_v12  ;;  %v1059_v20 = vadd.f32 %v1058_v15, %v1057_v14  ;;  %v716_v13 = vadd.f32 %v1056_v10, %v611_v11 }
 0x181   : > { %v616_v22 = vadd.f32 %v1003_v17, %v939_v16  ;;  %v1004_v62 = vpop.f32.mrb[14].mxu0  ;;  %v1060_v6 = vpop.f32.mrb[14].mxu1 }
 0x182   : > { %v1005_v29 = vpop.f32.mrb[15].mxu0  ;;  %v1061_v23 = vpop.f32.mrb[15].mxu1 }
 0x183   : > { %v1006_v26 = vadd.f32 %v1005_v29, %v1004_v62  ;;  %v1062_v27 = vadd.f32 %v1061_v23, %v1060_v6  ;;  %v721_v25 = vadd.f32 %v1059_v20, %v616_v22 }
 0x185   : > { %v621_v24 = vadd.f32 %v1006_v26, %v939_v16  ;;  %v1097_v3 = vpop.f32.mrb[16].mxu0  ;;  %v1103_v30 = vpop.f32.mrb[16].mxu1 }
 0x186   : > { %v801_v33 = vadd.f32 %v1097_v3, %v696_v45  ;;  %v821_v47 = vadd.f32 %v1103_v30, %v716_v13  ;;  %v795_v18 = vpop.f32.mrb[17].mxu0  ;;  %v815_v19 = vpop.f32.mrb[17].mxu1 }
 0x187   : > { %v796_v21 = vadd.f32 %v795_v18, %v691_v35  ;;  %v816_v32 = vadd.f32 %v815_v19, %v711_v9  ;;  %v726_v34 = vadd.f32 %v1062_v27, %v621_v24 }
 0x188   : > { %v835_v52 = vmax.f32 %v801_v33, 0.0  ;;  %v839_v41 = vmax.f32 %v821_v47, 0.0 }
 0x189   : > { %v834_v2 = vmax.f32 %v796_v21, 0.0  ;;  %v838_v31 = vmax.f32 %v816_v32, 0.0  ;;  %v1100_v37 = vpop.f32.mrb[18].mxu0  ;;  %v1106_v59 = vpop.f32.mrb[18].mxu1 }
 0x18a   : > { %843 = vst [vmem:[%s199_s7 + $0x8] sm:$0xff] %v835_v52  ;;  %847 = vst [vmem:[%s199_s7 + $0x28] sm:$0xff] %v839_v41  ;;  %v811_v16 = vadd.f32 %v1100_v37, %v706_v1  ;;  %v831_v60 = vadd.f32 %v1106_v59, %v726_v34  ;;  %v805_v36 = vpop.f32.mrb[19].mxu0  ;;  %v825_v38 = vpop.f32.mrb[19].mxu1 }
 0x18b   : > { %842 = vst [vmem:[%s199_s7] sm:$0xff] %v834_v2  ;;  %846 = vst [vmem:[%s199_s7 + $0x20] sm:$0xff] %v838_v31  ;;  %v806_v39 = vadd.f32 %v805_v36, %v701_v53  ;;  %v826_v44 = vadd.f32 %v825_v38, %v721_v25 }
 0x18c   : > { %v837_v45 = vmax.f32 %v811_v16, 0.0  ;;  %v841_v35 = vmax.f32 %v831_v60, 0.0 }
 0x18d   : > { %v836_v46 = vmax.f32 %v806_v39, 0.0  ;;  %v840_v42 = vmax.f32 %v826_v44, 0.0 }
 0x18e   : > { %845 = vst [vmem:[%s199_s7 + $0x18] sm:$0xff] %v837_v45  ;;  %849 = vst [vmem:[%s199_s7 + $0x38] sm:$0xff] %v841_v35 }
 0x18f   : > { %844 = vst [vmem:[%s199_s7 + $0x10] sm:$0xff] %v836_v46  ;;  %848 = vst [vmem:[%s199_s7 + $0x30] sm:$0xff] %v840_v42 }
 0x190 PF: > { %s13_s14 = sadd.s32 1, %s1308_s14   ;;  %s1830_s12 = smov %s1304_s13 }
 0x191   : > { %p10_p5 = scmp.ge.s32.totalorder %s13_s14, 4   ;;  %s1831_s13 = smov %s1833_s15 }
 0x193   :  { %12 = sbr.rel (!%p10_p5) target bundleno = 2 (0x2), region = 62 }

// kernel: _lambda_.11
= control target key start
LH: loop header
LB: loop body
LE: loop exit
PB: predicated region body
PF: predicated region fallthrough
CT: control target
= control target key end

     0   :  { %6 = vsyncpa [#allocation3], 0  ;;  %s563_s0 = inlined_call_operand.vmem [shape: f32[2,8,4,256], index: 0, kind: input, shape index: {}]   ;;  %s564_s1 = inlined_call_operand.hbm [shape: f32[2,4,4,128], index: 1, kind: output, shape index: {}]  }
   0x1   :  { %8 = vsyncpa [#allocation3 + $0x1], 0  ;;  %s444_s6 = smov 0   ;;  %s446_s7 = smov 0  }
   0x2   :  { %s448_s8 = smov 0   ;;  %s450_s9 = smov 0  }
   0x3   :  { %s452_s10 = smov 0   ;;  %s454_s11 = smov 0  }
   0x4 LB: > { %s279_s12 = sadd.s32 4294967295, %s429_s11   ;;  %s280_s13 = sadd.s32 4294967294, %s429_s11   ;;  %s429_s11 = sphi %s454_s11, %s14_s11   ;;  %s425_s10 = sphi %s452_s10, %s571_s10   ;;  %s421_s9 = sphi %s450_s9, %s570_s9   ;;  %s417_s8 = sphi %s448_s8, %s569_s8   ;;  %s413_s7 = sphi %s446_s7, %s568_s7   ;;  %s409_s6 = sphi %s444_s6, %s567_s6  }
   0x5   : > { %s26_s14 = sadd.s32 1, %s425_s10  ;;  %s63_s15 = sadd.s32 1, %s417_s8 }
   0x6   : > { %p28_p0 = scmp.ge.s32.totalorder %s26_s14, 2  ;;  %p73_p1 = scmp.ne.s32.totalorder %s417_s8, %s413_s7 }
   0x7   : > { %p74_p2 = scmp.eq.s32.totalorder %s279_s12, 1  ;;  %p79_p3 = scmp.ne.s32.totalorder %s413_s7, %s409_s6 }
   0x8   : > { %s573_s14 = smov (%p28_p0, %s26_s14), 0  ;;  %p80_p5 = scmp.eq.s32.totalorder %s280_s13, 1 }
   0x9   : > { %p484_p4 = por %p74_p2, %p73_p1  ;;  %s58_s17 = ssub.s32 %s425_s10, %s573_s14 }
   0xa   : > { %p283_p6 = scmp.ge.s32.totalorder %s429_s11, 1  ;;  %p61_p7 = scmp.eq.s32.totalorder %s58_s17, 0 }
   0xb   : > { %p491_p8 = por %p80_p5, %p79_p3  ;;  %p112_p9 = scmp.lt.s32.totalorder %s429_s11, 3 }
   0xc   : > { %s497_s19 = scalar_select %p61_p7, %s417_s8, %s63_s15  }
   0xd   : > { %p113_p10 = pnand %p283_p6, %p112_p9 }
   0xe   : > { %p138_p11 = scmp.lt.s32.totalorder (!%p113_p10), %s421_s9, 1  ;;  %s134_s20 = sand.u32 (!%p113_p10), 1, %s413_s7  }
   0xf   : > { %116 = sbr.rel (%p113_p10) target bundleno = 50 (0x32), region = 24  ;;  %s284_s22 = sshll.u32 (!%p113_p10), %s134_s20, 4 }
  0x10   : > { %s136_s27 = scalar_lea.vmem (!%p113_p10), [#allocation2], %s284_s22  ;;  %s293_s29 = sshll.u32 (!%p113_p10), %s421_s9, 8 }
  0x11   : > { %s197_s28 = sshll.u32 (!%p113_p10), %s136_s27, 4  ;;  %s513_s3 = scalar_lea.hbm (!%p113_p10), %s564_s1, %s293_s29  ;;  %s508_s28 = int_to_ptr.vmem [resolvable:$true] %s197_s28 }
  0x12   : > { %s517_s4 = scalar_lea.sflag (!%p113_p10), [#allocation3], %s134_s20  ;;  %s351_s5 = scalar_lea.vmem (!%p113_p10), %s508_s28, 256 }
  0x13   : > { %p352_p12 = scmp.ne.s32.totalorder (!%p113_p10), %s508_s28, %s351_s5 }
  0x15   : > { %p353_p13 = pnand (!%p113_p10), %p352_p12, %p484_p4 }
  0x16   : > { %s139_s21 = scalar_select %p138_p11, %s421_s9, 1 }
  0x17   : > { %p354_p0 = pneg %p353_p13  ;;  %s431_s9 = smov [#allocation2]  }
  0x18   : > { %s292_s23 = sshll.u32 %s139_s21, 6  ;;  %s355_s12 = sshll.u32 %s431_s9, 4  ;;  %s356_s12 = int_to_ptr.vmem [resolvable:$false] %s355_s12 }
  0x19   : > { %s146_s26 = scalar_lea.vmem %s563_s0, %s292_s23  ;;  %s357_s13 = scalar_lea.vmem %s356_s12, 512 }
  0x1a   : > { %v149_v0 = vld [vmem:[%s146_s26] sm:$0xff]  ;;  %v150_v1 = vld [vmem:[%s146_s26 + $0x8] sm:$0xff]  ;;  %v151_v2 = vld [vmem:[%s146_s26 + $0x10] sm:$0xff]  ;;  %p358_p1 = scmp.lt.s32.totalorder %s508_s28, %s356_s12  ;;  %p359_p2 = scmp.lt.s32.totalorder %s357_s13, %s351_s5 }
  0x1b   : > { %v157_v3 = vmax.f32 %v149_v0, %v150_v1  ;;  %v152_v4 = vld [vmem:[%s146_s26 + $0x18] sm:$0xff]  ;;  %v153_v5 = vld [vmem:[%s146_s26 + $0x20] sm:$0xff]  ;;  %v154_v6 = vld [vmem:[%s146_s26 + $0x28] sm:$0xff] }
  0x1c   : > { %v158_v7 = vmax.f32 %v151_v2, %v152_v4  ;;  %v159_v8 = vmax.f32 %v153_v5, %v154_v6  ;;  %v155_v9 = vld [vmem:[%s146_s26 + $0x30] sm:$0xff]  ;;  %v156_v10 = vld [vmem:[%s146_s26 + $0x38] sm:$0xff]  ;;  %p360_p3 = por %p359_p2, %p358_p1 }
  0x1d   : > { %v165_v11 = vrot.slane %v157_v3, 4  ;;  %v160_v12 = vmax.f32 %v155_v9, %v156_v10 }
  0x1e   : > { %v166_v13 = vrot.slane %v158_v7, 4  ;;  %v167_v14 = vrot.slane %v159_v8, 4  ;;  %p361_p5 = pnand %p360_p3, %p354_p0 }
  0x1f   : > { %v173_v15 = vmax.f32 %v157_v3, %v165_v11  ;;  %v168_v16 = vrot.slane %v160_v12, 4 }
  0x20   : > { %v174_v17 = vmax.f32 %v158_v7, %v166_v13  ;;  %v175_v18 = vmax.f32 %v159_v8, %v167_v14 }
  0x21   : > { %177 = vst [vmem:[%s136_s27] sm:$0xf] %v173_v15  ;;  %v176_v19 = vmax.f32 %v160_v12, %v168_v16 }
  0x22   : > { %178 = vst [vmem:[%s136_s27 + $0x4] sm:$0xf] %v174_v17  ;;  %179 = vst [vmem:[%s136_s27 + $0x8] sm:$0xf] %v175_v18 }
  0x23   : > { %180 = vst [vmem:[%s136_s27 + $0xc] sm:$0xf] %v176_v19 }
  0x24   : > { %364 = shalt.err (!%p361_p5)
}
  0x25   : > { %s365_s15 = scalar_lea.hbm %s513_s3, 256  ;;  %s369_s21 = scalar_lea.hbm %s564_s1, 512 }
  0x26   : > { %p366_p6 = scmp.ne.s32.totalorder %s513_s3, %s365_s15  ;;  %p370_p10 = scmp.lt.u32.totalorder %s513_s3, %s564_s1 }
  0x27   : > { %p371_p11 = scmp.lt.u32.totalorder %s369_s21, %s365_s15  ;;  %p373_p13 = scmp.lt.u32.totalorder %s365_s15, %s513_s3 }
  0x28   : > { %p367_p7 = pnand %p366_p6, %p484_p4 }
  0x29   : > { %p372_p12 = por %p371_p11, %p370_p10 }
  0x2a   : > { %p368_p9 = pneg %p367_p7 }
  0x2b   : > { %p374_p0 = por %p373_p13, %p372_p12 }
  0x2d   : > { %p375_p1 = pnand %p374_p0, %p368_p9 }
  0x2f   : > { %378 = shalt.err (!%p375_p1)
}
  0x30   : > { %s432_s24 = smov 64   ;;  %s433_s25 = smov 4  }
  0x31   : > { %294 = dma.vmem_to_hbm [thread:$0]  (%p484_p4), %s508_s28, 256, %s513_s3, %s517_s4, %s432_s24, %s432_s24, %s433_s25  }
  0x32 PF: > { %p300_p2 = scmp.ge.s32.totalorder %s429_s11, 2  ;;  %s212_s26 = sand.u32 1, %s409_s6  }
  0x33   : > { %s213_s27 = scalar_lea.sflag [#allocation3], %s212_s26 }
  0x34   : > { %p297_p3 = pnand %p300_p2, %p491_p8 }
  0x36   : > { %404 = dma.done.wait (!%p297_p3), %s213_s27, 256  }
  0x37   : > { %406 = vsyncadd (!%p297_p3), %s213_s27, 4294967040  ;;  %s14_s11 = sadd.s32 1, %s429_s11   ;;  %s567_s6 = smov %s413_s7 }
  0x38   : > { %p11_p5 = scmp.ge.s32.totalorder %s14_s11, 4   ;;  %s568_s7 = smov %s417_s8 }
  0x39   : > { %s569_s8 = smov %s497_s19  ;;  %s570_s9 = smov %s425_s10 }
  0x3a   : > { %s571_s10 = smov %s573_s14  ;;  %13 = sbr.rel (!%p11_p5) target bundleno = 4 (0x4), region = 59 }
  0x41   :  { %218 = vsyncpa [#allocation3], 1 }
  0x42   :  { %220 = vsyncpa [#allocation3 + $0x1], 1 }

// kernel: _lambda_.10
= control target key start
LH: loop header
LB: loop body
LE: loop exit
PB: predicated region body
PF: predicated region fallthrough
CT: control target
= control target key end

     0   :  { %s1645_s12 = smov 0   ;;  %s1647_s13 = smov 0   ;;  %s2335_s0 = inlined_call_operand.vmem [shape: f32[2,10,10,128], index: 0, kind: input, shape index: {}]   ;;  %s2336_s1 = inlined_call_operand.vmem [shape: f32[1152,128], index: 1, kind: input, shape index: {}]   ;;  %s2337_s2 = inlined_call_operand.vmem [shape: f32[1,128], index: 2, kind: input, shape index: {}]   ;;  %s2338_s3 = inlined_call_operand.vmem [shape: f32[2,8,8,128], index: 3, kind: output, shape index: {}]  }
   0x1   :  { %s1649_s14 = smov 0  }
   0x2 LB: > { %s25_s15 = sadd.s32 1, %s1619_s13  ;;  %p1100_p0 = scmp.ge.s32.totalorder %s1623_s14, 1  ;;  %s1623_s14 = sphi %s1649_s14, %s13_s14   ;;  %s1619_s13 = sphi %s1647_s13, %s2340_s13   ;;  %s1615_s12 = sphi %s1645_s12, %s2339_s12  }
   0x3   : > { %p27_p1 = scmp.ge.s32.totalorder %s25_s15, 2  ;;  %p155_p2 = scmp.lt.s32.totalorder %s1623_s14, 3 }
   0x5   : > { %s2342_s15 = smov (%p27_p1, %s25_s15), 0  ;;  %p156_p3 = pnand %p1100_p0, %p155_p2 }
   0x6   : > { %v339_v0 = vld [vmem:[%s2336_s1 + $0x80] sm:$0xff] (!%p156_p3)  ;;  %v340_v1 = vld [vmem:[%s2336_s1 + $0x88] sm:$0xff] (!%p156_p3)  ;;  %v341_v11 = vld [vmem:[%s2336_s1 + $0x90] sm:$0xff] (!%p156_p3)  ;;  %p185_p4 = scmp.lt.s32.totalorder (!%p156_p3), %s1615_s12, 1  ;;  %vm237_vm0 = vcmask (!%p156_p3), 1046528   ;;  %vm270_vm1 = vcmask (!%p156_p3), 1045504  }
   0x7   : > { %159 = sbr.rel (%p156_p3) target bundleno = 329 (0x149), region = 32  ;;  %v371_v2 = vld [vmem:[%s2336_s1 + $0x180] sm:$0xff] (!%p156_p3)  ;;  %v1400_v3 = vpack.c.bf16 (!%p156_p3), %v340_v1, %v339_v0  ;;  %v372_v4 = vld [vmem:[%s2336_s1 + $0x188] sm:$0xff] (!%p156_p3)  ;;  %v342_v13 = vld [vmem:[%s2336_s1 + $0x98] sm:$0xff] (!%p156_p3) }
   0x8   : > { %v323_v5 = vld [vmem:[%s2336_s1] sm:$0xff] (!%p156_p3)  ;;  %v324_v6 = vld [vmem:[%s2336_s1 + $0x8] sm:$0xff] (!%p156_p3)  ;;  %v1432_v7 = vpack.c.bf16 (!%p156_p3), %v372_v4, %v371_v2  ;;  %v373_v14 = vld [vmem:[%s2336_s1 + $0x190] sm:$0xff] (!%p156_p3)  ;;  %v1404_v16 = vpack.c.bf16 (!%p156_p3), %v342_v13, %v341_v11 }
   0x9   : > { %v1402_v8 = vpack.c.bf16 (!%p156_p3), %v324_v6, %v323_v5  ;;  %v355_v9 = vld [vmem:[%s2336_s1 + $0x100] sm:$0xff] (!%p156_p3)  ;;  %v356_v10 = vld [vmem:[%s2336_s1 + $0x108] sm:$0xff] (!%p156_p3)  ;;  %1401 = vmatprep.subr.bf16.mxu0 (!%p156_p3), %v1400_v3  ;;  %v374_v15 = vld [vmem:[%s2336_s1 + $0x198] sm:$0xff] (!%p156_p3) }
   0xa   : > { %v1434_v12 = vpack.c.bf16 (!%p156_p3), %v356_v10, %v355_v9  ;;  %1433 = vmatprep.subr.bf16.mxu1 (!%p156_p3), %v1432_v7  ;;  %v1436_v17 = vpack.c.bf16 (!%p156_p3), %v374_v15, %v373_v14  ;;  %v325_v18 = vld [vmem:[%s2336_s1 + $0x10] sm:$0xff] (!%p156_p3)  ;;  %v326_v19 = vld [vmem:[%s2336_s1 + $0x18] sm:$0xff] (!%p156_p3)  ;;  %v343_v23 = vld [vmem:[%s2336_s1 + $0xa0] sm:$0xff] (!%p156_p3) }
   0xb   : > { %1403 = vmatpush3.bf16.msra.mxu0 (!%p156_p3), %v1402_v8  ;;  %v357_v20 = vld [vmem:[%s2336_s1 + $0x110] sm:$0xff] (!%p156_p3)  ;;  %v1406_v21 = vpack.c.bf16 (!%p156_p3), %v326_v19, %v325_v18  ;;  %v358_v22 = vld [vmem:[%s2336_s1 + $0x118] sm:$0xff] (!%p156_p3)  ;;  %v344_v24 = vld [vmem:[%s2336_s1 + $0xa8] sm:$0xff] (!%p156_p3) }
   0xc   : > { %1435 = vmatpush3.bf16.msra.mxu1 (!%p156_p3), %v1434_v12  ;;  %1405 = vmatprep.subr.bf16.mxu0 (!%p156_p3), %v1404_v16  ;;  %v1438_v25 = vpack.c.bf16 (!%p156_p3), %v358_v22, %v357_v20  ;;  %v1408_v26 = vpack.c.bf16 (!%p156_p3), %v344_v24, %v343_v23  ;;  %v375_v27 = vld [vmem:[%s2336_s1 + $0x1a0] sm:$0xff] (!%p156_p3)  ;;  %v376_v28 = vld [vmem:[%s2336_s1 + $0x1a8] sm:$0xff] (!%p156_p3)  ;;  %v345_v35 = vld [vmem:[%s2336_s1 + $0xb0] sm:$0xff] (!%p156_p3) }
   0xd   : > { %1437 = vmatprep.subr.bf16.mxu1 (!%p156_p3), %v1436_v17  ;;  %v327_v29 = vld [vmem:[%s2336_s1 + $0x20] sm:$0xff] (!%p156_p3)  ;;  %v1440_v30 = vpack.c.bf16 (!%p156_p3), %v376_v28, %v375_v27  ;;  %v328_v31 = vld [vmem:[%s2336_s1 + $0x28] sm:$0xff] (!%p156_p3)  ;;  %v346_v36 = vld [vmem:[%s2336_s1 + $0xb8] sm:$0xff] (!%p156_p3) }
   0xe   : > { %v359_v32 = vld [vmem:[%s2336_s1 + $0x120] sm:$0xff]  ;;  %v360_v33 = vld [vmem:[%s2336_s1 + $0x128] sm:$0xff]  ;;  %v1410_v34 = vpack.c.bf16 %v328_v31, %v327_v29  ;;  %v377_v37 = vld [vmem:[%s2336_s1 + $0x1b0] sm:$0xff]  ;;  %v1412_v39 = vpack.c.bf16 %v346_v36, %v345_v35  ;;  %s2344_s12 = smov (!%p185_p4, %s1615_s12), 1 }
   0xf   : > { %1407 = vmatpush3.bf16.msra.mxu0 %v1406_v21  ;;  %v1442_v38 = vpack.c.bf16 %v360_v33, %v359_v32  ;;  %v378_v40 = vld [vmem:[%s2336_s1 + $0x1b8] sm:$0xff]  ;;  %v329_v41 = vld [vmem:[%s2336_s1 + $0x30] sm:$0xff]  ;;  %v347_v46 = vld [vmem:[%s2336_s1 + $0xc0] sm:$0xff]  ;;  %s1576_s4 = smul.u32 160, %s2344_s12  ;;  %s1107_s16 = sshll.u32 %s2344_s12, 6 }
  0x10   : > { %1439 = vmatpush3.bf16.msra.mxu1 %v1438_v25  ;;  %1409 = vmatprep.subr.bf16.mxu0 %v1408_v26  ;;  %v330_v42 = vld [vmem:[%s2336_s1 + $0x38] sm:$0xff]  ;;  %v1444_v43 = vpack.c.bf16 %v378_v40, %v377_v37  ;;  %v361_v44 = vld [vmem:[%s2336_s1 + $0x130] sm:$0xff]  ;;  %v348_v47 = vld [vmem:[%s2336_s1 + $0xc8] sm:$0xff]  ;;  %s199_s19 = scalar_lea.vmem %s2338_s3, %s1107_s16 }
  0x11   : > { %1441 = vmatprep.subr.bf16.mxu1 %v1440_v30  ;;  %v362_v45 = vld [vmem:[%s2336_s1 + $0x138] sm:$0xff]  ;;  %v379_v48 = vld [vmem:[%s2336_s1 + $0x1c0] sm:$0xff]  ;;  %v380_v49 = vld [vmem:[%s2336_s1 + $0x1c8] sm:$0xff]  ;;  %v1414_v50 = vpack.c.bf16 %v330_v42, %v329_v41  ;;  %v1416_v52 = vpack.c.bf16 %v348_v47, %v347_v46  ;;  %s1825_s27 = scalar_lea.vmem %s2335_s0, %s1576_s4 }
  0x12   : > { %v1446_v51 = vpack.c.bf16 %v362_v45, %v361_v44  ;;  %v331_v53 = vld [vmem:[%s2336_s1 + $0x40] sm:$0xff]  ;;  %v332_v54 = vld [vmem:[%s2336_s1 + $0x48] sm:$0xff]  ;;  %v1448_v56 = vpack.c.bf16 %v380_v49, %v379_v48  ;;  %v349_v58 = vld [vmem:[%s2336_s1 + $0xd0] sm:$0xff] }
  0x13   : > { %1411 = vmatpush3.bf16.msra.mxu0 %v1410_v34  ;;  %v363_v55 = vld [vmem:[%s2336_s1 + $0x140] sm:$0xff]  ;;  %v364_v57 = vld [vmem:[%s2336_s1 + $0x148] sm:$0xff]  ;;  %v350_v59 = vld [vmem:[%s2336_s1 + $0xd8] sm:$0xff]  ;;  %v1418_v62 = vpack.c.bf16 %v332_v54, %v331_v53 }
  0x14   : > { %1443 = vmatpush3.bf16.msra.mxu1 %v1442_v38  ;;  %1413 = vmatprep.subr.bf16.mxu0 %v1412_v39  ;;  %v381_v60 = vld [vmem:[%s2336_s1 + $0x1d0] sm:$0xff]  ;;  %v382_v61 = vld [vmem:[%s2336_s1 + $0x1d8] sm:$0xff]  ;;  %v1450_v63 = vpack.c.bf16 %v364_v57, %v363_v55  ;;  %v1420_v0 = vpack.c.bf16 %v350_v59, %v349_v58  ;;  %v351_v6 = vld [vmem:[%s2336_s1 + $0xe0] sm:$0xff] }
  0x15   : > { %1445 = vmatprep.subr.bf16.mxu1 %v1444_v43  ;;  %v333_v1 = vld [vmem:[%s2336_s1 + $0x50] sm:$0xff]  ;;  %v334_v2 = vld [vmem:[%s2336_s1 + $0x58] sm:$0xff]  ;;  %v1452_v4 = vpack.c.bf16 %v382_v61, %v381_v60  ;;  %v352_v7 = vld [vmem:[%s2336_s1 + $0xe8] sm:$0xff] }
  0x16   : > { %v365_v3 = vld [vmem:[%s2336_s1 + $0x150] sm:$0xff]  ;;  %v366_v5 = vld [vmem:[%s2336_s1 + $0x158] sm:$0xff]  ;;  %v383_v8 = vld [vmem:[%s2336_s1 + $0x1e0] sm:$0xff]  ;;  %v1422_v10 = vpack.c.bf16 %v334_v2, %v333_v1  ;;  %v1424_v15 = vpack.c.bf16 %v352_v7, %v351_v6 }
  0x17   : > { %1415 = vmatpush3.bf16.msra.mxu0 %v1414_v50  ;;  %v384_v9 = vld [vmem:[%s2336_s1 + $0x1e8] sm:$0xff]  ;;  %v335_v11 = vld [vmem:[%s2336_s1 + $0x60] sm:$0xff]  ;;  %v1454_v14 = vpack.c.bf16 %v366_v5, %v365_v3  ;;  %v353_v20 = vld [vmem:[%s2336_s1 + $0xf0] sm:$0xff] }
  0x18   : > { %1447 = vmatpush3.bf16.msra.mxu1 %v1446_v51  ;;  %1417 = vmatprep.subr.bf16.mxu0 %v1416_v52  ;;  %v336_v12 = vld [vmem:[%s2336_s1 + $0x68] sm:$0xff]  ;;  %v367_v13 = vld [vmem:[%s2336_s1 + $0x160] sm:$0xff]  ;;  %v1456_v19 = vpack.c.bf16 %v384_v9, %v383_v8  ;;  %v354_v21 = vld [vmem:[%s2336_s1 + $0xf8] sm:$0xff] }
  0x19   : > { %1449 = vmatprep.subr.bf16.mxu1 %v1448_v56  ;;  %v368_v16 = vld [vmem:[%s2336_s1 + $0x168] sm:$0xff]  ;;  %v1846_v17 = vld [vmem:[%s1825_s27] sm:$0xff]  ;;  %v1857_v24 = vld [vmem:[%s1825_s27 + $0x10] sm:$0xff]  ;;  %v1426_v27 = vpack.c.bf16 %v336_v12, %v335_v11  ;;  %v1428_v30 = vpack.c.bf16 %v354_v21, %v353_v20 }
  0x1a   : > { %v202_v18 = vld [vmem:[%s1825_s27 + $0x8] sm:$0x3]  ;;  %v238_v22 = vrot.slane %v1846_v17, 1  ;;  %v385_v25 = vld [vmem:[%s2336_s1 + $0x1f0] sm:$0xff]  ;;  %v386_v26 = vld [vmem:[%s2336_s1 + $0x1f8] sm:$0xff]  ;;  %643 = vmatprep.mubr.f32.mxu1 %v1857_v24  ;;  %v1458_v29 = vpack.c.bf16 %v368_v16, %v367_v13  ;;  %v271_v43 = vrot.slane %v1846_v17, 2 }
  0x1b   : > { %1419 = vmatpush3.bf16.msra.mxu0 %v1418_v62  ;;  %v239_v23 = vrot.slane %v202_v18, 1  ;;  %v337_v31 = vld [vmem:[%s2336_s1 + $0x70] sm:$0xff]  ;;  %v338_v32 = vld [vmem:[%s2336_s1 + $0x78] sm:$0xff]  ;;  %v1460_v34 = vpack.c.bf16 %v386_v26, %v385_v25  ;;  %v403_v36 = vld [vmem:[%s2336_s1 + $0x280] sm:$0xff]  ;;  %v272_v44 = vrot.slane %v202_v18, 2  ;;  %v241_v51 = vrot.slane %v1857_v24, 1 }
  0x1c   : > { %1451 = vmatpush3.bf16.msra.mxu1 %v1450_v63  ;;  %1421 = vmatprep.subr.bf16.mxu0 %v1420_v0  ;;  %v369_v33 = vld [vmem:[%s2336_s1 + $0x170] sm:$0xff]  ;;  %v370_v35 = vld [vmem:[%s2336_s1 + $0x178] sm:$0xff]  ;;  %v404_v37 = vld [vmem:[%s2336_s1 + $0x288] sm:$0xff]  ;;  %v1430_v41 = vpack.c.bf16 %v338_v32, %v337_v31  ;;  %v274_v62 = vrot.slane %v1857_v24, 2 }
  0x1d   : > { %1453 = vmatprep.subr.bf16.mxu1 %v1452_v4  ;;  %v240_v28 = vsel %vm237_vm0, %v238_v22, %v239_v23  ;;  %v435_v38 = vld [vmem:[%s2336_s1 + $0x380] sm:$0xff]  ;;  %v436_v39 = vld [vmem:[%s2336_s1 + $0x388] sm:$0xff]  ;;  %v204_v40 = vld [vmem:[%s1825_s27 + $0x18] sm:$0x3]  ;;  %v1462_v42 = vpack.c.bf16 %v370_v35, %v369_v33  ;;  %v1464_v45 = vpack.c.bf16 %v404_v37, %v403_v36  ;;  %v273_v60 = vsel %vm270_vm1, %v271_v43, %v272_v44 }
  0x1e   : > { %538 = vmatprep.mubr.f32.mxu0 %v240_v28  ;;  %v387_v46 = vld [vmem:[%s2336_s1 + $0x200] sm:$0xff]  ;;  %v388_v47 = vld [vmem:[%s2336_s1 + $0x208] sm:$0xff]  ;;  %v1496_v48 = vpack.c.bf16 %v436_v39, %v435_v38  ;;  %v242_v52 = vrot.slane %v204_v40, 1  ;;  %v405_v54 = vld [vmem:[%s2336_s1 + $0x290] sm:$0xff]  ;;  %v275_v63 = vrot.slane %v204_v40, 2 }
  0x1f   : > { %1423 = vmatpush3.bf16.msra.mxu0 %v1422_v10  ;;  %v419_v49 = vld [vmem:[%s2336_s1 + $0x300] sm:$0xff]  ;;  %v420_v50 = vld [vmem:[%s2336_s1 + $0x308] sm:$0xff]  ;;  %v406_v55 = vld [vmem:[%s2336_s1 + $0x298] sm:$0xff]  ;;  %v1466_v57 = vpack.c.bf16 %v388_v47, %v387_v46 }
  0x20   : > { %1455 = vmatpush3.bf16.msra.mxu1 %v1454_v14  ;;  %1425 = vmatprep.subr.bf16.mxu0 %v1424_v15  ;;  %v1907_v53 = vld [vmem:[%s1825_s27 + $0x20] sm:$0xff]  ;;  %v1916_v56 = vld [vmem:[%s1825_s27 + $0x28] sm:$0x3]  ;;  %v437_v58 = vld [vmem:[%s2336_s1 + $0x390] sm:$0xff]  ;;  %v1498_v61 = vpack.c.bf16 %v420_v50, %v419_v49  ;;  %v1933_v2 = vsel %vm237_vm0, %v241_v51, %v242_v52  ;;  %v1468_v3 = vpack.c.bf16 %v406_v55, %v405_v54 }
  0x21   : > { %1457 = vmatprep.subr.bf16.mxu1 %v1456_v19  ;;  %v438_v59 = vld [vmem:[%s2336_s1 + $0x398] sm:$0xff]  ;;  %v389_v0 = vld [vmem:[%s2336_s1 + $0x210] sm:$0xff]  ;;  %v244_v6 = vrot.slane %v1907_v53, 1  ;;  %v245_v7 = vrot.slane %v1916_v56, 1  ;;  %v407_v10 = vld [vmem:[%s2336_s1 + $0x2a0] sm:$0xff]  ;;  %v1964_v16 = vsel %vm270_vm1, %v274_v62, %v275_v63  ;;  %v277_v18 = vrot.slane %v1907_v53, 2 }
  0x22   : > { %v390_v1 = vld [vmem:[%s2336_s1 + $0x218] sm:$0xff]  ;;  %v421_v4 = vld [vmem:[%s2336_s1 + $0x310] sm:$0xff]  ;;  %v1500_v9 = vpack.c.bf16 %v438_v59, %v437_v58  ;;  %v408_v11 = vld [vmem:[%s2336_s1 + $0x2a8] sm:$0xff]  ;;  %v278_v19 = vrot.slane %v1916_v56, 2 }
  0x23   : > { %1427 = vmatpush3.bf16.msra.mxu0 %v1426_v27  ;;  %v422_v5 = vld [vmem:[%s2336_s1 + $0x318] sm:$0xff]  ;;  %v1944_v8 = vld [vmem:[%s1825_s27 + $0x30] sm:$0xff]  ;;  %v1470_v13 = vpack.c.bf16 %v390_v1, %v389_v0  ;;  %v439_v14 = vld [vmem:[%s2336_s1 + $0x3a0] sm:$0xff]  ;;  %v1976_v22 = vsel %vm237_vm0, %v244_v6, %v245_v7  ;;  %v1472_v23 = vpack.c.bf16 %v408_v11, %v407_v10 }
  0x24   : > { %1459 = vmatpush3.bf16.msra.mxu1 %v1458_v29  ;;  %1429 = vmatprep.subr.bf16.mxu0 %v1428_v30  ;;  %v1954_v12 = vld [vmem:[%s1825_s27 + $0x38] sm:$0x3]  ;;  %v440_v15 = vld [vmem:[%s2336_s1 + $0x3a8] sm:$0xff]  ;;  %v391_v20 = vld [vmem:[%s2336_s1 + $0x220] sm:$0xff]  ;;  %v247_v27 = vrot.slane %v1944_v8, 1  ;;  %v2008_v36 = vsel %vm270_vm1, %v277_v18, %v278_v19  ;;  %v280_v38 = vrot.slane %v1944_v8, 2 }
  0x25   : > { %1461 = vmatprep.subr.bf16.mxu1 %v1460_v34  ;;  %v392_v21 = vld [vmem:[%s2336_s1 + $0x228] sm:$0xff]  ;;  %v423_v25 = vld [vmem:[%s2336_s1 + $0x320] sm:$0xff]  ;;  %v248_v28 = vrot.slane %v1954_v12, 1  ;;  %v1504_v30 = vpack.c.bf16 %v440_v15, %v439_v14  ;;  %v409_v31 = vld [vmem:[%s2336_s1 + $0x2b0] sm:$0xff]  ;;  %v281_v39 = vrot.slane %v1954_v12, 2 }
  0x26   : > { %v424_v26 = vld [vmem:[%s2336_s1 + $0x328] sm:$0xff]  ;;  %v1987_v29 = vld [vmem:[%s1825_s27 + $0x40] sm:$0xff]  ;;  %v410_v32 = vld [vmem:[%s2336_s1 + $0x2b8] sm:$0xff]  ;;  %v1474_v34 = vpack.c.bf16 %v392_v21, %v391_v20 }
  0x27   : > { %1431 = vmatpush3.bf16.msra.mxu0 %v1430_v41  ;;  %v1997_v33 = vld [vmem:[%s1825_s27 + $0x48] sm:$0x3]  ;;  %v442_v35 = vld [vmem:[%s2336_s1 + $0x3b8] sm:$0xff]  ;;  %v1506_v37 = vpack.c.bf16 %v424_v26, %v423_v25  ;;  %v393_v40 = vld [vmem:[%s2336_s1 + $0x230] sm:$0xff]  ;;  %v1476_v43 = vpack.c.bf16 %v410_v32, %v409_v31  ;;  %v250_v46 = vrot.slane %v1987_v29, 1  ;;  %v283_v59 = vrot.slane %v1987_v29, 2 }
  0x28   : > { %1463 = vmatpush3.bf16.msra.mxu1 %v1462_v42  ;;  %1465 = vmatprep.subr.bf16.mxu0 %v1464_v45  ;;  %v394_v41 = vld [vmem:[%s2336_s1 + $0x238] sm:$0xff]  ;;  %v2020_v42 = vsel %vm237_vm0, %v247_v27, %v248_v28  ;;  %v425_v44 = vld [vmem:[%s2336_s1 + $0x330] sm:$0xff]  ;;  %v251_v47 = vrot.slane %v1997_v33, 1  ;;  %v411_v50 = vld [vmem:[%s2336_s1 + $0x2c0] sm:$0xff] }
  0x29   : > { %1497 = vmatprep.subr.bf16.mxu1 %v1496_v48  ;;  %v426_v45 = vld [vmem:[%s2336_s1 + $0x338] sm:$0xff]  ;;  %v2031_v48 = vld [vmem:[%s1825_s27 + $0x50] sm:$0xff]  ;;  %v412_v51 = vld [vmem:[%s2336_s1 + $0x2c8] sm:$0xff]  ;;  %v1478_v54 = vpack.c.bf16 %v394_v41, %v393_v40 }
  0x2a   : > { %539 = vmatmul.mubr.f32.vlgmr.msra.gmra.mrb[0].mxu0 %v1846_v17  ;;  %v1502_v17 = vpack.c.bf16 %v422_v5, %v421_v4  ;;  %v2041_v52 = vld [vmem:[%s1825_s27 + $0x58] sm:$0x3]  ;;  %v443_v55 = vld [vmem:[%s2336_s1 + $0x3c0] sm:$0xff]  ;;  %v444_v56 = vld [vmem:[%s2336_s1 + $0x3c8] sm:$0xff]  ;;  %v1510_v58 = vpack.c.bf16 %v426_v45, %v425_v44  ;;  %v2067_v0 = vsel %vm237_vm0, %v250_v46, %v251_v47  ;;  %v1480_v1 = vpack.c.bf16 %v412_v51, %v411_v50 }
  0x2b   : > { %644 = vmatmul.mubr.f32.vlgmr.msra.gmra.mrb[0].mxu1 %v273_v60  ;;  %1467 = vmatpush3.bf16.msra.mxu0 %v1466_v57  ;;  %v2052_v57 = vsel %vm270_vm1, %v280_v38, %v281_v39  ;;  %v284_v60 = vrot.slane %v1997_v33, 2  ;;  %v396_v62 = vld [vmem:[%s2336_s1 + $0x248] sm:$0xff]  ;;  %v427_v63 = vld [vmem:[%s2336_s1 + $0x340] sm:$0xff]  ;;  %v253_v4 = vrot.slane %v2031_v48, 1  ;;  %v254_v5 = vrot.slane %v2041_v52, 1  ;;  %v413_v10 = vld [vmem:[%s2336_s1 + $0x2d0] sm:$0xff] }
  0x2c   : > { %1499 = vmatpush3.bf16.msra.mxu1 %v1498_v61  ;;  %543 = vmatprep.mubr.f32.mxu0 %v1933_v2  ;;  %v395_v61 = vld [vmem:[%s2336_s1 + $0x240] sm:$0xff]  ;;  %v2078_v7 = vld [vmem:[%s1825_s27 + $0x68] sm:$0x3]  ;;  %v414_v11 = vld [vmem:[%s2336_s1 + $0x2d8] sm:$0xff]  ;;  %v286_v14 = vrot.slane %v2031_v48, 2  ;;  %v287_v15 = vrot.slane %v2041_v52, 2 }
  0x2d   : > { %648 = vmatprep.mubr.f32.mxu1 %v1907_v53  ;;  %1469 = vmatprep.subr.bf16.mxu0 %v1468_v3  ;;  %v428_v3 = vld [vmem:[%s2336_s1 + $0x348] sm:$0xff]  ;;  %v2075_v6 = vld [vmem:[%s1825_s27 + $0x60] sm:$0xff]  ;;  %v445_v12 = vld [vmem:[%s2336_s1 + $0x3d0] sm:$0xff]  ;;  %v2104_v20 = vsel %vm270_vm1, %v283_v59, %v284_v60  ;;  %v257_v27 = vrot.slane %v2078_v7, 1  ;;  %v1484_v31 = vpack.c.bf16 %v414_v11, %v413_v10  ;;  %v290_v44 = vrot.slane %v2078_v7, 2 }
  0x2e   : > { %544 = vmatmul.mubr.f32.gmra.mrb[2].mxu0 %v1857_v24  ;;  %1501 = vmatprep.subr.bf16.mxu1 %v1500_v9  ;;  %v441_v24 = vld [vmem:[%s2336_s1 + $0x3b0] sm:$0xff]  ;;  %v1512_v9 = vpack.c.bf16 %v444_v56, %v443_v55  ;;  %v398_v19 = vld [vmem:[%s2336_s1 + $0x258] sm:$0xff]  ;;  %v1514_v21 = vpack.c.bf16 %v428_v3, %v427_v63  ;;  %v256_v26 = vrot.slane %v2075_v6, 1  ;;  %v415_v32 = vld [vmem:[%s2336_s1 + $0x2e0] sm:$0xff]  ;;  %v2141_v40 = vsel %vm270_vm1, %v286_v14, %v287_v15 }
  0x2f   : > { %649 = vmatmul.mubr.f32.gmra.mrb[2].mxu1 %v1964_v16  ;;  %1471 = vmatpush3.bf16.msra.mxu0 %v1470_v13  ;;  %v1508_v49 = vpack.c.bf16 %v442_v35, %v441_v24  ;;  %v1482_v13 = vpack.c.bf16 %v396_v62, %v395_v61  ;;  %v397_v18 = vld [vmem:[%s2336_s1 + $0x250] sm:$0xff]  ;;  %v430_v25 = vld [vmem:[%s2336_s1 + $0x358] sm:$0xff]  ;;  %v416_v33 = vld [vmem:[%s2336_s1 + $0x2e8] sm:$0xff]  ;;  %v289_v35 = vrot.slane %v2075_v6, 2 }
  0x30   : > { %1503 = vmatpush3.bf16.msra.mxu1 %v1502_v17  ;;  %548 = vmatprep.mubr.f32.mxu0 %v1976_v22  ;;  %v446_v17 = vld [vmem:[%s2336_s1 + $0x3d8] sm:$0xff]  ;;  %v2115_v28 = vld [vmem:[%s1825_s27 + $0x70] sm:$0xff]  ;;  %v1486_v41 = vpack.c.bf16 %v398_v19, %v397_v18  ;;  %v448_v45 = vld [vmem:[%s2336_s1 + $0x3e8] sm:$0xff]  ;;  %v1488_v50 = vpack.c.bf16 %v416_v33, %v415_v32 }
  0x31   : > { %653 = vmatprep.mubr.f32.mxu1 %v1944_v8  ;;  %1473 = vmatprep.subr.bf16.mxu0 %v1472_v23  ;;  %v429_v23 = vld [vmem:[%s2336_s1 + $0x350] sm:$0xff]  ;;  %v1516_v24 = vpack.c.bf16 %v446_v17, %v445_v12  ;;  %v2136_v38 = vld [vmem:[%s1825_s27 + $0x78] sm:$0x3]  ;;  %v399_v46 = vld [vmem:[%s2336_s1 + $0x260] sm:$0xff]  ;;  %v259_v52 = vrot.slane %v2115_v28, 1  ;;  %v292_v10 = vrot.slane %v2115_v28, 2  ;;  %v2199_v14 = vsel %vm270_vm1, %v289_v35, %v290_v44 }
  0x32   : > { %549 = vmatmul.mubr.f32.gmra.mrb[4].mxu0 %v1907_v53  ;;  %1505 = vmatprep.subr.bf16.mxu1 %v1504_v30  ;;  %v2119_v30 = vsel %vm237_vm0, %v253_v4, %v254_v5  ;;  %v2151_v47 = vld [vmem:[%s1825_s27 + $0x88] sm:$0x3]  ;;  %v2163_v55 = vld [vmem:[%s1825_s27 + $0x90] sm:$0xff]  ;;  %v220_v56 = vld [vmem:[%s1825_s27 + $0x98] sm:$0x3]  ;;  %v260_v60 = vrot.slane %v2136_v38, 1 }
  0x33   : > { %654 = vmatmul.mubr.f32.gmra.mrb[4].mxu1 %v2008_v36  ;;  %1475 = vmatpush3.bf16.msra.mxu0 %v1474_v34  ;;  %v2128_v34 = vld [vmem:[%s1825_s27 + $0x80] sm:$0xff]  ;;  %v400_v51 = vld [vmem:[%s2336_s1 + $0x268] sm:$0xff]  ;;  %v315_v61 = vrot.slane %v2163_v55, 1  ;;  %v316_v62 = vrot.slane %v220_v56, 1  ;;  %v319_v63 = vrot.slane %v2163_v55, 2  ;;  %v417_v3 = vld [vmem:[%s2336_s1 + $0x2f0] sm:$0xff] }
  0x34   : > { %1507 = vmatpush3.bf16.msra.mxu1 %v1506_v37  ;;  %553 = vmatprep.mubr.f32.mxu0 %v2020_v42  ;;  %v447_v37 = vld [vmem:[%s2336_s1 + $0x3e0] sm:$0xff]  ;;  %v305_v39 = vrot.slane %v2128_v34, 1  ;;  %v432_v59 = vld [vmem:[%s2336_s1 + $0x368] sm:$0xff]  ;;  %v418_v4 = vld [vmem:[%s2336_s1 + $0x2f8] sm:$0xff]  ;;  %v320_v7 = vrot.slane %v220_v56, 2  ;;  %v293_v17 = vrot.slane %v2136_v38, 2 }
  0x35   : > { %658 = vmatprep.mubr.f32.mxu1 %v1987_v29  ;;  %1477 = vmatprep.subr.bf16.mxu0 %v1476_v43  ;;  %v1518_v43 = vpack.c.bf16 %v430_v25, %v429_v23  ;;  %v449_v11 = vld [vmem:[%s2336_s1 + $0x3f0] sm:$0xff]  ;;  %v450_v12 = vld [vmem:[%s2336_s1 + $0x3f8] sm:$0xff]  ;;  %v2213_v23 = vsel %vm237_vm0, %v259_v52, %v260_v60  ;;  %v1492_v25 = vpack.c.bf16 %v418_v4, %v417_v3  ;;  %v451_v32 = vld [vmem:[%s2336_s1 + $0x400] sm:$0xff] }
  0x36   : > { %554 = vmatmul.mubr.f32.gmra.mrb[6].mxu0 %v1944_v8  ;;  %1509 = vmatprep.subr.bf16.mxu1 %v1508_v49  ;;  %v2155_v49 = vsel %vm237_vm0, %v256_v26, %v257_v27  ;;  %v401_v18 = vld [vmem:[%s2336_s1 + $0x270] sm:$0xff]  ;;  %v402_v19 = vld [vmem:[%s2336_s1 + $0x278] sm:$0xff]  ;;  %v452_v33 = vld [vmem:[%s2336_s1 + $0x408] sm:$0xff]  ;;  %v2231_v35 = vsel %vm270_vm1, %v292_v10, %v293_v17 }
  0x37   : > { %659 = vmatmul.mubr.f32.gmra.mrb[6].mxu1 %v2052_v57  ;;  %1479 = vmatpush3.bf16.msra.mxu0 %v1478_v54  ;;  %v306_v54 = vrot.slane %v2151_v47, 1  ;;  %v433_v26 = vld [vmem:[%s2336_s1 + $0x370] sm:$0xff]  ;;  %v434_v27 = vld [vmem:[%s2336_s1 + $0x378] sm:$0xff]  ;;  %v1528_v38 = vpack.c.bf16 %v452_v33, %v451_v32  ;;  %v455_v44 = vld [vmem:[%s2336_s1 + $0x420] sm:$0xff] }
  0x38   : > { %1511 = vmatpush3.bf16.msra.mxu1 %v1510_v58  ;;  %558 = vmatprep.mubr.f32.mxu0 %v2067_v0  ;;  %v431_v58 = vld [vmem:[%s2336_s1 + $0x360] sm:$0xff]  ;;  %v464_v52 = vld [vmem:[%s2336_s1 + $0x468] sm:$0xff]  ;;  %v465_v56 = vld [vmem:[%s2336_s1 + $0x470] sm:$0xff] }
  0x39   : > { %663 = vmatprep.mubr.f32.mxu1 %v2031_v48  ;;  %1481 = vmatprep.subr.bf16.mxu0 %v1480_v1  ;;  %v1520_v1 = vpack.c.bf16 %v448_v45, %v447_v37  ;;  %v2184_v5 = vsel %vm237_vm0, %v305_v39, %v306_v54  ;;  %v1522_v15 = vpack.c.bf16 %v432_v59, %v431_v58  ;;  %v453_v39 = vld [vmem:[%s2336_s1 + $0x410] sm:$0xff]  ;;  %v456_v45 = vld [vmem:[%s2336_s1 + $0x428] sm:$0xff]  ;;  %v310_v54 = vrot.slane %v2151_v47, 2 }
  0x3a   : > { %559 = vmatmul.mubr.f32.gmra.mrb[8].mxu0 %v1987_v29  ;;  %1513 = vmatprep.subr.bf16.mxu1 %v1512_v9  ;;  %v1490_v9 = vpack.c.bf16 %v400_v51, %v399_v46  ;;  %v1526_v37 = vpack.c.bf16 %v434_v27, %v433_v26  ;;  %v458_v46 = vld [vmem:[%s2336_s1 + $0x438] sm:$0xff] }
  0x3b   : > { %664 = vmatmul.mubr.f32.gmra.mrb[8].mxu1 %v2104_v20  ;;  %1483 = vmatpush3.bf16.msra.mxu0 %v1482_v13  ;;  %v2195_v13 = vsel %vm237_vm0, %v315_v61, %v316_v62  ;;  %v462_v51 = vld [vmem:[%s2336_s1 + $0x458] sm:$0xff] }
  0x3c   : > { %1515 = vmatpush3.bf16.msra.mxu1 %v1514_v21  ;;  %563 = vmatprep.mubr.f32.mxu0 %v2119_v30  ;;  %v2209_v21 = vsel %vm270_vm1, %v319_v63, %v320_v7 }
  0x3d   : > { %668 = vmatprep.mubr.f32.mxu1 %v2075_v6  ;;  %1485 = vmatprep.subr.bf16.mxu0 %v1484_v31  ;;  %v1524_v31 = vpack.c.bf16 %v450_v12, %v449_v11 }
  0x3e   : > { %564 = vmatmul.mubr.f32.gmra.mrb[10].mxu0 %v2031_v48  ;;  %1517 = vmatprep.subr.bf16.mxu1 %v1516_v24  ;;  %v1494_v24 = vpack.c.bf16 %v402_v19, %v401_v18 }
  0x3f   : > { %669 = vmatmul.mubr.f32.gmra.mrb[10].mxu1 %v2141_v40  ;;  %1487 = vmatpush3.bf16.msra.mxu0 %v1486_v41  ;;  %v454_v41 = vld [vmem:[%s2336_s1 + $0x418] sm:$0xff] }
  0x40   : > { %1519 = vmatpush3.bf16.msra.mxu1 %v1518_v43  ;;  %568 = vmatprep.mubr.f32.mxu0 %v2155_v49  ;;  %v1532_v43 = vpack.c.bf16 %v454_v41, %v453_v39 }
  0x41   : > { %673 = vmatprep.mubr.f32.mxu1 %v2115_v28  ;;  %1489 = vmatprep.subr.bf16.mxu0 %v1488_v50  ;;  %v460_v50 = vld [vmem:[%s2336_s1 + $0x448] sm:$0xff] }
  0x42   : > { %569 = vmatmul.mubr.f32.gmra.mrb[12].mxu0 %v2075_v6  ;;  %1521 = vmatprep.subr.bf16.mxu1 %v1520_v1 }
  0x43   : > { %674 = vmatmul.mubr.f32.gmra.mrb[12].mxu1 %v2199_v14  ;;  %1491 = vmatpush3.bf16.msra.mxu0 %v1490_v9 }
  0x44   : > { %1523 = vmatpush3.bf16.msra.mxu1 %v1522_v15  ;;  %573 = vmatprep.mubr.f32.mxu0 %v2213_v23 }
  0x45   : > { %678 = vmatprep.mubr.f32.mxu1 %v2128_v34  ;;  %1493 = vmatprep.subr.bf16.mxu0 %v1492_v25 }
  0x46   : > { %574 = vmatmul.mubr.f32.gmra.mrb[14].mxu0 %v2115_v28  ;;  %1525 = vmatprep.subr.bf16.mxu1 %v1524_v31 }
  0x47   : > { %679 = vmatmul.mubr.f32.gmra.mrb[14].mxu1 %v2231_v35  ;;  %1495 = vmatpush3.bf16.msra.mxu0 %v1494_v24 }
  0x48   : > { %1527 = vmatpush3.bf16.msra.mxu1 %v1526_v37  ;;  %748 = vmatprep.mubr.f32.mxu0 %v1964_v16  ;;  %v1536_v16 = vpack.c.bf16 %v456_v45, %v455_v44 }
  0x49   : > { %853 = vmatprep.mubr.f32.mxu1 %v1976_v22  ;;  %1529 = vmatprep.subr.bf16.mxu0 %v1528_v38 }
  0x4a   : > { %749 = vmatmul.mubr.f32.vlgmr.msra.gmra.mrb[16].mxu0 %v1933_v2  ;;  %1560 = vmatprep.subr.bf16.mxu1 %v1528_v38  ;;  %v457_v2 = vld [vmem:[%s2336_s1 + $0x430] sm:$0xff] }
  0x4b   : > { %854 = vmatmul.mubr.f32.vlgmr.msra.gmra.mrb[16].mxu1 %v1907_v53  ;;  %1531 = vmatpush3.bf16.msra.mxu0 %v1528_v38  ;;  %v1540_v53 = vpack.c.bf16 %v458_v46, %v457_v2 }
  0x4c   : > { %1568 = vmatpush3.bf16.msra.mxu1 %v1528_v38  ;;  %753 = vmatprep.mubr.f32.mxu0 %v2008_v36 }
  0x4d   : > { %858 = vmatprep.mubr.f32.mxu1 %v2020_v42  ;;  %1533 = vmatprep.subr.bf16.mxu0 %v1532_v43 }
  0x4e   : > { %754 = vmatmul.mubr.f32.gmra.mrb[18].mxu0 %v1976_v22  ;;  %1561 = vmatprep.subr.bf16.mxu1 %v1532_v43  ;;  %v459_v22 = vld [vmem:[%s2336_s1 + $0x440] sm:$0xff] }
  0x4f   : > { %859 = vmatmul.mubr.f32.gmra.mrb[18].mxu1 %v1944_v8  ;;  %1535 = vmatpush3.bf16.msra.mxu0 %v1532_v43  ;;  %v1544_v8 = vpack.c.bf16 %v460_v50, %v459_v22 }
  0x50   : > { %1569 = vmatpush3.bf16.msra.mxu1 %v1532_v43  ;;  %758 = vmatprep.mubr.f32.mxu0 %v2052_v57 }
  0x51   : > { %863 = vmatprep.mubr.f32.mxu1 %v2067_v0  ;;  %1537 = vmatprep.subr.bf16.mxu0 %v1536_v16 }
  0x52   : > { %759 = vmatmul.mubr.f32.gmra.mrb[20].mxu0 %v2020_v42  ;;  %1562 = vmatprep.subr.bf16.mxu1 %v1536_v16  ;;  %v461_v42 = vld [vmem:[%s2336_s1 + $0x450] sm:$0xff] }
  0x53   : > { %864 = vmatmul.mubr.f32.gmra.mrb[20].mxu1 %v1987_v29  ;;  %1539 = vmatpush3.bf16.msra.mxu0 %v1536_v16  ;;  %v1548_v29 = vpack.c.bf16 %v462_v51, %v461_v42 }
  0x54   : > { %1570 = vmatpush3.bf16.msra.mxu1 %v1536_v16  ;;  %763 = vmatprep.mubr.f32.mxu0 %v2104_v20 }
  0x55   : > { %868 = vmatprep.mubr.f32.mxu1 %v2119_v30  ;;  %1541 = vmatprep.subr.bf16.mxu0 %v1540_v53 }
  0x56   : > { %764 = vmatmul.mubr.f32.gmra.mrb[22].mxu0 %v2067_v0  ;;  %1563 = vmatprep.subr.bf16.mxu1 %v1540_v53  ;;  %v463_v0 = vld [vmem:[%s2336_s1 + $0x460] sm:$0xff] }
  0x57   : > { %869 = vmatmul.mubr.f32.gmra.mrb[22].mxu1 %v2031_v48  ;;  %1543 = vmatpush3.bf16.msra.mxu0 %v1540_v53  ;;  %v1552_v48 = vpack.c.bf16 %v464_v52, %v463_v0 }
  0x58   : > { %1571 = vmatpush3.bf16.msra.mxu1 %v1540_v53  ;;  %768 = vmatprep.mubr.f32.mxu0 %v2141_v40 }
  0x59   : > { %873 = vmatprep.mubr.f32.mxu1 %v2155_v49  ;;  %1545 = vmatprep.subr.bf16.mxu0 %v1544_v8 }
  0x5a   : > { %769 = vmatmul.mubr.f32.gmra.mrb[24].mxu0 %v2119_v30  ;;  %1564 = vmatprep.subr.bf16.mxu1 %v1544_v8  ;;  %v309_v30 = vrot.slane %v2128_v34, 2 }
  0x5b   : > { %874 = vmatmul.mubr.f32.gmra.mrb[24].mxu1 %v2075_v6  ;;  %1547 = vmatpush3.bf16.msra.mxu0 %v1544_v8  ;;  %v466_v6 = vld [vmem:[%s2336_s1 + $0x478] sm:$0xff] }
  0x5c   : > { %1572 = vmatpush3.bf16.msra.mxu1 %v1544_v8  ;;  %773 = vmatprep.mubr.f32.mxu0 %v2199_v14  ;;  %v311_v47 = vsel %vm270_vm1, %v309_v30, %v310_v54 }
  0x5d   : > { %878 = vmatprep.mubr.f32.mxu1 %v2213_v23  ;;  %1549 = vmatprep.subr.bf16.mxu0 %v1548_v29 }
  0x5e   : > { %774 = vmatmul.mubr.f32.gmra.mrb[26].mxu0 %v2155_v49  ;;  %1565 = vmatprep.subr.bf16.mxu1 %v1548_v29  ;;  %v1556_v49 = vpack.c.bf16 %v466_v6, %v465_v56 }
  0x5f   : > { %879 = vmatmul.mubr.f32.gmra.mrb[26].mxu1 %v2115_v28  ;;  %1551 = vmatpush3.bf16.msra.mxu0 %v1548_v29 }
  0x60   : > { %1573 = vmatpush3.bf16.msra.mxu1 %v1548_v29  ;;  %778 = vmatprep.mubr.f32.mxu0 %v2231_v35 }
  0x61   : > { %883 = vmatprep.mubr.f32.mxu1 %v2184_v5  ;;  %1553 = vmatprep.subr.bf16.mxu0 %v1552_v48 }
  0x62   : > { %779 = vmatmul.mubr.f32.gmra.mrb[28].mxu0 %v2213_v23  ;;  %1566 = vmatprep.subr.bf16.mxu1 %v1552_v48 }
  0x63   : > { %884 = vmatmul.mubr.f32.gmra.mrb[28].mxu1 %v2128_v34  ;;  %1555 = vmatpush3.bf16.msra.mxu0 %v1552_v48 }
  0x64   : > { %1574 = vmatpush3.bf16.msra.mxu1 %v1552_v48  ;;  %783 = vmatprep.mubr.f32.mxu0 %v311_v47 }
  0x65   : > { %888 = vmatprep.mubr.f32.mxu1 %v2195_v13  ;;  %1557 = vmatprep.subr.bf16.mxu0 %v1556_v49 }
  0x66   : > { %784 = vmatmul.mubr.f32.gmra.mrb[30].mxu0 %v2184_v5  ;;  %1567 = vmatprep.subr.bf16.mxu1 %v1556_v49 }
  0x67   : > { %889 = vmatmul.mubr.f32.gmra.mrb[30].mxu1 %v2163_v55  ;;  %1559 = vmatpush3.bf16.msra.mxu0 %v1556_v49  ;;  %v1104_v55 = vld [vmem:[%s2337_s2] ss:$0 sm:$0xff] }
  0x68   : > { %1575 = vmatpush3.bf16.msra.mxu1 %v1556_v49  ;;  %1388 = vmatprep.mubr.f32.mxu0 %v2008_v36 }
  0x69   : > { %1394 = vmatprep.mubr.f32.mxu1 %v2199_v14 }
  0x6a   : > { %1389 = vmatmul.mubr.f32.vlgmr.msra.gmra.mrb[32].mxu0 %v2052_v57 }
  0x6b   : > { %1395 = vmatmul.mubr.f32.vlgmr.msra.gmra.mrb[32].mxu1 %v2231_v35  ;;  %1391 = vmatprep.mubr.f32.mxu0 %v2104_v20 }
  0x6c   : > { %1397 = vmatprep.mubr.f32.mxu1 %v311_v47 }
  0x6e   : > { %1392 = vmatmul.mubr.f32.gmra.mrb[34].mxu0 %v2141_v40 }
  0x6f   : > { %1398 = vmatmul.mubr.f32.gmra.mrb[34].mxu1 %v2209_v21 }
  0xfd   : > { %v1140_v28 = vpop.f32.mrb[0].mxu0 }
  0xfe   : > { %v1196_v34 = vpop.f32.mrb[0].mxu1  ;;  %v1141_v36 = vpop.f32.mrb[1].mxu0 }
  0xff   : > { %v1142_v58 = vadd.f32 %v1141_v36, %v1140_v28  ;;  %v1197_v59 = vpop.f32.mrb[1].mxu1 }
 0x100   : > { %v1198_v60 = vadd.f32 %v1197_v59, %v1196_v34 }
 0x101   : > { %v541_v57 = vadd.f32 %v1142_v58, %v1104_v55  ;;  %v1143_v61 = vpop.f32.mrb[2].mxu0 }
 0x102   : > { %v1199_v62 = vpop.f32.mrb[2].mxu1  ;;  %v1144_v63 = vpop.f32.mrb[3].mxu0 }
 0x103   : > { %v646_v20 = vadd.f32 %v1198_v60, %v541_v57  ;;  %v1145_v1 = vadd.f32 %v1144_v63, %v1143_v61  ;;  %v1200_v3 = vpop.f32.mrb[3].mxu1 }
 0x104   : > { %v1201_v40 = vadd.f32 %v1200_v3, %v1199_v62 }
 0x105   : > { %v546_v4 = vadd.f32 %v1145_v1, %v1104_v55  ;;  %v1146_v5 = vpop.f32.mrb[4].mxu0 }
 0x106   : > { %v1202_v7 = vpop.f32.mrb[4].mxu1  ;;  %v1147_v9 = vpop.f32.mrb[5].mxu0 }
 0x107   : > { %v651_v10 = vadd.f32 %v1201_v40, %v546_v4  ;;  %v1148_v11 = vadd.f32 %v1147_v9, %v1146_v5  ;;  %v1203_v12 = vpop.f32.mrb[5].mxu1 }
 0x108   : > { %v1204_v13 = vadd.f32 %v1203_v12, %v1202_v7 }
 0x109   : > { %v551_v14 = vadd.f32 %v1148_v11, %v1104_v55  ;;  %v1149_v15 = vpop.f32.mrb[6].mxu0 }
 0x10a   : > { %v1205_v17 = vpop.f32.mrb[6].mxu1  ;;  %v1150_v18 = vpop.f32.mrb[7].mxu0 }
 0x10b   : > { %v656_v19 = vadd.f32 %v1204_v13, %v551_v14  ;;  %v1151_v21 = vadd.f32 %v1150_v18, %v1149_v15  ;;  %v1206_v23 = vpop.f32.mrb[7].mxu1 }
 0x10c   : > { %v1207_v25 = vadd.f32 %v1206_v23, %v1205_v17 }
 0x10d   : > { %v556_v26 = vadd.f32 %v1151_v21, %v1104_v55  ;;  %v1152_v27 = vpop.f32.mrb[8].mxu0 }
 0x10e   : > { %v1208_v31 = vpop.f32.mrb[8].mxu1  ;;  %v1153_v32 = vpop.f32.mrb[9].mxu0 }
 0x10f   : > { %v661_v33 = vadd.f32 %v1207_v25, %v556_v26  ;;  %v1154_v24 = vadd.f32 %v1153_v32, %v1152_v27  ;;  %v1209_v35 = vpop.f32.mrb[9].mxu1 }
 0x110   : > { %v1210_v37 = vadd.f32 %v1209_v35, %v1208_v31 }
 0x111   : > { %v561_v38 = vadd.f32 %v1154_v24, %v1104_v55  ;;  %v1155_v39 = vpop.f32.mrb[10].mxu0 }
 0x112   : > { %v1211_v41 = vpop.f32.mrb[10].mxu1  ;;  %v1156_v43 = vpop.f32.mrb[11].mxu0 }
 0x113   : > { %v666_v44 = vadd.f32 %v1210_v37, %v561_v38  ;;  %v1157_v45 = vadd.f32 %v1156_v43, %v1155_v39  ;;  %v1212_v16 = vpop.f32.mrb[11].mxu1 }
 0x114   : > { %v1213_v2 = vadd.f32 %v1212_v16, %v1211_v41 }
 0x115   : > { %v566_v46 = vadd.f32 %v1157_v45, %v1104_v55  ;;  %v1158_v53 = vpop.f32.mrb[12].mxu0 }
 0x116   : > { %v1214_v22 = vpop.f32.mrb[12].mxu1  ;;  %v1159_v50 = vpop.f32.mrb[13].mxu0 }
 0x117   : > { %v671_v8 = vadd.f32 %v1213_v2, %v566_v46  ;;  %v1160_v42 = vadd.f32 %v1159_v50, %v1158_v53  ;;  %v1215_v51 = vpop.f32.mrb[13].mxu1 }
 0x118   : > { %v1216_v29 = vadd.f32 %v1215_v51, %v1214_v22 }
 0x119   : > { %v571_v0 = vadd.f32 %v1160_v42, %v1104_v55  ;;  %v1161_v52 = vpop.f32.mrb[14].mxu0 }
 0x11a   : > { %v1217_v48 = vpop.f32.mrb[14].mxu1  ;;  %v1162_v30 = vpop.f32.mrb[15].mxu0 }
 0x11b   : > { %v676_v54 = vadd.f32 %v1216_v29, %v571_v0  ;;  %v1163_v56 = vadd.f32 %v1162_v30, %v1161_v52  ;;  %v1218_v6 = vpop.f32.mrb[15].mxu1 }
 0x11c   : > { %v1219_v47 = vadd.f32 %v1218_v6, %v1217_v48 }
 0x11d   : > { %v576_v49 = vadd.f32 %v1163_v56, %v1104_v55  ;;  %v1252_v28 = vpop.f32.mrb[16].mxu0 }
 0x11e   : > { %v1308_v34 = vpop.f32.mrb[16].mxu1  ;;  %v1253_v36 = vpop.f32.mrb[17].mxu0 }
 0x11f   : > { %v681_v58 = vadd.f32 %v1219_v47, %v576_v49  ;;  %v1254_v59 = vadd.f32 %v1253_v36, %v1252_v28  ;;  %v1309_v60 = vpop.f32.mrb[17].mxu1 }
 0x120   : > { %v1310_v57 = vadd.f32 %v1309_v60, %v1308_v34 }
 0x121   : > { %v751_v61 = vadd.f32 %v1254_v59, %v646_v20  ;;  %v1255_v62 = vpop.f32.mrb[18].mxu0 }
 0x122   : > { %v1311_v63 = vpop.f32.mrb[18].mxu1  ;;  %v1256_v1 = vpop.f32.mrb[19].mxu0 }
 0x123   : > { %v1257_v3 = vadd.f32 %v1256_v1, %v1255_v62  ;;  %v1312_v40 = vpop.f32.mrb[19].mxu1  ;;  %v856_v4 = vadd.f32 %v1310_v57, %v751_v61 }
 0x124   : > { %v1313_v5 = vadd.f32 %v1312_v40, %v1311_v63 }
 0x125   : > { %v756_v7 = vadd.f32 %v1257_v3, %v651_v10  ;;  %v1258_v9 = vpop.f32.mrb[20].mxu0 }
 0x126   : > { %v1314_v11 = vpop.f32.mrb[20].mxu1  ;;  %v1259_v12 = vpop.f32.mrb[21].mxu0 }
 0x127   : > { %v1260_v55 = vadd.f32 %v1259_v12, %v1258_v9  ;;  %v1315_v13 = vpop.f32.mrb[21].mxu1  ;;  %v861_v14 = vadd.f32 %v1313_v5, %v756_v7 }
 0x128   : > { %v1316_v15 = vadd.f32 %v1315_v13, %v1314_v11 }
 0x129   : > { %v761_v17 = vadd.f32 %v1260_v55, %v656_v19  ;;  %v1261_v18 = vpop.f32.mrb[22].mxu0 }
 0x12a   : > { %v1317_v21 = vpop.f32.mrb[22].mxu1  ;;  %v1262_v23 = vpop.f32.mrb[23].mxu0 }
 0x12b   : > { %v1263_v20 = vadd.f32 %v1262_v23, %v1261_v18  ;;  %v1318_v25 = vpop.f32.mrb[23].mxu1  ;;  %v866_v26 = vadd.f32 %v1316_v15, %v761_v17 }
 0x12c   : > { %v1319_v27 = vadd.f32 %v1318_v25, %v1317_v21 }
 0x12d   : > { %v766_v31 = vadd.f32 %v1263_v20, %v661_v33  ;;  %v1264_v32 = vpop.f32.mrb[24].mxu0 }
 0x12e   : > { %v1320_v24 = vpop.f32.mrb[24].mxu1  ;;  %v1265_v35 = vpop.f32.mrb[25].mxu0 }
 0x12f   : > { %v1266_v10 = vadd.f32 %v1265_v35, %v1264_v32  ;;  %v1321_v37 = vpop.f32.mrb[25].mxu1  ;;  %v871_v38 = vadd.f32 %v1319_v27, %v766_v31 }
 0x130   : > { %v1322_v39 = vadd.f32 %v1321_v37, %v1320_v24 }
 0x131   : > { %v771_v41 = vadd.f32 %v1266_v10, %v666_v44  ;;  %v1267_v43 = vpop.f32.mrb[26].mxu0 }
 0x132   : > { %v1323_v45 = vpop.f32.mrb[26].mxu1  ;;  %v1268_v16 = vpop.f32.mrb[27].mxu0 }
 0x133   : > { %v1269_v19 = vadd.f32 %v1268_v16, %v1267_v43  ;;  %v1324_v2 = vpop.f32.mrb[27].mxu1  ;;  %v876_v46 = vadd.f32 %v1322_v39, %v771_v41 }
 0x134   : > { %v1325_v53 = vadd.f32 %v1324_v2, %v1323_v45 }
 0x135   : > { %v776_v22 = vadd.f32 %v1269_v19, %v671_v8  ;;  %v1270_v50 = vpop.f32.mrb[28].mxu0 }
 0x136   : > { %v1326_v42 = vpop.f32.mrb[28].mxu1  ;;  %v1271_v33 = vpop.f32.mrb[29].mxu0 }
 0x137   : > { %v1272_v51 = vadd.f32 %v1271_v33, %v1270_v50  ;;  %v1327_v29 = vpop.f32.mrb[29].mxu1  ;;  %v881_v0 = vadd.f32 %v1325_v53, %v776_v22 }
 0x138   : > { %v1328_v52 = vadd.f32 %v1327_v29, %v1326_v42 }
 0x139   : > { %v781_v48 = vadd.f32 %v1272_v51, %v676_v54  ;;  %v1273_v30 = vpop.f32.mrb[30].mxu0 }
 0x13a   : > { %v1329_v56 = vpop.f32.mrb[30].mxu1  ;;  %v1274_v44 = vpop.f32.mrb[31].mxu0 }
 0x13b   : > { %v1275_v6 = vadd.f32 %v1274_v44, %v1273_v30  ;;  %v1330_v47 = vpop.f32.mrb[31].mxu1  ;;  %v886_v49 = vadd.f32 %v1328_v52, %v781_v48 }
 0x13c   : > { %v1331_v28 = vadd.f32 %v1330_v47, %v1329_v56 }
 0x13d   : > { %v786_v34 = vadd.f32 %v1275_v6, %v681_v58  ;;  %v1390_v36 = vpop.f32.mrb[32].mxu0 }
 0x13e   : > { %v966_v8 = vadd.f32 %v1390_v36, %v861_v14  ;;  %v1396_v59 = vpop.f32.mrb[32].mxu1  ;;  %v960_v60 = vpop.f32.mrb[33].mxu0 }
 0x13f   : > { %v986_v57 = vadd.f32 %v1396_v59, %v881_v0  ;;  %v961_v61 = vadd.f32 %v960_v60, %v856_v4  ;;  %v980_v54 = vpop.f32.mrb[33].mxu1  ;;  %v891_v62 = vadd.f32 %v1331_v28, %v786_v34 }
 0x140   : > { %v1000_v63 = vmax.f32 %v966_v8, 0.0  ;;  %v981_v1 = vadd.f32 %v980_v54, %v876_v46 }
 0x141   : > { %v1004_v3 = vmax.f32 %v986_v57, 0.0  ;;  %v999_v40 = vmax.f32 %v961_v61, 0.0  ;;  %v1393_v5 = vpop.f32.mrb[34].mxu0 }
 0x142   : > { %1008 = vst [vmem:[%s199_s19 + $0x8] sm:$0xff] %v1000_v63  ;;  %v1003_v7 = vmax.f32 %v981_v1, 0.0  ;;  %v976_v58 = vadd.f32 %v1393_v5, %v871_v38  ;;  %v1399_v9 = vpop.f32.mrb[34].mxu1  ;;  %v970_v11 = vpop.f32.mrb[35].mxu0 }
 0x143   : > { %1012 = vst [vmem:[%s199_s19 + $0x28] sm:$0xff] %v1004_v3  ;;  %1007 = vst [vmem:[%s199_s19] sm:$0xff] %v999_v40  ;;  %v996_v12 = vadd.f32 %v1399_v9, %v891_v62  ;;  %v971_v55 = vadd.f32 %v970_v11, %v866_v26  ;;  %v990_v13 = vpop.f32.mrb[35].mxu1 }
 0x144   : > { %1011 = vst [vmem:[%s199_s19 + $0x20] sm:$0xff] %v1003_v7  ;;  %v1002_v14 = vmax.f32 %v976_v58, 0.0  ;;  %v991_v4 = vadd.f32 %v990_v13, %v886_v49 }
 0x145   : > { %v1006_v15 = vmax.f32 %v996_v12, 0.0  ;;  %v1001_v17 = vmax.f32 %v971_v55, 0.0 }
 0x146   : > { %1010 = vst [vmem:[%s199_s19 + $0x18] sm:$0xff] %v1002_v14  ;;  %v1005_v18 = vmax.f32 %v991_v4, 0.0 }
 0x147   : > { %1014 = vst [vmem:[%s199_s19 + $0x38] sm:$0xff] %v1006_v15  ;;  %1009 = vst [vmem:[%s199_s19 + $0x10] sm:$0xff] %v1001_v17 }
 0x148   : > { %1013 = vst [vmem:[%s199_s19 + $0x30] sm:$0xff] %v1005_v18 }
 0x149 PF: > { %s13_s14 = sadd.s32 1, %s1623_s14   ;;  %s2339_s12 = smov %s1619_s13 }
 0x14a   : > { %p10_p5 = scmp.ge.s32.totalorder %s13_s14, 4   ;;  %s2340_s13 = smov %s2342_s15 }
 0x14c   :  { %12 = sbr.rel (!%p10_p5) target bundleno = 2 (0x2), region = 62 }

</bundles_post_ra>
